<compile_context>
chip_gen: v7x
topology: tpu7x:2x2x1
jax: 0.10.0
libtpu: 0.0.40
codegen_flags: <defaults>
</compile_context>

<pallas_src>
import functools
import math

import numpy as np
import jax
import jax.numpy as jnp
from jax import lax
from jax.experimental import pallas as pl
from jax.experimental.pallas import tpu as pltpu

# -------------------- config (small, consistent with the module) --------------------
B = 2          # batch
S = 8          # wordpiece sequence length
V = 50         # vocab size
D = 32         # emb_dim
HEADS = 4      # attention heads
DH = D // HEADS
FF_DIM = 64    # transformer feed-forward dim
LAYERS = 2     # encoder layers
HD = 32        # syntax head/rel hidden dim
R = 5          # number of relation labels (rel_dim)
LN_EPS = 1e-12
NEG_INF = -1e30      # additive key-padding / decode mask value
OUT_LANES = 128      # lane-dense packed output width (head block | rel block)
REL_OFFSET = OUT_LANES // 2


# ============================= fused Pallas kernel =============================

def _layer_norm(x, g, b, eps):
    mean = jnp.mean(x, axis=-1, keepdims=True)
    var = jnp.mean((x - mean) ** 2, axis=-1, keepdims=True)
    return (x - mean) * lax.rsqrt(var + eps) * g + b


def bert_syntax_kernel(we_ref, pe_ref, eg_ref, eb_ref,               # embeddings + emb LN
                       bias_ref, sel_ref, tmask_ref, given_ref,      # attn bias / word sel / decode
                       wqkv_ref, bqkv_ref, wo_ref, bo_ref, g1_ref, b1_ref,
                       w1_ref, bf1_ref, w2_ref, bf2_ref, g2_ref, b2_ref,   # stacked [L, ...]
                       wproj_ref, bproj_ref, rootp_ref, hk_ref, rk_ref,    # fused syntax heads
                       out_ref,
                       *, heads, eps, n_batch, n_words, use_given_head):
    f32 = jnp.float32

    # ---- emb: word emb + position emb -> LayerNorm (dropout = identity, inference) ----
    x = we_ref[...] + pe_ref[...]                                     # [B*S, D]
    x = _layer_norm(x, eg_ref[...], eb_ref[...], eps)
    m, d = x.shape
    dh = d // heads

    # additive attention bias (block-diagonal batch mask + key padding), hoisted.
    bias = bias_ref[...]                                              # [B*S, B*S]

    # ---- encoder: LAYERS x post-LN TransformerEncoderLayer (gelu) ----
    n_layers = wqkv_ref.shape[0]
    for l in range(n_layers):                                         # static loop, weights stay in VMEM
        qkv = jnp.dot(x, wqkv_ref[l], preferred_element_type=f32) + bqkv_ref[l]   # [M, 3D]
        ctx_parts = []
        for h in range(heads):                                        # static lane slices, no relayouts
            qh = qkv[:, h * dh:(h + 1) * dh]                          # Q already scaled (folded in wqkv)
            kh = qkv[:, d + h * dh: d + (h + 1) * dh]
            vh = qkv[:, 2 * d + h * dh: 2 * d + (h + 1) * dh]
            sc = lax.dot_general(qh, kh, (((1,), (1,)), ((), ())),
                                 preferred_element_type=f32)          # [M, M] = q @ k^T (no transpose op)
            sc = sc + bias
            sc = sc - jnp.max(sc, axis=-1, keepdims=True)
            p = jnp.exp(sc)
            p = p * pl.reciprocal(jnp.sum(p, axis=-1, keepdims=True), approx=True)
            ctx_parts.append(jnp.dot(p, vh, preferred_element_type=f32))          # [M, dh]
        ctx = jnp.concatenate(ctx_parts, axis=-1)                     # [M, D]

        attn = jnp.dot(ctx, wo_ref[l], preferred_element_type=f32) + bo_ref[l]
        y = _layer_norm(x + attn, g1_ref[l], b1_ref[l], eps)

        h1 = jnp.dot(y, w1_ref[l], preferred_element_type=f32) + bf1_ref[l]
        # exact (erf) GELU, matching torch F.gelu default
        h1 = 0.5 * h1 * (1.0 + lax.erf(h1 * (1.0 / math.sqrt(2.0))))
        ff = jnp.dot(h1, w2_ref[l], preferred_element_type=f32) + bf2_ref[l]
        x = _layer_norm(y + ff, g2_ref[l], b2_ref[l], eps)

    # ---- pad_masked: left-compact word positions (block-diag one-hot matmul), all batches ----
    x_words = jnp.dot(sel_ref[...], x, preferred_element_type=f32)    # [B*W, D]

    hd = hk_ref.shape[0]
    r_dim = rk_ref.shape[1] // hd
    w = n_words

    # fused projections: columns = [ head_h | head_t | rel_h | rel_t ], relu
    wp = jnp.maximum(jnp.dot(x_words, wproj_ref[...], preferred_element_type=f32)
                     + bproj_ref[...], 0.0)                           # [B*W, 4*HD]
    # head query side: relu(x Wh + bh) @ kernel  (root query row is stripped -> words only)
    hkq = jnp.dot(wp[:, :hd], hk_ref[...], preferred_element_type=f32)            # [B*W, HD]

    col = lax.broadcasted_iota(jnp.int32, (w, w + 1), 1)              # [W, W+1]
    hs_list, rh_list = [], []
    for b in range(n_batch):                                          # static tiny loop (B=2)
        wp_b = wp[b * w:(b + 1) * w]                                  # [W, 4*HD]
        # key/tail side with root row prepended (root projection precomputed -> constant row)
        t_b = jnp.concatenate([rootp_ref[:, hd:2 * hd], wp_b[:, hd:2 * hd]], axis=0)   # [W+1, HD]
        hs_b = lax.dot_general(hkq[b * w:(b + 1) * w], t_b, (((1,), (1,)), ((), ())),
                               preferred_element_type=f32)            # [W, W+1]
        hs_list.append(hs_b)

        # head decode (greedy argmax over valid candidates; root always valid) or teacher forcing
        if use_given_head:
            head_id = given_ref[b]                                    # [W, 1] int32
        else:
            mask_ext = jnp.concatenate([jnp.ones((1, 1), f32), tmask_ref[b]], axis=-1)  # [1, W+1]
            masked = jnp.where(mask_ext > 0.5, hs_b, NEG_INF)
            mx = jnp.max(masked, axis=-1, keepdims=True)
            cand = jnp.where(masked >= mx, col, jnp.int32(w + 1))
            head_id = jnp.min(cand, axis=-1, keepdims=True)           # first argmax, [W, 1]
        onehot = (col == head_id).astype(f32)                         # [W, W+1]

        # gather head-token rel projections (relu commutes with row selection)
        rh_pool = jnp.concatenate([rootp_ref[:, 2 * hd:3 * hd], wp_b[:, 2 * hd:3 * hd]], axis=0)
        rh_list.append(jnp.dot(onehot, rh_pool, preferred_element_type=f32))      # [W, HD]

    # one biaffine kernel matmul for both batches
    rhk = jnp.dot(jnp.concatenate(rh_list, axis=0), rk_ref[...],
                  preferred_element_type=f32)                         # [B*W, HD*R] (relation-major cols)

    pad_rows = out_ref.shape[1] - w
    half = out_ref.shape[2] // 2
    for b in range(n_batch):
        rt_b = wp[b * w:(b + 1) * w, 3 * hd:4 * hd]                   # [W, HD]
        rhk_b = rhk[b * w:(b + 1) * w]
        # static lane slices over relations (no [W, R, HD] reshape)
        rel_b = jnp.concatenate(
            [jnp.sum(rhk_b[:, r * hd:(r + 1) * hd] * rt_b, axis=-1, keepdims=True)
             for r in range(r_dim)], axis=-1)                          # [W, R]

        # pack into a lane-dense [8, 128] slab -> single unmasked full-tile store
        hs_pad = jnp.concatenate([hs_list[b],
                                  jnp.zeros((w, half - (w + 1)), f32)], axis=-1)   # [W, 64]
        rel_pad = jnp.concatenate([rel_b,
                                   jnp.zeros((w, half - r_dim), f32)], axis=-1)    # [W, 64]
        rows = jnp.concatenate([hs_pad, rel_pad], axis=-1)             # [W, 128]
        slab = jnp.concatenate([rows, jnp.zeros((pad_rows, 2 * half), f32)], axis=0)  # [8, 128]
        out_ref[b] = slab


# ============================= JAX glue + pallas_call wrapper =============================

def _word_select(word_mask, max_words):
    """One-hot selection matrix implementing slovnet pad_masked (left-compact, zero pad)."""
    wm = word_mask.astype(jnp.int32)
    rank = jnp.cumsum(wm, axis=-1) - wm                               # 0-based rank of each word start
    w_idx = jnp.arange(max_words, dtype=jnp.int32)[None, :, None]     # [1, W, 1]
    sel = (rank[:, None, :] == w_idx) & word_mask[:, None, :]         # [B, W, S]
    return sel.astype(jnp.float32)


def prepare_params(raw):
    """One-time constant transforms: fold attention scale into wqkv, fuse syntax-head
    projection weights, precompute root-row projections."""
    d = raw["word_emb"].shape[1]
    dh = d // HEADS
    scale = 1.0 / math.sqrt(dh)

    enc = dict(raw["enc"])
    enc["wqkv"] = enc["wqkv"].at[:, :, :d].multiply(scale)            # scale Q columns only
    enc["bqkv"] = enc["bqkv"].at[:, :, :d].multiply(scale)

    hp, rp = raw["head"], raw["rel"]

    def root_ff(root, wgt, bias):
        return jnp.maximum(jnp.dot(root, wgt) + bias, 0.0)

    wproj = jnp.concatenate([hp["wh"], hp["wt"], rp["wh"], rp["wt"]], axis=1)     # [D, 4*HD]
    bproj = jnp.concatenate([hp["bh"], hp["bt"], rp["bh"], rp["bt"]], axis=1)     # [1, 4*HD]
    root_proj = jnp.concatenate([root_ff(hp["root"], hp["wh"], hp["bh"]),
                                 root_ff(hp["root"], hp["wt"], hp["bt"]),
                                 root_ff(rp["root"], rp["wh"], rp["bh"]),
                                 root_ff(rp["root"], rp["wt"], rp["bt"])], axis=1)  # [1, 4*HD]

    return {
        "word_emb": raw["word_emb"], "pos_emb": raw["pos_emb"],
        "emb_g": raw["emb_g"], "emb_b": raw["emb_b"],
        "enc": enc,
        "wproj": wproj, "bproj": bproj, "root_proj": root_proj,
        "hkernel": hp["kernel"], "rkernel": rp["kernel"],             # rel kernel cols relation-major
    }


def bert_syntax_forward(params, input_ids, word_mask, pad_mask, target_mask, max_words,
                        target_head_id=None):
    bsz, seq = input_ids.shape
    d = params["word_emb"].shape[1]
    w = int(max_words)   # TODO(synk): torch pad_masked length is data-dependent; static here.
    hd = params["hkernel"].shape[0]
    rel_dim = params["rkernel"].shape[1] // hd
    out_rows = ((w + 7) // 8) * 8                                     # sublane-padded query rows

    # vocabulary embedding gather + position embedding tiling (glue), batch folded into rows
    we = jnp.take(params["word_emb"], input_ids.reshape(-1), axis=0)  # [B*S, D]
    pe = jnp.tile(params["pos_emb"], (bsz, 1))                        # [B*S, D]

    # block-diagonal batch mask + key-padding mask as one additive bias (assumes trailing padding)
    batch_ids = jnp.repeat(jnp.arange(bsz, dtype=jnp.int32), seq)     # [B*S]
    valid_key = jnp.logical_not(pad_mask).reshape(-1)                 # [B*S]
    attn_bias = jnp.where((batch_ids[:, None] == batch_ids[None, :]) & valid_key[None, :],
                          0.0, NEG_INF).astype(jnp.float32)           # [B*S, B*S]

    # block-diagonal word-selection one-hot implementing pad_masked for the folded layout
    sel = _word_select(word_mask, w)                                  # [B, W, S]
    eye_b = jnp.eye(bsz, dtype=jnp.float32)
    sel_all = (eye_b[:, None, :, None] * sel[:, :, None, :]).reshape(bsz * w, bsz * seq)

    tmask = target_mask.astype(jnp.float32)[:, None, :]               # [B, 1, W]
    if target_head_id is None:
        use_given = False
        given = jnp.zeros((bsz, w, 1), jnp.int32)
    else:
        use_given = True
        given = target_head_id.astype(jnp.int32)[:, :, None]          # [B, W, 1]

    enc = params["enc"]
    kern = functools.partial(bert_syntax_kernel, heads=HEADS, eps=LN_EPS,
                             n_batch=bsz, n_words=w, use_given_head=use_given)

    # Single grid-less pallas_call: all inputs (<1 MiB) live in VMEM for the whole kernel.
    # (On v7x one could benchmark a grid=(B,) "parallel" split; at these sizes the fused
    #  single-core version is expected to win, so we keep the collapsed grid.)
    packed = pl.pallas_call(
        kern,
        out_shape=jax.ShapeDtypeStruct((bsz, out_rows, OUT_LANES), jnp.float32),
    )(we, pe, params["emb_g"], params["emb_b"],
      attn_bias, sel_all, tmask, given,
      enc["wqkv"], enc["bqkv"], enc["wo"], enc["bo"], enc["g1"], enc["b1"],
      enc["w1"], enc["bf1"], enc["w2"], enc["bf2"], enc["g2"], enc["b2"],
      params["wproj"], params["bproj"], params["root_proj"],
      params["hkernel"], params["rkernel"])

    head_scores = packed[:, :w, :w + 1]                               # [B, W, W+1]
    rel_scores = packed[:, :w, REL_OFFSET:REL_OFFSET + rel_dim]       # [B, W, R]
    return {"head_id": head_scores, "rel_id": rel_scores}             # SyntaxPred


# ============================= params =============================

def init_params(key):
    keys = iter(jax.random.split(key, 64))

    def rnd(shape, scale=0.02):
        return (scale * jax.random.normal(next(keys), shape)).astype(jnp.float32)

    params = {
        "word_emb": rnd((V, D), 0.1),
        "pos_emb": rnd((S, D), 0.1),
        "emb_g": jnp.ones((1, D), jnp.float32),
        "emb_b": jnp.zeros((1, D), jnp.float32),
        # encoder-layer weights pre-stacked with a leading [LAYERS, ...] axis
        "enc": {
            "wqkv": rnd((LAYERS, D, 3 * D)), "bqkv": jnp.zeros((LAYERS, 1, 3 * D), jnp.float32),
            "wo": rnd((LAYERS, D, D)), "bo": jnp.zeros((LAYERS, 1, D), jnp.float32),
            "g1": jnp.ones((LAYERS, 1, D), jnp.float32), "b1": jnp.zeros((LAYERS, 1, D), jnp.float32),
            "w1": rnd((LAYERS, D, FF_DIM)), "bf1": jnp.zeros((LAYERS, 1, FF_DIM), jnp.float32),
            "w2": rnd((LAYERS, FF_DIM, D)), "bf2": jnp.zeros((LAYERS, 1, D), jnp.float32),
            "g2": jnp.ones((LAYERS, 1, D), jnp.float32), "b2": jnp.zeros((LAYERS, 1, D), jnp.float32),
        },
        "head": {
            "wh": rnd((D, HD)), "bh": jnp.zeros((1, HD), jnp.float32),
            "wt": rnd((D, HD)), "bt": jnp.zeros((1, HD), jnp.float32),
            "kernel": jnp.eye(HD, dtype=jnp.float32),       # slovnet: init.eye_
            "root": rnd((1, D), 0.1),
        },
        "rel": {
            "wh": rnd((D, HD)), "bh": jnp.zeros((1, HD), jnp.float32),
            "wt": rnd((D, HD)), "bt": jnp.zeros((1, HD), jnp.float32),
            "kernel": rnd((HD, HD * R), 0.05),              # slovnet: xavier_uniform_
            "root": rnd((1, D), 0.1),
        },
    }
    return params


# ============================= main =============================

if __name__ == "__main__":
    key = jax.random.PRNGKey(0)
    k_params, k_ids = jax.random.split(key)
    params = prepare_params(init_params(k_params))

    # deterministic example inputs
    lengths = np.array([8, 6])
    pad_mask_np = np.arange(S)[None, :] >= lengths[:, None]            # True = pad position
    word_mask_np = np.zeros((B, S), dtype=bool)
    word_mask_np[0, [1, 2, 3, 4, 6]] = True                            # word starts
    word_mask_np[1, [1, 2, 3, 4]] = True
    max_words = int(word_mask_np.sum(-1).max())                        # static W (here 5)
    counts = word_mask_np.sum(-1)
    target_mask_np = np.arange(max_words)[None, :] < counts[:, None]   # [B, W]

    input_ids = jax.random.randint(k_ids, (B, S), 1, V)
    input_ids = jnp.where(jnp.asarray(pad_mask_np), 0, input_ids)      # pad id = 0

    fwd = jax.jit(functools.partial(bert_syntax_forward, max_words=max_words))
    out = fwd(
        params,
        input_ids,
        jnp.asarray(word_mask_np),
        jnp.asarray(pad_mask_np),
        jnp.asarray(target_mask_np),
    )
    out = jax.block_until_ready(out)

    assert out["head_id"].shape == (B, max_words, max_words + 1)
    assert out["rel_id"].shape == (B, max_words, R)
    assert bool(np.all(np.isfinite(np.asarray(out["head_id"]))))
    assert bool(np.all(np.isfinite(np.asarray(out["rel_id"]))))
    print("KERNEL_OK")
</pallas_src>

<mosaic_0001>
module attributes {stable_mosaic.version = 11 : i64} {
  func.func @bert_syntax_kernel(%arg0: memref<16x32xf32, #tpu.memory_space<vmem>>, %arg1: memref<16x32xf32, #tpu.memory_space<vmem>>, %arg2: memref<1x32xf32, #tpu.memory_space<vmem>>, %arg3: memref<1x32xf32, #tpu.memory_space<vmem>>, %arg4: memref<16x16xf32, #tpu.memory_space<vmem>>, %arg5: memref<10x16xf32, #tpu.memory_space<vmem>>, %arg6: memref<2x1x5xf32, #tpu.memory_space<vmem>>, %arg7: memref<2x5x1xi32, #tpu.memory_space<vmem>>, %arg8: memref<2x32x96xf32, #tpu.memory_space<vmem>>, %arg9: memref<2x1x96xf32, #tpu.memory_space<vmem>>, %arg10: memref<2x32x32xf32, #tpu.memory_space<vmem>>, %arg11: memref<2x1x32xf32, #tpu.memory_space<vmem>>, %arg12: memref<2x1x32xf32, #tpu.memory_space<vmem>>, %arg13: memref<2x1x32xf32, #tpu.memory_space<vmem>>, %arg14: memref<2x32x64xf32, #tpu.memory_space<vmem>>, %arg15: memref<2x1x64xf32, #tpu.memory_space<vmem>>, %arg16: memref<2x64x32xf32, #tpu.memory_space<vmem>>, %arg17: memref<2x1x32xf32, #tpu.memory_space<vmem>>, %arg18: memref<2x1x32xf32, #tpu.memory_space<vmem>>, %arg19: memref<2x1x32xf32, #tpu.memory_space<vmem>>, %arg20: memref<32x128xf32, #tpu.memory_space<vmem>>, %arg21: memref<1x128xf32, #tpu.memory_space<vmem>>, %arg22: memref<1x128xf32, #tpu.memory_space<vmem>>, %arg23: memref<32x32xf32, #tpu.memory_space<vmem>>, %arg24: memref<32x160xf32, #tpu.memory_space<vmem>>, %arg25: memref<2x8x128xf32, #tpu.memory_space<vmem>>) attributes {dimension_semantics = [], scalar_prefetch = 0 : i64, scratch_operands = 0 : i64, tpu.core_type = #tpu.core_type<tc>} {
    %c0 = arith.constant 0 : index
    %c0_0 = arith.constant 0 : index
    %0 = vector.load %arg0[%c0, %c0_0] : memref<16x32xf32, #tpu.memory_space<vmem>>, vector<16x32xf32>
    %c0_1 = arith.constant 0 : index
    %c0_2 = arith.constant 0 : index
    %1 = vector.load %arg1[%c0_1, %c0_2] : memref<16x32xf32, #tpu.memory_space<vmem>>, vector<16x32xf32>
    %2 = arith.addf %0, %1 : vector<16x32xf32>
    %c0_3 = arith.constant 0 : index
    %c0_4 = arith.constant 0 : index
    %3 = vector.load %arg2[%c0_3, %c0_4] : memref<1x32xf32, #tpu.memory_space<vmem>>, vector<1x32xf32>
    %c0_5 = arith.constant 0 : index
    %c0_6 = arith.constant 0 : index
    %4 = vector.load %arg3[%c0_5, %c0_6] : memref<1x32xf32, #tpu.memory_space<vmem>>, vector<1x32xf32>
    %cst = arith.constant dense<0.000000e+00> : vector<16xf32>
    %5 = vector.multi_reduction <add>, %2, %cst [1] : vector<16x32xf32> to vector<16xf32>
    %6 = vector.shape_cast %5 : vector<16xf32> to vector<16x1xf32>
    %cst_7 = arith.constant 3.200000e+01 : f32
    %7 = vector.broadcast %cst_7 : f32 to vector<16x1xf32>
    %8 = arith.divf %6, %7 : vector<16x1xf32>
    %9 = vector.broadcast %8 : vector<16x1xf32> to vector<16x32xf32>
    %10 = arith.subf %2, %9 : vector<16x32xf32>
    %11 = arith.mulf %10, %10 : vector<16x32xf32>
    %cst_8 = arith.constant dense<0.000000e+00> : vector<16xf32>
    %12 = vector.multi_reduction <add>, %11, %cst_8 [1] : vector<16x32xf32> to vector<16xf32>
    %13 = vector.shape_cast %12 : vector<16xf32> to vector<16x1xf32>
    %cst_9 = arith.constant 3.200000e+01 : f32
    %14 = vector.broadcast %cst_9 : f32 to vector<16x1xf32>
    %15 = arith.divf %13, %14 : vector<16x1xf32>
    %16 = vector.broadcast %8 : vector<16x1xf32> to vector<16x32xf32>
    %17 = arith.subf %2, %16 : vector<16x32xf32>
    %cst_10 = arith.constant 9.99999996E-13 : f32
    %18 = vector.broadcast %cst_10 : f32 to vector<16x1xf32>
    %19 = arith.addf %15, %18 : vector<16x1xf32>
    %20 = math.rsqrt %19 : vector<16x1xf32>
    %21 = vector.broadcast %20 : vector<16x1xf32> to vector<16x32xf32>
    %22 = arith.mulf %17, %21 : vector<16x32xf32>
    %23 = vector.broadcast %3 : vector<1x32xf32> to vector<16x32xf32>
    %24 = arith.mulf %22, %23 : vector<16x32xf32>
    %25 = vector.broadcast %4 : vector<1x32xf32> to vector<16x32xf32>
    %26 = arith.addf %24, %25 : vector<16x32xf32>
    %c0_11 = arith.constant 0 : index
    %c0_12 = arith.constant 0 : index
    %27 = vector.load %arg4[%c0_11, %c0_12] : memref<16x16xf32, #tpu.memory_space<vmem>>, vector<16x16xf32>
    %c0_13 = arith.constant 0 : index
    %c0_14 = arith.constant 0 : index
    %c0_15 = arith.constant 0 : index
    %28 = vector.load %arg8[%c0_13, %c0_14, %c0_15] : memref<2x32x96xf32, #tpu.memory_space<vmem>>, vector<1x32x96xf32>
    %29 = vector.shape_cast %28 : vector<1x32x96xf32> to vector<32x96xf32>
    %cst_16 = arith.constant dense<0.000000e+00> : vector<16x96xf32>
    %30 = tpu.matmul %26, %29, %cst_16 {dimension_numbers = #tpu.dot_dimension_numbers<[1], [0], [0], [1], [0, 0, 1, 1], [], []>} : vector<16x32xf32>, vector<32x96xf32>, vector<16x96xf32> -> vector<16x96xf32>
    %c0_17 = arith.constant 0 : index
    %c0_18 = arith.constant 0 : index
    %c0_19 = arith.constant 0 : index
    %31 = vector.load %arg9[%c0_17, %c0_18, %c0_19] : memref<2x1x96xf32, #tpu.memory_space<vmem>>, vector<1x1x96xf32>
    %32 = vector.shape_cast %31 : vector<1x1x96xf32> to vector<1x96xf32>
    %33 = vector.broadcast %32 : vector<1x96xf32> to vector<16x96xf32>
    %34 = arith.addf %30, %33 : vector<16x96xf32>
    %35 = vector.extract_strided_slice %34 {offsets = [0, 0], sizes = [16, 8], strides = [1, 1]} : vector<16x96xf32> to vector<16x8xf32>
    %36 = vector.extract_strided_slice %34 {offsets = [0, 32], sizes = [16, 8], strides = [1, 1]} : vector<16x96xf32> to vector<16x8xf32>
    %37 = vector.extract_strided_slice %34 {offsets = [0, 64], sizes = [16, 8], strides = [1, 1]} : vector<16x96xf32> to vector<16x8xf32>
    %cst_20 = arith.constant dense<0.000000e+00> : vector<16x16xf32>
    %38 = tpu.matmul %35, %36, %cst_20 {dimension_numbers = #tpu.dot_dimension_numbers<[1], [1], [0], [0], [0, 0, 1, 0], [], []>} : vector<16x8xf32>, vector<16x8xf32>, vector<16x16xf32> -> vector<16x16xf32>
    %39 = arith.addf %38, %27 : vector<16x16xf32>
    %cst_21 = arith.constant dense<0xFF800000> : vector<16xf32>
    %40 = vector.multi_reduction <maximumf>, %39, %cst_21 [1] : vector<16x16xf32> to vector<16xf32>
    %41 = vector.shape_cast %40 : vector<16xf32> to vector<16x1xf32>
    %42 = vector.broadcast %41 : vector<16x1xf32> to vector<16x16xf32>
    %43 = arith.subf %39, %42 : vector<16x16xf32>
    %44 = math.exp %43 : vector<16x16xf32>
    %cst_22 = arith.constant dense<0.000000e+00> : vector<16xf32>
    %45 = vector.multi_reduction <add>, %44, %cst_22 [1] : vector<16x16xf32> to vector<16xf32>
    %46 = vector.shape_cast %45 : vector<16xf32> to vector<16x1xf32>
    %47 = tpu.reciprocal %46 {approx = true} : vector<16x1xf32> -> vector<16x1xf32>
    %48 = vector.broadcast %47 : vector<16x1xf32> to vector<16x16xf32>
    %49 = arith.mulf %44, %48 : vector<16x16xf32>
    %cst_23 = arith.constant dense<0.000000e+00> : vector<16x8xf32>
    %50 = tpu.matmul %49, %37, %cst_23 {dimension_numbers = #tpu.dot_dimension_numbers<[1], [0], [0], [1], [0, 0, 1, 1], [], []>} : vector<16x16xf32>, vector<16x8xf32>, vector<16x8xf32> -> vector<16x8xf32>
    %51 = vector.extract_strided_slice %34 {offsets = [0, 8], sizes = [16, 8], strides = [1, 1]} : vector<16x96xf32> to vector<16x8xf32>
    %52 = vector.extract_strided_slice %34 {offsets = [0, 40], sizes = [16, 8], strides = [1, 1]} : vector<16x96xf32> to vector<16x8xf32>
    %53 = vector.extract_strided_slice %34 {offsets = [0, 72], sizes = [16, 8], strides = [1, 1]} : vector<16x96xf32> to vector<16x8xf32>
    %cst_24 = arith.constant dense<0.000000e+00> : vector<16x16xf32>
    %54 = tpu.matmul %51, %52, %cst_24 {dimension_numbers = #tpu.dot_dimension_numbers<[1], [1], [0], [0], [0, 0, 1, 0], [], []>} : vector<16x8xf32>, vector<16x8xf32>, vector<16x16xf32> -> vector<16x16xf32>
    %55 = arith.addf %54, %27 : vector<16x16xf32>
    %cst_25 = arith.constant dense<0xFF800000> : vector<16xf32>
    %56 = vector.multi_reduction <maximumf>, %55, %cst_25 [1] : vector<16x16xf32> to vector<16xf32>
    %57 = vector.shape_cast %56 : vector<16xf32> to vector<16x1xf32>
    %58 = vector.broadcast %57 : vector<16x1xf32> to vector<16x16xf32>
    %59 = arith.subf %55, %58 : vector<16x16xf32>
    %60 = math.exp %59 : vector<16x16xf32>
    %cst_26 = arith.constant dense<0.000000e+00> : vector<16xf32>
    %61 = vector.multi_reduction <add>, %60, %cst_26 [1] : vector<16x16xf32> to vector<16xf32>
    %62 = vector.shape_cast %61 : vector<16xf32> to vector<16x1xf32>
    %63 = tpu.reciprocal %62 {approx = true} : vector<16x1xf32> -> vector<16x1xf32>
    %64 = vector.broadcast %63 : vector<16x1xf32> to vector<16x16xf32>
    %65 = arith.mulf %60, %64 : vector<16x16xf32>
    %cst_27 = arith.constant dense<0.000000e+00> : vector<16x8xf32>
    %66 = tpu.matmul %65, %53, %cst_27 {dimension_numbers = #tpu.dot_dimension_numbers<[1], [0], [0], [1], [0, 0, 1, 1], [], []>} : vector<16x16xf32>, vector<16x8xf32>, vector<16x8xf32> -> vector<16x8xf32>
    %67 = vector.extract_strided_slice %34 {offsets = [0, 16], sizes = [16, 8], strides = [1, 1]} : vector<16x96xf32> to vector<16x8xf32>
    %68 = vector.extract_strided_slice %34 {offsets = [0, 48], sizes = [16, 8], strides = [1, 1]} : vector<16x96xf32> to vector<16x8xf32>
    %69 = vector.extract_strided_slice %34 {offsets = [0, 80], sizes = [16, 8], strides = [1, 1]} : vector<16x96xf32> to vector<16x8xf32>
    %cst_28 = arith.constant dense<0.000000e+00> : vector<16x16xf32>
    %70 = tpu.matmul %67, %68, %cst_28 {dimension_numbers = #tpu.dot_dimension_numbers<[1], [1], [0], [0], [0, 0, 1, 0], [], []>} : vector<16x8xf32>, vector<16x8xf32>, vector<16x16xf32> -> vector<16x16xf32>
    %71 = arith.addf %70, %27 : vector<16x16xf32>
    %cst_29 = arith.constant dense<0xFF800000> : vector<16xf32>
    %72 = vector.multi_reduction <maximumf>, %71, %cst_29 [1] : vector<16x16xf32> to vector<16xf32>
    %73 = vector.shape_cast %72 : vector<16xf32> to vector<16x1xf32>
    %74 = vector.broadcast %73 : vector<16x1xf32> to vector<16x16xf32>
    %75 = arith.subf %71, %74 : vector<16x16xf32>
    %76 = math.exp %75 : vector<16x16xf32>
    %cst_30 = arith.constant dense<0.000000e+00> : vector<16xf32>
    %77 = vector.multi_reduction <add>, %76, %cst_30 [1] : vector<16x16xf32> to vector<16xf32>
    %78 = vector.shape_cast %77 : vector<16xf32> to vector<16x1xf32>
    %79 = tpu.reciprocal %78 {approx = true} : vector<16x1xf32> -> vector<16x1xf32>
    %80 = vector.broadcast %79 : vector<16x1xf32> to vector<16x16xf32>
    %81 = arith.mulf %76, %80 : vector<16x16xf32>
    %cst_31 = arith.constant dense<0.000000e+00> : vector<16x8xf32>
    %82 = tpu.matmul %81, %69, %cst_31 {dimension_numbers = #tpu.dot_dimension_numbers<[1], [0], [0], [1], [0, 0, 1, 1], [], []>} : vector<16x16xf32>, vector<16x8xf32>, vector<16x8xf32> -> vector<16x8xf32>
    %83 = vector.extract_strided_slice %34 {offsets = [0, 24], sizes = [16, 8], strides = [1, 1]} : vector<16x96xf32> to vector<16x8xf32>
    %84 = vector.extract_strided_slice %34 {offsets = [0, 56], sizes = [16, 8], strides = [1, 1]} : vector<16x96xf32> to vector<16x8xf32>
    %85 = vector.extract_strided_slice %34 {offsets = [0, 88], sizes = [16, 8], strides = [1, 1]} : vector<16x96xf32> to vector<16x8xf32>
    %cst_32 = arith.constant dense<0.000000e+00> : vector<16x16xf32>
    %86 = tpu.matmul %83, %84, %cst_32 {dimension_numbers = #tpu.dot_dimension_numbers<[1], [1], [0], [0], [0, 0, 1, 0], [], []>} : vector<16x8xf32>, vector<16x8xf32>, vector<16x16xf32> -> vector<16x16xf32>
    %87 = arith.addf %86, %27 : vector<16x16xf32>
    %cst_33 = arith.constant dense<0xFF800000> : vector<16xf32>
    %88 = vector.multi_reduction <maximumf>, %87, %cst_33 [1] : vector<16x16xf32> to vector<16xf32>
    %89 = vector.shape_cast %88 : vector<16xf32> to vector<16x1xf32>
    %90 = vector.broadcast %89 : vector<16x1xf32> to vector<16x16xf32>
    %91 = arith.subf %87, %90 : vector<16x16xf32>
    %92 = math.exp %91 : vector<16x16xf32>
    %cst_34 = arith.constant dense<0.000000e+00> : vector<16xf32>
    %93 = vector.multi_reduction <add>, %92, %cst_34 [1] : vector<16x16xf32> to vector<16xf32>
    %94 = vector.shape_cast %93 : vector<16xf32> to vector<16x1xf32>
    %95 = tpu.reciprocal %94 {approx = true} : vector<16x1xf32> -> vector<16x1xf32>
    %96 = vector.broadcast %95 : vector<16x1xf32> to vector<16x16xf32>
    %97 = arith.mulf %92, %96 : vector<16x16xf32>
    %cst_35 = arith.constant dense<0.000000e+00> : vector<16x8xf32>
    %98 = tpu.matmul %97, %85, %cst_35 {dimension_numbers = #tpu.dot_dimension_numbers<[1], [0], [0], [1], [0, 0, 1, 1], [], []>} : vector<16x16xf32>, vector<16x8xf32>, vector<16x8xf32> -> vector<16x8xf32>
    %99 = tpu.concatenate %50, %66, %82, %98 in 1 : vector<16x8xf32>, vector<16x8xf32>, vector<16x8xf32>, vector<16x8xf32> -> vector<16x32xf32>
    %c0_36 = arith.constant 0 : index
    %c0_37 = arith.constant 0 : index
    %c0_38 = arith.constant 0 : index
    %100 = vector.load %arg10[%c0_36, %c0_37, %c0_38] : memref<2x32x32xf32, #tpu.memory_space<vmem>>, vector<1x32x32xf32>
    %101 = vector.shape_cast %100 : vector<1x32x32xf32> to vector<32x32xf32>
    %cst_39 = arith.constant dense<0.000000e+00> : vector<16x32xf32>
    %102 = tpu.matmul %99, %101, %cst_39 {dimension_numbers = #tpu.dot_dimension_numbers<[1], [0], [0], [1], [0, 0, 1, 1], [], []>} : vector<16x32xf32>, vector<32x32xf32>, vector<16x32xf32> -> vector<16x32xf32>
    %c0_40 = arith.constant 0 : index
    %c0_41 = arith.constant 0 : index
    %c0_42 = arith.constant 0 : index
    %103 = vector.load %arg11[%c0_40, %c0_41, %c0_42] : memref<2x1x32xf32, #tpu.memory_space<vmem>>, vector<1x1x32xf32>
    %104 = vector.shape_cast %103 : vector<1x1x32xf32> to vector<1x32xf32>
    %105 = vector.broadcast %104 : vector<1x32xf32> to vector<16x32xf32>
    %106 = arith.addf %102, %105 : vector<16x32xf32>
    %107 = arith.addf %26, %106 : vector<16x32xf32>
    %c0_43 = arith.constant 0 : index
    %c0_44 = arith.constant 0 : index
    %c0_45 = arith.constant 0 : index
    %108 = vector.load %arg12[%c0_43, %c0_44, %c0_45] : memref<2x1x32xf32, #tpu.memory_space<vmem>>, vector<1x1x32xf32>
    %109 = vector.shape_cast %108 : vector<1x1x32xf32> to vector<1x32xf32>
    %c0_46 = arith.constant 0 : index
    %c0_47 = arith.constant 0 : index
    %c0_48 = arith.constant 0 : index
    %110 = vector.load %arg13[%c0_46, %c0_47, %c0_48] : memref<2x1x32xf32, #tpu.memory_space<vmem>>, vector<1x1x32xf32>
    %111 = vector.shape_cast %110 : vector<1x1x32xf32> to vector<1x32xf32>
    %cst_49 = arith.constant dense<0.000000e+00> : vector<16xf32>
    %112 = vector.multi_reduction <add>, %107, %cst_49 [1] : vector<16x32xf32> to vector<16xf32>
    %113 = vector.shape_cast %112 : vector<16xf32> to vector<16x1xf32>
    %cst_50 = arith.constant 3.200000e+01 : f32
    %114 = vector.broadcast %cst_50 : f32 to vector<16x1xf32>
    %115 = arith.divf %113, %114 : vector<16x1xf32>
    %116 = vector.broadcast %115 : vector<16x1xf32> to vector<16x32xf32>
    %117 = arith.subf %107, %116 : vector<16x32xf32>
    %118 = arith.mulf %117, %117 : vector<16x32xf32>
    %cst_51 = arith.constant dense<0.000000e+00> : vector<16xf32>
    %119 = vector.multi_reduction <add>, %118, %cst_51 [1] : vector<16x32xf32> to vector<16xf32>
    %120 = vector.shape_cast %119 : vector<16xf32> to vector<16x1xf32>
    %cst_52 = arith.constant 3.200000e+01 : f32
    %121 = vector.broadcast %cst_52 : f32 to vector<16x1xf32>
    %122 = arith.divf %120, %121 : vector<16x1xf32>
    %123 = vector.broadcast %115 : vector<16x1xf32> to vector<16x32xf32>
    %124 = arith.subf %107, %123 : vector<16x32xf32>
    %cst_53 = arith.constant 9.99999996E-13 : f32
    %125 = vector.broadcast %cst_53 : f32 to vector<16x1xf32>
    %126 = arith.addf %122, %125 : vector<16x1xf32>
    %127 = math.rsqrt %126 : vector<16x1xf32>
    %128 = vector.broadcast %127 : vector<16x1xf32> to vector<16x32xf32>
    %129 = arith.mulf %124, %128 : vector<16x32xf32>
    %130 = vector.broadcast %109 : vector<1x32xf32> to vector<16x32xf32>
    %131 = arith.mulf %129, %130 : vector<16x32xf32>
    %132 = vector.broadcast %111 : vector<1x32xf32> to vector<16x32xf32>
    %133 = arith.addf %131, %132 : vector<16x32xf32>
    %c0_54 = arith.constant 0 : index
    %c0_55 = arith.constant 0 : index
    %c0_56 = arith.constant 0 : index
    %134 = vector.load %arg14[%c0_54, %c0_55, %c0_56] : memref<2x32x64xf32, #tpu.memory_space<vmem>>, vector<1x32x64xf32>
    %135 = vector.shape_cast %134 : vector<1x32x64xf32> to vector<32x64xf32>
    %cst_57 = arith.constant dense<0.000000e+00> : vector<16x64xf32>
    %136 = tpu.matmul %133, %135, %cst_57 {dimension_numbers = #tpu.dot_dimension_numbers<[1], [0], [0], [1], [0, 0, 1, 1], [], []>} : vector<16x32xf32>, vector<32x64xf32>, vector<16x64xf32> -> vector<16x64xf32>
    %c0_58 = arith.constant 0 : index
    %c0_59 = arith.constant 0 : index
    %c0_60 = arith.constant 0 : index
    %137 = vector.load %arg15[%c0_58, %c0_59, %c0_60] : memref<2x1x64xf32, #tpu.memory_space<vmem>>, vector<1x1x64xf32>
    %138 = vector.shape_cast %137 : vector<1x1x64xf32> to vector<1x64xf32>
    %139 = vector.broadcast %138 : vector<1x64xf32> to vector<16x64xf32>
    %140 = arith.addf %136, %139 : vector<16x64xf32>
    %cst_61 = arith.constant 5.000000e-01 : f32
    %141 = vector.broadcast %cst_61 : f32 to vector<16x64xf32>
    %142 = arith.mulf %141, %140 : vector<16x64xf32>
    %cst_62 = arith.constant 0.707106769 : f32
    %143 = vector.broadcast %cst_62 : f32 to vector<16x64xf32>
    %144 = arith.mulf %140, %143 : vector<16x64xf32>
    %145 = math.erf %144 : vector<16x64xf32>
    %cst_63 = arith.constant 1.000000e+00 : f32
    %146 = vector.broadcast %cst_63 : f32 to vector<16x64xf32>
    %147 = arith.addf %146, %145 : vector<16x64xf32>
    %148 = arith.mulf %142, %147 : vector<16x64xf32>
    %c0_64 = arith.constant 0 : index
    %c0_65 = arith.constant 0 : index
    %c0_66 = arith.constant 0 : index
    %149 = vector.load %arg16[%c0_64, %c0_65, %c0_66] : memref<2x64x32xf32, #tpu.memory_space<vmem>>, vector<1x64x32xf32>
    %150 = vector.shape_cast %149 : vector<1x64x32xf32> to vector<64x32xf32>
    %cst_67 = arith.constant dense<0.000000e+00> : vector<16x32xf32>
    %151 = tpu.matmul %148, %150, %cst_67 {dimension_numbers = #tpu.dot_dimension_numbers<[1], [0], [0], [1], [0, 0, 1, 1], [], []>} : vector<16x64xf32>, vector<64x32xf32>, vector<16x32xf32> -> vector<16x32xf32>
    %c0_68 = arith.constant 0 : index
    %c0_69 = arith.constant 0 : index
    %c0_70 = arith.constant 0 : index
    %152 = vector.load %arg17[%c0_68, %c0_69, %c0_70] : memref<2x1x32xf32, #tpu.memory_space<vmem>>, vector<1x1x32xf32>
    %153 = vector.shape_cast %152 : vector<1x1x32xf32> to vector<1x32xf32>
    %154 = vector.broadcast %153 : vector<1x32xf32> to vector<16x32xf32>
    %155 = arith.addf %151, %154 : vector<16x32xf32>
    %156 = arith.addf %133, %155 : vector<16x32xf32>
    %c0_71 = arith.constant 0 : index
    %c0_72 = arith.constant 0 : index
    %c0_73 = arith.constant 0 : index
    %157 = vector.load %arg18[%c0_71, %c0_72, %c0_73] : memref<2x1x32xf32, #tpu.memory_space<vmem>>, vector<1x1x32xf32>
    %158 = vector.shape_cast %157 : vector<1x1x32xf32> to vector<1x32xf32>
    %c0_74 = arith.constant 0 : index
    %c0_75 = arith.constant 0 : index
    %c0_76 = arith.constant 0 : index
    %159 = vector.load %arg19[%c0_74, %c0_75, %c0_76] : memref<2x1x32xf32, #tpu.memory_space<vmem>>, vector<1x1x32xf32>
    %160 = vector.shape_cast %159 : vector<1x1x32xf32> to vector<1x32xf32>
    %cst_77 = arith.constant dense<0.000000e+00> : vector<16xf32>
    %161 = vector.multi_reduction <add>, %156, %cst_77 [1] : vector<16x32xf32> to vector<16xf32>
    %162 = vector.shape_cast %161 : vector<16xf32> to vector<16x1xf32>
    %cst_78 = arith.constant 3.200000e+01 : f32
    %163 = vector.broadcast %cst_78 : f32 to vector<16x1xf32>
    %164 = arith.divf %162, %163 : vector<16x1xf32>
    %165 = vector.broadcast %164 : vector<16x1xf32> to vector<16x32xf32>
    %166 = arith.subf %156, %165 : vector<16x32xf32>
    %167 = arith.mulf %166, %166 : vector<16x32xf32>
    %cst_79 = arith.constant dense<0.000000e+00> : vector<16xf32>
    %168 = vector.multi_reduction <add>, %167, %cst_79 [1] : vector<16x32xf32> to vector<16xf32>
    %169 = vector.shape_cast %168 : vector<16xf32> to vector<16x1xf32>
    %cst_80 = arith.constant 3.200000e+01 : f32
    %170 = vector.broadcast %cst_80 : f32 to vector<16x1xf32>
    %171 = arith.divf %169, %170 : vector<16x1xf32>
    %172 = vector.broadcast %164 : vector<16x1xf32> to vector<16x32xf32>
    %173 = arith.subf %156, %172 : vector<16x32xf32>
    %cst_81 = arith.constant 9.99999996E-13 : f32
    %174 = vector.broadcast %cst_81 : f32 to vector<16x1xf32>
    %175 = arith.addf %171, %174 : vector<16x1xf32>
    %176 = math.rsqrt %175 : vector<16x1xf32>
    %177 = vector.broadcast %176 : vector<16x1xf32> to vector<16x32xf32>
    %178 = arith.mulf %173, %177 : vector<16x32xf32>
    %179 = vector.broadcast %158 : vector<1x32xf32> to vector<16x32xf32>
    %180 = arith.mulf %178, %179 : vector<16x32xf32>
    %181 = vector.broadcast %160 : vector<1x32xf32> to vector<16x32xf32>
    %182 = arith.addf %180, %181 : vector<16x32xf32>
    %c1 = arith.constant 1 : index
    %c0_82 = arith.constant 0 : index
    %c0_83 = arith.constant 0 : index
    %183 = vector.load %arg8[%c1, %c0_82, %c0_83] : memref<2x32x96xf32, #tpu.memory_space<vmem>>, vector<1x32x96xf32>
    %184 = vector.shape_cast %183 : vector<1x32x96xf32> to vector<32x96xf32>
    %cst_84 = arith.constant dense<0.000000e+00> : vector<16x96xf32>
    %185 = tpu.matmul %182, %184, %cst_84 {dimension_numbers = #tpu.dot_dimension_numbers<[1], [0], [0], [1], [0, 0, 1, 1], [], []>} : vector<16x32xf32>, vector<32x96xf32>, vector<16x96xf32> -> vector<16x96xf32>
    %c1_85 = arith.constant 1 : index
    %c0_86 = arith.constant 0 : index
    %c0_87 = arith.constant 0 : index
    %186 = vector.load %arg9[%c1_85, %c0_86, %c0_87] : memref<2x1x96xf32, #tpu.memory_space<vmem>>, vector<1x1x96xf32>
    %187 = vector.shape_cast %186 : vector<1x1x96xf32> to vector<1x96xf32>
    %188 = vector.broadcast %187 : vector<1x96xf32> to vector<16x96xf32>
    %189 = arith.addf %185, %188 : vector<16x96xf32>
    %190 = vector.extract_strided_slice %189 {offsets = [0, 0], sizes = [16, 8], strides = [1, 1]} : vector<16x96xf32> to vector<16x8xf32>
    %191 = vector.extract_strided_slice %189 {offsets = [0, 32], sizes = [16, 8], strides = [1, 1]} : vector<16x96xf32> to vector<16x8xf32>
    %192 = vector.extract_strided_slice %189 {offsets = [0, 64], sizes = [16, 8], strides = [1, 1]} : vector<16x96xf32> to vector<16x8xf32>
    %cst_88 = arith.constant dense<0.000000e+00> : vector<16x16xf32>
    %193 = tpu.matmul %190, %191, %cst_88 {dimension_numbers = #tpu.dot_dimension_numbers<[1], [1], [0], [0], [0, 0, 1, 0], [], []>} : vector<16x8xf32>, vector<16x8xf32>, vector<16x16xf32> -> vector<16x16xf32>
    %194 = arith.addf %193, %27 : vector<16x16xf32>
    %cst_89 = arith.constant dense<0xFF800000> : vector<16xf32>
    %195 = vector.multi_reduction <maximumf>, %194, %cst_89 [1] : vector<16x16xf32> to vector<16xf32>
    %196 = vector.shape_cast %195 : vector<16xf32> to vector<16x1xf32>
    %197 = vector.broadcast %196 : vector<16x1xf32> to vector<16x16xf32>
    %198 = arith.subf %194, %197 : vector<16x16xf32>
    %199 = math.exp %198 : vector<16x16xf32>
    %cst_90 = arith.constant dense<0.000000e+00> : vector<16xf32>
    %200 = vector.multi_reduction <add>, %199, %cst_90 [1] : vector<16x16xf32> to vector<16xf32>
    %201 = vector.shape_cast %200 : vector<16xf32> to vector<16x1xf32>
    %202 = tpu.reciprocal %201 {approx = true} : vector<16x1xf32> -> vector<16x1xf32>
    %203 = vector.broadcast %202 : vector<16x1xf32> to vector<16x16xf32>
    %204 = arith.mulf %199, %203 : vector<16x16xf32>
    %cst_91 = arith.constant dense<0.000000e+00> : vector<16x8xf32>
    %205 = tpu.matmul %204, %192, %cst_91 {dimension_numbers = #tpu.dot_dimension_numbers<[1], [0], [0], [1], [0, 0, 1, 1], [], []>} : vector<16x16xf32>, vector<16x8xf32>, vector<16x8xf32> -> vector<16x8xf32>
    %206 = vector.extract_strided_slice %189 {offsets = [0, 8], sizes = [16, 8], strides = [1, 1]} : vector<16x96xf32> to vector<16x8xf32>
    %207 = vector.extract_strided_slice %189 {offsets = [0, 40], sizes = [16, 8], strides = [1, 1]} : vector<16x96xf32> to vector<16x8xf32>
    %208 = vector.extract_strided_slice %189 {offsets = [0, 72], sizes = [16, 8], strides = [1, 1]} : vector<16x96xf32> to vector<16x8xf32>
    %cst_92 = arith.constant dense<0.000000e+00> : vector<16x16xf32>
    %209 = tpu.matmul %206, %207, %cst_92 {dimension_numbers = #tpu.dot_dimension_numbers<[1], [1], [0], [0], [0, 0, 1, 0], [], []>} : vector<16x8xf32>, vector<16x8xf32>, vector<16x16xf32> -> vector<16x16xf32>
    %210 = arith.addf %209, %27 : vector<16x16xf32>
    %cst_93 = arith.constant dense<0xFF800000> : vector<16xf32>
    %211 = vector.multi_reduction <maximumf>, %210, %cst_93 [1] : vector<16x16xf32> to vector<16xf32>
    %212 = vector.shape_cast %211 : vector<16xf32> to vector<16x1xf32>
    %213 = vector.broadcast %212 : vector<16x1xf32> to vector<16x16xf32>
    %214 = arith.subf %210, %213 : vector<16x16xf32>
    %215 = math.exp %214 : vector<16x16xf32>
    %cst_94 = arith.constant dense<0.000000e+00> : vector<16xf32>
    %216 = vector.multi_reduction <add>, %215, %cst_94 [1] : vector<16x16xf32> to vector<16xf32>
    %217 = vector.shape_cast %216 : vector<16xf32> to vector<16x1xf32>
    %218 = tpu.reciprocal %217 {approx = true} : vector<16x1xf32> -> vector<16x1xf32>
    %219 = vector.broadcast %218 : vector<16x1xf32> to vector<16x16xf32>
    %220 = arith.mulf %215, %219 : vector<16x16xf32>
    %cst_95 = arith.constant dense<0.000000e+00> : vector<16x8xf32>
    %221 = tpu.matmul %220, %208, %cst_95 {dimension_numbers = #tpu.dot_dimension_numbers<[1], [0], [0], [1], [0, 0, 1, 1], [], []>} : vector<16x16xf32>, vector<16x8xf32>, vector<16x8xf32> -> vector<16x8xf32>
    %222 = vector.extract_strided_slice %189 {offsets = [0, 16], sizes = [16, 8], strides = [1, 1]} : vector<16x96xf32> to vector<16x8xf32>
    %223 = vector.extract_strided_slice %189 {offsets = [0, 48], sizes = [16, 8], strides = [1, 1]} : vector<16x96xf32> to vector<16x8xf32>
    %224 = vector.extract_strided_slice %189 {offsets = [0, 80], sizes = [16, 8], strides = [1, 1]} : vector<16x96xf32> to vector<16x8xf32>
    %cst_96 = arith.constant dense<0.000000e+00> : vector<16x16xf32>
    %225 = tpu.matmul %222, %223, %cst_96 {dimension_numbers = #tpu.dot_dimension_numbers<[1], [1], [0], [0], [0, 0, 1, 0], [], []>} : vector<16x8xf32>, vector<16x8xf32>, vector<16x16xf32> -> vector<16x16xf32>
    %226 = arith.addf %225, %27 : vector<16x16xf32>
    %cst_97 = arith.constant dense<0xFF800000> : vector<16xf32>
    %227 = vector.multi_reduction <maximumf>, %226, %cst_97 [1] : vector<16x16xf32> to vector<16xf32>
    %228 = vector.shape_cast %227 : vector<16xf32> to vector<16x1xf32>
    %229 = vector.broadcast %228 : vector<16x1xf32> to vector<16x16xf32>
    %230 = arith.subf %226, %229 : vector<16x16xf32>
    %231 = math.exp %230 : vector<16x16xf32>
    %cst_98 = arith.constant dense<0.000000e+00> : vector<16xf32>
    %232 = vector.multi_reduction <add>, %231, %cst_98 [1] : vector<16x16xf32> to vector<16xf32>
    %233 = vector.shape_cast %232 : vector<16xf32> to vector<16x1xf32>
    %234 = tpu.reciprocal %233 {approx = true} : vector<16x1xf32> -> vector<16x1xf32>
    %235 = vector.broadcast %234 : vector<16x1xf32> to vector<16x16xf32>
    %236 = arith.mulf %231, %235 : vector<16x16xf32>
    %cst_99 = arith.constant dense<0.000000e+00> : vector<16x8xf32>
    %237 = tpu.matmul %236, %224, %cst_99 {dimension_numbers = #tpu.dot_dimension_numbers<[1], [0], [0], [1], [0, 0, 1, 1], [], []>} : vector<16x16xf32>, vector<16x8xf32>, vector<16x8xf32> -> vector<16x8xf32>
    %238 = vector.extract_strided_slice %189 {offsets = [0, 24], sizes = [16, 8], strides = [1, 1]} : vector<16x96xf32> to vector<16x8xf32>
    %239 = vector.extract_strided_slice %189 {offsets = [0, 56], sizes = [16, 8], strides = [1, 1]} : vector<16x96xf32> to vector<16x8xf32>
    %240 = vector.extract_strided_slice %189 {offsets = [0, 88], sizes = [16, 8], strides = [1, 1]} : vector<16x96xf32> to vector<16x8xf32>
    %cst_100 = arith.constant dense<0.000000e+00> : vector<16x16xf32>
    %241 = tpu.matmul %238, %239, %cst_100 {dimension_numbers = #tpu.dot_dimension_numbers<[1], [1], [0], [0], [0, 0, 1, 0], [], []>} : vector<16x8xf32>, vector<16x8xf32>, vector<16x16xf32> -> vector<16x16xf32>
    %242 = arith.addf %241, %27 : vector<16x16xf32>
    %cst_101 = arith.constant dense<0xFF800000> : vector<16xf32>
    %243 = vector.multi_reduction <maximumf>, %242, %cst_101 [1] : vector<16x16xf32> to vector<16xf32>
    %244 = vector.shape_cast %243 : vector<16xf32> to vector<16x1xf32>
    %245 = vector.broadcast %244 : vector<16x1xf32> to vector<16x16xf32>
    %246 = arith.subf %242, %245 : vector<16x16xf32>
    %247 = math.exp %246 : vector<16x16xf32>
    %cst_102 = arith.constant dense<0.000000e+00> : vector<16xf32>
    %248 = vector.multi_reduction <add>, %247, %cst_102 [1] : vector<16x16xf32> to vector<16xf32>
    %249 = vector.shape_cast %248 : vector<16xf32> to vector<16x1xf32>
    %250 = tpu.reciprocal %249 {approx = true} : vector<16x1xf32> -> vector<16x1xf32>
    %251 = vector.broadcast %250 : vector<16x1xf32> to vector<16x16xf32>
    %252 = arith.mulf %247, %251 : vector<16x16xf32>
    %cst_103 = arith.constant dense<0.000000e+00> : vector<16x8xf32>
    %253 = tpu.matmul %252, %240, %cst_103 {dimension_numbers = #tpu.dot_dimension_numbers<[1], [0], [0], [1], [0, 0, 1, 1], [], []>} : vector<16x16xf32>, vector<16x8xf32>, vector<16x8xf32> -> vector<16x8xf32>
    %254 = tpu.concatenate %205, %221, %237, %253 in 1 : vector<16x8xf32>, vector<16x8xf32>, vector<16x8xf32>, vector<16x8xf32> -> vector<16x32xf32>
    %c1_104 = arith.constant 1 : index
    %c0_105 = arith.constant 0 : index
    %c0_106 = arith.constant 0 : index
    %255 = vector.load %arg10[%c1_104, %c0_105, %c0_106] : memref<2x32x32xf32, #tpu.memory_space<vmem>>, vector<1x32x32xf32>
    %256 = vector.shape_cast %255 : vector<1x32x32xf32> to vector<32x32xf32>
    %cst_107 = arith.constant dense<0.000000e+00> : vector<16x32xf32>
    %257 = tpu.matmul %254, %256, %cst_107 {dimension_numbers = #tpu.dot_dimension_numbers<[1], [0], [0], [1], [0, 0, 1, 1], [], []>} : vector<16x32xf32>, vector<32x32xf32>, vector<16x32xf32> -> vector<16x32xf32>
    %c1_108 = arith.constant 1 : index
    %c0_109 = arith.constant 0 : index
    %c0_110 = arith.constant 0 : index
    %258 = vector.load %arg11[%c1_108, %c0_109, %c0_110] : memref<2x1x32xf32, #tpu.memory_space<vmem>>, vector<1x1x32xf32>
    %259 = vector.shape_cast %258 : vector<1x1x32xf32> to vector<1x32xf32>
    %260 = vector.broadcast %259 : vector<1x32xf32> to vector<16x32xf32>
    %261 = arith.addf %257, %260 : vector<16x32xf32>
    %262 = arith.addf %182, %261 : vector<16x32xf32>
    %c1_111 = arith.constant 1 : index
    %c0_112 = arith.constant 0 : index
    %c0_113 = arith.constant 0 : index
    %263 = vector.load %arg12[%c1_111, %c0_112, %c0_113] : memref<2x1x32xf32, #tpu.memory_space<vmem>>, vector<1x1x32xf32>
    %264 = vector.shape_cast %263 : vector<1x1x32xf32> to vector<1x32xf32>
    %c1_114 = arith.constant 1 : index
    %c0_115 = arith.constant 0 : index
    %c0_116 = arith.constant 0 : index
    %265 = vector.load %arg13[%c1_114, %c0_115, %c0_116] : memref<2x1x32xf32, #tpu.memory_space<vmem>>, vector<1x1x32xf32>
    %266 = vector.shape_cast %265 : vector<1x1x32xf32> to vector<1x32xf32>
    %cst_117 = arith.constant dense<0.000000e+00> : vector<16xf32>
    %267 = vector.multi_reduction <add>, %262, %cst_117 [1] : vector<16x32xf32> to vector<16xf32>
    %268 = vector.shape_cast %267 : vector<16xf32> to vector<16x1xf32>
    %cst_118 = arith.constant 3.200000e+01 : f32
    %269 = vector.broadcast %cst_118 : f32 to vector<16x1xf32>
    %270 = arith.divf %268, %269 : vector<16x1xf32>
    %271 = vector.broadcast %270 : vector<16x1xf32> to vector<16x32xf32>
    %272 = arith.subf %262, %271 : vector<16x32xf32>
    %273 = arith.mulf %272, %272 : vector<16x32xf32>
    %cst_119 = arith.constant dense<0.000000e+00> : vector<16xf32>
    %274 = vector.multi_reduction <add>, %273, %cst_119 [1] : vector<16x32xf32> to vector<16xf32>
    %275 = vector.shape_cast %274 : vector<16xf32> to vector<16x1xf32>
    %cst_120 = arith.constant 3.200000e+01 : f32
    %276 = vector.broadcast %cst_120 : f32 to vector<16x1xf32>
    %277 = arith.divf %275, %276 : vector<16x1xf32>
    %278 = vector.broadcast %270 : vector<16x1xf32> to vector<16x32xf32>
    %279 = arith.subf %262, %278 : vector<16x32xf32>
    %cst_121 = arith.constant 9.99999996E-13 : f32
    %280 = vector.broadcast %cst_121 : f32 to vector<16x1xf32>
    %281 = arith.addf %277, %280 : vector<16x1xf32>
    %282 = math.rsqrt %281 : vector<16x1xf32>
    %283 = vector.broadcast %282 : vector<16x1xf32> to vector<16x32xf32>
    %284 = arith.mulf %279, %283 : vector<16x32xf32>
    %285 = vector.broadcast %264 : vector<1x32xf32> to vector<16x32xf32>
    %286 = arith.mulf %284, %285 : vector<16x32xf32>
    %287 = vector.broadcast %266 : vector<1x32xf32> to vector<16x32xf32>
    %288 = arith.addf %286, %287 : vector<16x32xf32>
    %c1_122 = arith.constant 1 : index
    %c0_123 = arith.constant 0 : index
    %c0_124 = arith.constant 0 : index
    %289 = vector.load %arg14[%c1_122, %c0_123, %c0_124] : memref<2x32x64xf32, #tpu.memory_space<vmem>>, vector<1x32x64xf32>
    %290 = vector.shape_cast %289 : vector<1x32x64xf32> to vector<32x64xf32>
    %cst_125 = arith.constant dense<0.000000e+00> : vector<16x64xf32>
    %291 = tpu.matmul %288, %290, %cst_125 {dimension_numbers = #tpu.dot_dimension_numbers<[1], [0], [0], [1], [0, 0, 1, 1], [], []>} : vector<16x32xf32>, vector<32x64xf32>, vector<16x64xf32> -> vector<16x64xf32>
    %c1_126 = arith.constant 1 : index
    %c0_127 = arith.constant 0 : index
    %c0_128 = arith.constant 0 : index
    %292 = vector.load %arg15[%c1_126, %c0_127, %c0_128] : memref<2x1x64xf32, #tpu.memory_space<vmem>>, vector<1x1x64xf32>
    %293 = vector.shape_cast %292 : vector<1x1x64xf32> to vector<1x64xf32>
    %294 = vector.broadcast %293 : vector<1x64xf32> to vector<16x64xf32>
    %295 = arith.addf %291, %294 : vector<16x64xf32>
    %cst_129 = arith.constant 5.000000e-01 : f32
    %296 = vector.broadcast %cst_129 : f32 to vector<16x64xf32>
    %297 = arith.mulf %296, %295 : vector<16x64xf32>
    %cst_130 = arith.constant 0.707106769 : f32
    %298 = vector.broadcast %cst_130 : f32 to vector<16x64xf32>
    %299 = arith.mulf %295, %298 : vector<16x64xf32>
    %300 = math.erf %299 : vector<16x64xf32>
    %cst_131 = arith.constant 1.000000e+00 : f32
    %301 = vector.broadcast %cst_131 : f32 to vector<16x64xf32>
    %302 = arith.addf %301, %300 : vector<16x64xf32>
    %303 = arith.mulf %297, %302 : vector<16x64xf32>
    %c1_132 = arith.constant 1 : index
    %c0_133 = arith.constant 0 : index
    %c0_134 = arith.constant 0 : index
    %304 = vector.load %arg16[%c1_132, %c0_133, %c0_134] : memref<2x64x32xf32, #tpu.memory_space<vmem>>, vector<1x64x32xf32>
    %305 = vector.shape_cast %304 : vector<1x64x32xf32> to vector<64x32xf32>
    %cst_135 = arith.constant dense<0.000000e+00> : vector<16x32xf32>
    %306 = tpu.matmul %303, %305, %cst_135 {dimension_numbers = #tpu.dot_dimension_numbers<[1], [0], [0], [1], [0, 0, 1, 1], [], []>} : vector<16x64xf32>, vector<64x32xf32>, vector<16x32xf32> -> vector<16x32xf32>
    %c1_136 = arith.constant 1 : index
    %c0_137 = arith.constant 0 : index
    %c0_138 = arith.constant 0 : index
    %307 = vector.load %arg17[%c1_136, %c0_137, %c0_138] : memref<2x1x32xf32, #tpu.memory_space<vmem>>, vector<1x1x32xf32>
    %308 = vector.shape_cast %307 : vector<1x1x32xf32> to vector<1x32xf32>
    %309 = vector.broadcast %308 : vector<1x32xf32> to vector<16x32xf32>
    %310 = arith.addf %306, %309 : vector<16x32xf32>
    %311 = arith.addf %288, %310 : vector<16x32xf32>
    %c1_139 = arith.constant 1 : index
    %c0_140 = arith.constant 0 : index
    %c0_141 = arith.constant 0 : index
    %312 = vector.load %arg18[%c1_139, %c0_140, %c0_141] : memref<2x1x32xf32, #tpu.memory_space<vmem>>, vector<1x1x32xf32>
    %313 = vector.shape_cast %312 : vector<1x1x32xf32> to vector<1x32xf32>
    %c1_142 = arith.constant 1 : index
    %c0_143 = arith.constant 0 : index
    %c0_144 = arith.constant 0 : index
    %314 = vector.load %arg19[%c1_142, %c0_143, %c0_144] : memref<2x1x32xf32, #tpu.memory_space<vmem>>, vector<1x1x32xf32>
    %315 = vector.shape_cast %314 : vector<1x1x32xf32> to vector<1x32xf32>
    %cst_145 = arith.constant dense<0.000000e+00> : vector<16xf32>
    %316 = vector.multi_reduction <add>, %311, %cst_145 [1] : vector<16x32xf32> to vector<16xf32>
    %317 = vector.shape_cast %316 : vector<16xf32> to vector<16x1xf32>
    %cst_146 = arith.constant 3.200000e+01 : f32
    %318 = vector.broadcast %cst_146 : f32 to vector<16x1xf32>
    %319 = arith.divf %317, %318 : vector<16x1xf32>
    %320 = vector.broadcast %319 : vector<16x1xf32> to vector<16x32xf32>
    %321 = arith.subf %311, %320 : vector<16x32xf32>
    %322 = arith.mulf %321, %321 : vector<16x32xf32>
    %cst_147 = arith.constant dense<0.000000e+00> : vector<16xf32>
    %323 = vector.multi_reduction <add>, %322, %cst_147 [1] : vector<16x32xf32> to vector<16xf32>
    %324 = vector.shape_cast %323 : vector<16xf32> to vector<16x1xf32>
    %cst_148 = arith.constant 3.200000e+01 : f32
    %325 = vector.broadcast %cst_148 : f32 to vector<16x1xf32>
    %326 = arith.divf %324, %325 : vector<16x1xf32>
    %327 = vector.broadcast %319 : vector<16x1xf32> to vector<16x32xf32>
    %328 = arith.subf %311, %327 : vector<16x32xf32>
    %cst_149 = arith.constant 9.99999996E-13 : f32
    %329 = vector.broadcast %cst_149 : f32 to vector<16x1xf32>
    %330 = arith.addf %326, %329 : vector<16x1xf32>
    %331 = math.rsqrt %330 : vector<16x1xf32>
    %332 = vector.broadcast %331 : vector<16x1xf32> to vector<16x32xf32>
    %333 = arith.mulf %328, %332 : vector<16x32xf32>
    %334 = vector.broadcast %313 : vector<1x32xf32> to vector<16x32xf32>
    %335 = arith.mulf %333, %334 : vector<16x32xf32>
    %336 = vector.broadcast %315 : vector<1x32xf32> to vector<16x32xf32>
    %337 = arith.addf %335, %336 : vector<16x32xf32>
    %c0_150 = arith.constant 0 : index
    %c0_151 = arith.constant 0 : index
    %338 = vector.load %arg5[%c0_150, %c0_151] : memref<10x16xf32, #tpu.memory_space<vmem>>, vector<10x16xf32>
    %cst_152 = arith.constant dense<0.000000e+00> : vector<10x32xf32>
    %339 = tpu.matmul %338, %337, %cst_152 {dimension_numbers = #tpu.dot_dimension_numbers<[1], [0], [0], [1], [0, 0, 1, 1], [], []>} : vector<10x16xf32>, vector<16x32xf32>, vector<10x32xf32> -> vector<10x32xf32>
    %c0_153 = arith.constant 0 : index
    %c0_154 = arith.constant 0 : index
    %340 = vector.load %arg20[%c0_153, %c0_154] : memref<32x128xf32, #tpu.memory_space<vmem>>, vector<32x128xf32>
    %cst_155 = arith.constant dense<0.000000e+00> : vector<10x128xf32>
    %341 = tpu.matmul %339, %340, %cst_155 {dimension_numbers = #tpu.dot_dimension_numbers<[1], [0], [0], [1], [0, 0, 1, 1], [], []>} : vector<10x32xf32>, vector<32x128xf32>, vector<10x128xf32> -> vector<10x128xf32>
    %c0_156 = arith.constant 0 : index
    %c0_157 = arith.constant 0 : index
    %342 = vector.load %arg21[%c0_156, %c0_157] : memref<1x128xf32, #tpu.memory_space<vmem>>, vector<1x128xf32>
    %343 = vector.broadcast %342 : vector<1x128xf32> to vector<10x128xf32>
    %344 = arith.addf %341, %343 : vector<10x128xf32>
    %cst_158 = arith.constant 0.000000e+00 : f32
    %345 = vector.broadcast %cst_158 : f32 to vector<10x128xf32>
    %346 = arith.maximumf %344, %345 : vector<10x128xf32>
    %347 = vector.extract_strided_slice %346 {offsets = [0, 0], sizes = [10, 32], strides = [1, 1]} : vector<10x128xf32> to vector<10x32xf32>
    %c0_159 = arith.constant 0 : index
    %c0_160 = arith.constant 0 : index
    %348 = vector.load %arg23[%c0_159, %c0_160] : memref<32x32xf32, #tpu.memory_space<vmem>>, vector<32x32xf32>
    %cst_161 = arith.constant dense<0.000000e+00> : vector<10x32xf32>
    %349 = tpu.matmul %347, %348, %cst_161 {dimension_numbers = #tpu.dot_dimension_numbers<[1], [0], [0], [1], [0, 0, 1, 1], [], []>} : vector<10x32xf32>, vector<32x32xf32>, vector<10x32xf32> -> vector<10x32xf32>
    %350 = tpu.iota {dimensions = array<i32: 1>} : vector<5x6xi32>
    %351 = vector.extract_strided_slice %346 {offsets = [0, 0], sizes = [5, 128], strides = [1, 1]} : vector<10x128xf32> to vector<5x128xf32>
    %c0_162 = arith.constant 0 : index
    %c32 = arith.constant 32 : index
    %352 = vector.load %arg22[%c0_162, %c32] : memref<1x128xf32, #tpu.memory_space<vmem>>, vector<1x32xf32>
    %353 = vector.extract_strided_slice %351 {offsets = [0, 32], sizes = [5, 32], strides = [1, 1]} : vector<5x128xf32> to vector<5x32xf32>
    %354 = tpu.concatenate %352, %353 in 0 : vector<1x32xf32>, vector<5x32xf32> -> vector<6x32xf32>
    %355 = vector.extract_strided_slice %349 {offsets = [0, 0], sizes = [5, 32], strides = [1, 1]} : vector<10x32xf32> to vector<5x32xf32>
    %cst_163 = arith.constant dense<0.000000e+00> : vector<5x6xf32>
    %356 = tpu.matmul %355, %354, %cst_163 {dimension_numbers = #tpu.dot_dimension_numbers<[1], [1], [0], [0], [0, 0, 1, 0], [], []>} : vector<5x32xf32>, vector<6x32xf32>, vector<5x6xf32> -> vector<5x6xf32>
    %cst_164 = arith.constant 1.000000e+00 : f32
    %357 = vector.broadcast %cst_164 : f32 to vector<1x1xf32>
    %c0_165 = arith.constant 0 : index
    %c0_166 = arith.constant 0 : index
    %c0_167 = arith.constant 0 : index
    %358 = vector.load %arg6[%c0_165, %c0_166, %c0_167] : memref<2x1x5xf32, #tpu.memory_space<vmem>>, vector<1x1x5xf32>
    %359 = vector.shape_cast %358 : vector<1x1x5xf32> to vector<1x5xf32>
    %360 = tpu.concatenate %357, %359 in 1 : vector<1x1xf32>, vector<1x5xf32> -> vector<1x6xf32>
    %cst_168 = arith.constant 5.000000e-01 : f32
    %361 = vector.broadcast %cst_168 : f32 to vector<1x6xf32>
    %362 = arith.cmpf ogt, %360, %361 : vector<1x6xf32>
    %cst_169 = arith.constant -1.000000e+30 : f32
    %363 = vector.shape_cast %362 : vector<1x6xi1> to vector<1x6xi1>
    %364 = vector.broadcast %363 : vector<1x6xi1> to vector<5x6xi1>
    %365 = vector.broadcast %cst_169 : f32 to vector<5x6xf32>
    %366 = arith.select %364, %356, %365 : vector<5x6xi1>, vector<5x6xf32>
    %cst_170 = arith.constant dense<0xFF800000> : vector<5xf32>
    %367 = vector.multi_reduction <maximumf>, %366, %cst_170 [1] : vector<5x6xf32> to vector<5xf32>
    %368 = vector.shape_cast %367 : vector<5xf32> to vector<5x1xf32>
    %369 = vector.broadcast %368 : vector<5x1xf32> to vector<5x6xf32>
    %370 = arith.cmpf oge, %366, %369 : vector<5x6xf32>
    %c6_i32 = arith.constant 6 : i32
    %371 = vector.broadcast %c6_i32 : i32 to vector<5x6xi32>
    %372 = arith.select %370, %350, %371 : vector<5x6xi1>, vector<5x6xi32>
    %cst_171 = arith.constant dense<2147483647> : vector<5xi32>
    %373 = vector.multi_reduction <minsi>, %372, %cst_171 [1] : vector<5x6xi32> to vector<5xi32>
    %374 = vector.shape_cast %373 : vector<5xi32> to vector<5x1xi32>
    %375 = vector.broadcast %374 : vector<5x1xi32> to vector<5x6xi32>
    %376 = arith.cmpi eq, %350, %375 : vector<5x6xi32>
    %377 = arith.extui %376 : vector<5x6xi1> to vector<5x6xi32>
    %378 = arith.sitofp %377 : vector<5x6xi32> to vector<5x6xf32>
    %c0_172 = arith.constant 0 : index
    %c64 = arith.constant 64 : index
    %379 = vector.load %arg22[%c0_172, %c64] : memref<1x128xf32, #tpu.memory_space<vmem>>, vector<1x32xf32>
    %380 = vector.extract_strided_slice %351 {offsets = [0, 64], sizes = [5, 32], strides = [1, 1]} : vector<5x128xf32> to vector<5x32xf32>
    %381 = tpu.concatenate %379, %380 in 0 : vector<1x32xf32>, vector<5x32xf32> -> vector<6x32xf32>
    %cst_173 = arith.constant dense<0.000000e+00> : vector<5x32xf32>
    %382 = tpu.matmul %378, %381, %cst_173 {dimension_numbers = #tpu.dot_dimension_numbers<[1], [0], [0], [1], [0, 0, 1, 1], [], []>} : vector<5x6xf32>, vector<6x32xf32>, vector<5x32xf32> -> vector<5x32xf32>
    %383 = vector.extract_strided_slice %346 {offsets = [5, 0], sizes = [5, 128], strides = [1, 1]} : vector<10x128xf32> to vector<5x128xf32>
    %c0_174 = arith.constant 0 : index
    %c32_175 = arith.constant 32 : index
    %384 = vector.load %arg22[%c0_174, %c32_175] : memref<1x128xf32, #tpu.memory_space<vmem>>, vector<1x32xf32>
    %385 = vector.extract_strided_slice %383 {offsets = [0, 32], sizes = [5, 32], strides = [1, 1]} : vector<5x128xf32> to vector<5x32xf32>
    %386 = tpu.concatenate %384, %385 in 0 : vector<1x32xf32>, vector<5x32xf32> -> vector<6x32xf32>
    %387 = vector.extract_strided_slice %349 {offsets = [5, 0], sizes = [5, 32], strides = [1, 1]} : vector<10x32xf32> to vector<5x32xf32>
    %cst_176 = arith.constant dense<0.000000e+00> : vector<5x6xf32>
    %388 = tpu.matmul %387, %386, %cst_176 {dimension_numbers = #tpu.dot_dimension_numbers<[1], [1], [0], [0], [0, 0, 1, 0], [], []>} : vector<5x32xf32>, vector<6x32xf32>, vector<5x6xf32> -> vector<5x6xf32>
    %cst_177 = arith.constant 1.000000e+00 : f32
    %389 = vector.broadcast %cst_177 : f32 to vector<1x1xf32>
    %c1_178 = arith.constant 1 : index
    %c0_179 = arith.constant 0 : index
    %c0_180 = arith.constant 0 : index
    %390 = vector.load %arg6[%c1_178, %c0_179, %c0_180] : memref<2x1x5xf32, #tpu.memory_space<vmem>>, vector<1x1x5xf32>
    %391 = vector.shape_cast %390 : vector<1x1x5xf32> to vector<1x5xf32>
    %392 = tpu.concatenate %389, %391 in 1 : vector<1x1xf32>, vector<1x5xf32> -> vector<1x6xf32>
    %cst_181 = arith.constant 5.000000e-01 : f32
    %393 = vector.broadcast %cst_181 : f32 to vector<1x6xf32>
    %394 = arith.cmpf ogt, %392, %393 : vector<1x6xf32>
    %cst_182 = arith.constant -1.000000e+30 : f32
    %395 = vector.shape_cast %394 : vector<1x6xi1> to vector<1x6xi1>
    %396 = vector.broadcast %395 : vector<1x6xi1> to vector<5x6xi1>
    %397 = vector.broadcast %cst_182 : f32 to vector<5x6xf32>
    %398 = arith.select %396, %388, %397 : vector<5x6xi1>, vector<5x6xf32>
    %cst_183 = arith.constant dense<0xFF800000> : vector<5xf32>
    %399 = vector.multi_reduction <maximumf>, %398, %cst_183 [1] : vector<5x6xf32> to vector<5xf32>
    %400 = vector.shape_cast %399 : vector<5xf32> to vector<5x1xf32>
    %401 = vector.broadcast %400 : vector<5x1xf32> to vector<5x6xf32>
    %402 = arith.cmpf oge, %398, %401 : vector<5x6xf32>
    %c6_i32_184 = arith.constant 6 : i32
    %403 = vector.broadcast %c6_i32_184 : i32 to vector<5x6xi32>
    %404 = arith.select %402, %350, %403 : vector<5x6xi1>, vector<5x6xi32>
    %cst_185 = arith.constant dense<2147483647> : vector<5xi32>
    %405 = vector.multi_reduction <minsi>, %404, %cst_185 [1] : vector<5x6xi32> to vector<5xi32>
    %406 = vector.shape_cast %405 : vector<5xi32> to vector<5x1xi32>
    %407 = vector.broadcast %406 : vector<5x1xi32> to vector<5x6xi32>
    %408 = arith.cmpi eq, %350, %407 : vector<5x6xi32>
    %409 = arith.extui %408 : vector<5x6xi1> to vector<5x6xi32>
    %410 = arith.sitofp %409 : vector<5x6xi32> to vector<5x6xf32>
    %c0_186 = arith.constant 0 : index
    %c64_187 = arith.constant 64 : index
    %411 = vector.load %arg22[%c0_186, %c64_187] : memref<1x128xf32, #tpu.memory_space<vmem>>, vector<1x32xf32>
    %412 = vector.extract_strided_slice %383 {offsets = [0, 64], sizes = [5, 32], strides = [1, 1]} : vector<5x128xf32> to vector<5x32xf32>
    %413 = tpu.concatenate %411, %412 in 0 : vector<1x32xf32>, vector<5x32xf32> -> vector<6x32xf32>
    %cst_188 = arith.constant dense<0.000000e+00> : vector<5x32xf32>
    %414 = tpu.matmul %410, %413, %cst_188 {dimension_numbers = #tpu.dot_dimension_numbers<[1], [0], [0], [1], [0, 0, 1, 1], [], []>} : vector<5x6xf32>, vector<6x32xf32>, vector<5x32xf32> -> vector<5x32xf32>
    %415 = tpu.concatenate %382, %414 in 0 : vector<5x32xf32>, vector<5x32xf32> -> vector<10x32xf32>
    %c0_189 = arith.constant 0 : index
    %c0_190 = arith.constant 0 : index
    %416 = vector.load %arg24[%c0_189, %c0_190] : memref<32x160xf32, #tpu.memory_space<vmem>>, vector<32x160xf32>
    %cst_191 = arith.constant dense<0.000000e+00> : vector<10x160xf32>
    %417 = tpu.matmul %415, %416, %cst_191 {dimension_numbers = #tpu.dot_dimension_numbers<[1], [0], [0], [1], [0, 0, 1, 1], [], []>} : vector<10x32xf32>, vector<32x160xf32>, vector<10x160xf32> -> vector<10x160xf32>
    %418 = vector.extract_strided_slice %346 {offsets = [0, 96], sizes = [5, 32], strides = [1, 1]} : vector<10x128xf32> to vector<5x32xf32>
    %419 = vector.extract_strided_slice %417 {offsets = [0, 0], sizes = [5, 160], strides = [1, 1]} : vector<10x160xf32> to vector<5x160xf32>
    %420 = vector.extract_strided_slice %419 {offsets = [0, 0], sizes = [5, 32], strides = [1, 1]} : vector<5x160xf32> to vector<5x32xf32>
    %421 = arith.mulf %420, %418 : vector<5x32xf32>
    %cst_192 = arith.constant dense<0.000000e+00> : vector<5xf32>
    %422 = vector.multi_reduction <add>, %421, %cst_192 [1] : vector<5x32xf32> to vector<5xf32>
    %423 = vector.shape_cast %422 : vector<5xf32> to vector<5x1xf32>
    %424 = vector.extract_strided_slice %419 {offsets = [0, 32], sizes = [5, 32], strides = [1, 1]} : vector<5x160xf32> to vector<5x32xf32>
    %425 = arith.mulf %424, %418 : vector<5x32xf32>
    %cst_193 = arith.constant dense<0.000000e+00> : vector<5xf32>
    %426 = vector.multi_reduction <add>, %425, %cst_193 [1] : vector<5x32xf32> to vector<5xf32>
    %427 = vector.shape_cast %426 : vector<5xf32> to vector<5x1xf32>
    %428 = vector.extract_strided_slice %419 {offsets = [0, 64], sizes = [5, 32], strides = [1, 1]} : vector<5x160xf32> to vector<5x32xf32>
    %429 = arith.mulf %428, %418 : vector<5x32xf32>
    %cst_194 = arith.constant dense<0.000000e+00> : vector<5xf32>
    %430 = vector.multi_reduction <add>, %429, %cst_194 [1] : vector<5x32xf32> to vector<5xf32>
    %431 = vector.shape_cast %430 : vector<5xf32> to vector<5x1xf32>
    %432 = vector.extract_strided_slice %419 {offsets = [0, 96], sizes = [5, 32], strides = [1, 1]} : vector<5x160xf32> to vector<5x32xf32>
    %433 = arith.mulf %432, %418 : vector<5x32xf32>
    %cst_195 = arith.constant dense<0.000000e+00> : vector<5xf32>
    %434 = vector.multi_reduction <add>, %433, %cst_195 [1] : vector<5x32xf32> to vector<5xf32>
    %435 = vector.shape_cast %434 : vector<5xf32> to vector<5x1xf32>
    %436 = vector.extract_strided_slice %419 {offsets = [0, 128], sizes = [5, 32], strides = [1, 1]} : vector<5x160xf32> to vector<5x32xf32>
    %437 = arith.mulf %436, %418 : vector<5x32xf32>
    %cst_196 = arith.constant dense<0.000000e+00> : vector<5xf32>
    %438 = vector.multi_reduction <add>, %437, %cst_196 [1] : vector<5x32xf32> to vector<5xf32>
    %439 = vector.shape_cast %438 : vector<5xf32> to vector<5x1xf32>
    %440 = tpu.concatenate %423, %427, %431, %435, %439 in 1 : vector<5x1xf32>, vector<5x1xf32>, vector<5x1xf32>, vector<5x1xf32>, vector<5x1xf32> -> vector<5x5xf32>
    %cst_197 = arith.constant 0.000000e+00 : f32
    %441 = vector.broadcast %cst_197 : f32 to vector<5x58xf32>
    %442 = tpu.concatenate %356, %441 in 1 : vector<5x6xf32>, vector<5x58xf32> -> vector<5x64xf32>
    %cst_198 = arith.constant 0.000000e+00 : f32
    %443 = vector.broadcast %cst_198 : f32 to vector<5x59xf32>
    %444 = tpu.concatenate %440, %443 in 1 : vector<5x5xf32>, vector<5x59xf32> -> vector<5x64xf32>
    %445 = tpu.concatenate %442, %444 in 1 : vector<5x64xf32>, vector<5x64xf32> -> vector<5x128xf32>
    %cst_199 = arith.constant 0.000000e+00 : f32
    %446 = vector.broadcast %cst_199 : f32 to vector<3x128xf32>
    %447 = tpu.concatenate %445, %446 in 0 : vector<5x128xf32>, vector<3x128xf32> -> vector<8x128xf32>
    %c0_200 = arith.constant 0 : index
    %c0_201 = arith.constant 0 : index
    %c0_202 = arith.constant 0 : index
    %448 = vector.load %arg25[%c0_200, %c0_201, %c0_202] : memref<2x8x128xf32, #tpu.memory_space<vmem>>, vector<1x8x128xf32>
    %449 = vector.shape_cast %448 : vector<1x8x128xf32> to vector<8x128xf32>
    %450 = vector.shape_cast %447 : vector<8x128xf32> to vector<1x8x128xf32>
    tpu.vector_store %arg25[%c0_200, %c0_201, %c0_202], %450 {strides = array<i32>} : memref<2x8x128xf32, #tpu.memory_space<vmem>>, vector<1x8x128xf32>,
    %451 = vector.extract_strided_slice %346 {offsets = [5, 96], sizes = [5, 32], strides = [1, 1]} : vector<10x128xf32> to vector<5x32xf32>
    %452 = vector.extract_strided_slice %417 {offsets = [5, 0], sizes = [5, 160], strides = [1, 1]} : vector<10x160xf32> to vector<5x160xf32>
    %453 = vector.extract_strided_slice %452 {offsets = [0, 0], sizes = [5, 32], strides = [1, 1]} : vector<5x160xf32> to vector<5x32xf32>
    %454 = arith.mulf %453, %451 : vector<5x32xf32>
    %cst_203 = arith.constant dense<0.000000e+00> : vector<5xf32>
    %455 = vector.multi_reduction <add>, %454, %cst_203 [1] : vector<5x32xf32> to vector<5xf32>
    %456 = vector.shape_cast %455 : vector<5xf32> to vector<5x1xf32>
    %457 = vector.extract_strided_slice %452 {offsets = [0, 32], sizes = [5, 32], strides = [1, 1]} : vector<5x160xf32> to vector<5x32xf32>
    %458 = arith.mulf %457, %451 : vector<5x32xf32>
    %cst_204 = arith.constant dense<0.000000e+00> : vector<5xf32>
    %459 = vector.multi_reduction <add>, %458, %cst_204 [1] : vector<5x32xf32> to vector<5xf32>
    %460 = vector.shape_cast %459 : vector<5xf32> to vector<5x1xf32>
    %461 = vector.extract_strided_slice %452 {offsets = [0, 64], sizes = [5, 32], strides = [1, 1]} : vector<5x160xf32> to vector<5x32xf32>
    %462 = arith.mulf %461, %451 : vector<5x32xf32>
    %cst_205 = arith.constant dense<0.000000e+00> : vector<5xf32>
    %463 = vector.multi_reduction <add>, %462, %cst_205 [1] : vector<5x32xf32> to vector<5xf32>
    %464 = vector.shape_cast %463 : vector<5xf32> to vector<5x1xf32>
    %465 = vector.extract_strided_slice %452 {offsets = [0, 96], sizes = [5, 32], strides = [1, 1]} : vector<5x160xf32> to vector<5x32xf32>
    %466 = arith.mulf %465, %451 : vector<5x32xf32>
    %cst_206 = arith.constant dense<0.000000e+00> : vector<5xf32>
    %467 = vector.multi_reduction <add>, %466, %cst_206 [1] : vector<5x32xf32> to vector<5xf32>
    %468 = vector.shape_cast %467 : vector<5xf32> to vector<5x1xf32>
    %469 = vector.extract_strided_slice %452 {offsets = [0, 128], sizes = [5, 32], strides = [1, 1]} : vector<5x160xf32> to vector<5x32xf32>
    %470 = arith.mulf %469, %451 : vector<5x32xf32>
    %cst_207 = arith.constant dense<0.000000e+00> : vector<5xf32>
    %471 = vector.multi_reduction <add>, %470, %cst_207 [1] : vector<5x32xf32> to vector<5xf32>
    %472 = vector.shape_cast %471 : vector<5xf32> to vector<5x1xf32>
    %473 = tpu.concatenate %456, %460, %464, %468, %472 in 1 : vector<5x1xf32>, vector<5x1xf32>, vector<5x1xf32>, vector<5x1xf32>, vector<5x1xf32> -> vector<5x5xf32>
    %cst_208 = arith.constant 0.000000e+00 : f32
    %474 = vector.broadcast %cst_208 : f32 to vector<5x58xf32>
    %475 = tpu.concatenate %388, %474 in 1 : vector<5x6xf32>, vector<5x58xf32> -> vector<5x64xf32>
    %cst_209 = arith.constant 0.000000e+00 : f32
    %476 = vector.broadcast %cst_209 : f32 to vector<5x59xf32>
    %477 = tpu.concatenate %473, %476 in 1 : vector<5x5xf32>, vector<5x59xf32> -> vector<5x64xf32>
    %478 = tpu.concatenate %475, %477 in 1 : vector<5x64xf32>, vector<5x64xf32> -> vector<5x128xf32>
    %cst_210 = arith.constant 0.000000e+00 : f32
    %479 = vector.broadcast %cst_210 : f32 to vector<3x128xf32>
    %480 = tpu.concatenate %478, %479 in 0 : vector<5x128xf32>, vector<3x128xf32> -> vector<8x128xf32>
    %c1_211 = arith.constant 1 : index
    %c0_212 = arith.constant 0 : index
    %c0_213 = arith.constant 0 : index
    %481 = vector.load %arg25[%c1_211, %c0_212, %c0_213] : memref<2x8x128xf32, #tpu.memory_space<vmem>>, vector<1x8x128xf32>
    %482 = vector.shape_cast %481 : vector<1x8x128xf32> to vector<8x128xf32>
    %483 = vector.shape_cast %480 : vector<8x128xf32> to vector<1x8x128xf32>
    tpu.vector_store %arg25[%c1_211, %c0_212, %c0_213], %483 {strides = array<i32>} : memref<2x8x128xf32, #tpu.memory_space<vmem>>, vector<1x8x128xf32>,
    return
  }
}

</mosaic_0001>

<bundles_post_ra>
// kernel: bert_syntax_forward.1
= control target key start
LH: loop header
LB: loop body
LE: loop exit
PB: predicated region body
PF: predicated region fallthrough
CT: control target
= control target key end

     0   :  { %vm88_vm0 = vcmask 261120   ;;  %vm232_vm1 = vcmask 64512   ;;  %s4592_s28 = smov 88   ;;  %vm316_vm3 = vcmask 130048   ;;  %s5473_s26 = smov 80   ;;  %vm1054_vm4 = vcmask 195584   ;;  %s5430_s0 = inlined_call_operand.vmem [shape: f32[16,32], index: 0, kind: input, shape index: {}]   ;;  %s5431_s1 = inlined_call_operand.vmem [shape: f32[16,32], index: 1, kind: input, shape index: {}]   ;;  %s5432_s7 = inlined_call_operand.vmem [shape: s32[2,5,1], index: 7, kind: input, shape index: {}]   ;;  %s5433_s8 = inlined_call_operand.vmem [shape: f32[2,32,96], index: 8, kind: input, shape index: {}]   ;;  %s5434_s2 = inlined_call_operand.vmem [shape: f32[1,32], index: 2, kind: input, shape index: {}]   ;;  %s5435_s3 = inlined_call_operand.vmem [shape: f32[1,32], index: 3, kind: input, shape index: {}]   ;;  %s5436_s9 = inlined_call_operand.vmem [shape: f32[2,1,96], index: 9, kind: input, shape index: {}]   ;;  %s5437_s4 = inlined_call_operand.vmem [shape: f32[16,16], index: 4, kind: input, shape index: {}]   ;;  %s5438_s10 = inlined_call_operand.vmem [shape: f32[2,32,32], index: 10, kind: input, shape index: {}]   ;;  %s5439_s11 = inlined_call_operand.vmem [shape: f32[2,1,32], index: 11, kind: input, shape index: {}]   ;;  %s5440_s14 = inlined_call_operand.vmem [shape: f32[2,32,64], index: 14, kind: input, shape index: {}]   ;;  %s5441_s12 = inlined_call_operand.vmem [shape: f32[2,1,32], index: 12, kind: input, shape index: {}]   ;;  %s5442_s13 = inlined_call_operand.vmem [shape: f32[2,1,32], index: 13, kind: input, shape index: {}]   ;;  %s5443_s16 = inlined_call_operand.vmem [shape: f32[2,64,32], index: 16, kind: input, shape index: {}]   ;;  %s5444_s15 = inlined_call_operand.vmem [shape: f32[2,1,64], index: 15, kind: input, shape index: {}]   ;;  %s5445_s17 = inlined_call_operand.vmem [shape: f32[2,1,32], index: 17, kind: input, shape index: {}]   ;;  %s5446_s18 = inlined_call_operand.vmem [shape: f32[2,1,32], index: 18, kind: input, shape index: {}]   ;;  %s5447_s19 = inlined_call_operand.vmem [shape: f32[2,1,32], index: 19, kind: input, shape index: {}]   ;;  %s5448_s5 = inlined_call_operand.vmem [shape: f32[10,16], index: 5, kind: input, shape index: {}]   ;;  %s5449_s20 = inlined_call_operand.vmem [shape: f32[32,128], index: 20, kind: input, shape index: {}]   ;;  %s5450_s23 = inlined_call_operand.vmem [shape: f32[32,32], index: 23, kind: input, shape index: {}]   ;;  %s5451_s21 = inlined_call_operand.vmem [shape: f32[1,128], index: 21, kind: input, shape index: {}]   ;;  %s5452_s22 = inlined_call_operand.vmem [shape: f32[1,128], index: 22, kind: input, shape index: {}]   ;;  %s5453_s6 = inlined_call_operand.vmem [shape: f32[2,1,5], index: 6, kind: input, shape index: {}]   ;;  %s5454_s24 = inlined_call_operand.vmem [shape: f32[32,160], index: 24, kind: input, shape index: {}]   ;;  %s5455_s25 = inlined_call_operand.vmem [shape: f32[2,8,128], index: 25, kind: output, shape index: {}]  }
   0x1   :  { %5481 = sst [smem:[#allocation2_spill]] %s5430_s0  ;;  %vm4806_vm2 = vmpackc.low %vm232_vm1, %vm232_vm1  ;;  %s5466_s0 = smov 40   ;;  %vm1312_vm5 = vcmask 523264   ;;  %vm3021_vm6 = vcmask 1040384   ;;  %vm3223_vm7 = vcmask 1043456   ;;  %vm4607_vm8 = vmmov 0  }
   0x2   :  { %5482 = sst [smem:[#allocation3_spill]] %s5431_s1  ;;  %s5470_s29 = smov 48   ;;  %vm3230_vm9 = vcmask 1042432   ;;  %vm3110_vm10 = vcmask 7168   ;;  %vm3120_vm14 = vcmask 45056  }
   0x3   :  { %5483 = sst [smem:[#allocation4_spill]] %s5433_s8  ;;  %s5474_s8 = smov 64  }
   0x4   :  { %5484 = sst [smem:[#allocation5_spill]] %s5434_s2  ;;  %s5493_s2 = sld [smem:[#allocation4_spill]] }
   0x5   :  { %5485 = sst [smem:[#allocation6_spill]] %s5435_s3  ;;  %s4594_s3 = smov 120  }
   0x6   :  { %5486 = sst [smem:[#allocation7_spill]] %s5436_s9  ;;  %s5491_s9 = sld [smem:[#allocation2_spill]] }
   0x7   :  { %5487 = sst [smem:[#allocation8_spill]] %s5437_s4  ;;  %s5494_s4 = sld [smem:[#allocation5_spill]] }
   0x8   :  { %5488 = sst [smem:[#allocation9_spill]] %s5438_s10  ;;  %s5495_s1 = sld [smem:[#allocation6_spill]] }
   0x9   :  { %5489 = sst [smem:[#allocation10_spill]] %s5439_s11  ;;  %s5496_s27 = sld [smem:[#allocation7_spill]] }
   0xa   :  { %5490 = sst [smem:[#allocation11_spill]] %s5450_s23  ;;  %v134_v18 = vld [vmem:[%s5493_s2] sm:$0xff]  ;;  %v135_v19 = vld [vmem:[%s5493_s2 + $0x8] sm:$0xff]  ;;  %v136_v20 = vld [vmem:[%s5493_s2 + $0x10] sm:$0xff]  ;;  %s4593_s11 = smov 96  }
   0xb   :  { %s5492_s23 = sld [smem:[#allocation3_spill]]  ;;  %v4211_v21 = vpack.c.bf16 %v135_v19, %v134_v18  ;;  %v137_v22 = vld [vmem:[%s5493_s2 + $0x18] sm:$0xff]  ;;  %s5499_s7 = sld [smem:[#allocation8_spill]] }
   0xc   :  { %v80_v0 = vld [vmem:[%s5491_s9] sm:$0xff]  ;;  %v81_v2 = vld [vmem:[%s5491_s9 + $0x8] sm:$0xff]  ;;  %v4215_v23 = vpack.c.bf16 %v137_v22, %v136_v20  ;;  %s5467_s10 = smov 72   ;;  %s5464_s9 = smov 8  }
   0xd   :  { %4212 = vmatprep.subr.bf16.mxu0 %v4211_v21  ;;  %v3669_v31 = vld [vmem:[%s5494_s4] ss:$0 sm:$0xff]  ;;  %s5480_s4 = smov 56   ;;  %s5505_s30 = smov 112  }
   0xe   :  { %4214 = vmatpush3.bf16.msra.mxu0 %v4211_v21  ;;  %v3670_v33 = vld [vmem:[%s5495_s1] ss:$0 sm:$0xff]  ;;  %s5471_s1 = smov 112  }
   0xf   :  { %4216 = vmatprep.subr.bf16.mxu0 %v4215_v23  ;;  %v3671_v40 = vld [vmem:[%s5496_s27] ss:$0 sm:$0xff] }
  0x11   :  { %v82_v1 = vld [vmem:[%s5492_s23] sm:$0xff]  ;;  %v83_v4 = vld [vmem:[%s5492_s23 + $0x8] sm:$0xff]  ;;  %s5468_s23 = smov 104  }
  0x12   :  { %v84_v3 = vadd.f32 %v82_v1, %v80_v0  ;;  %v85_v5 = vadd.f32 %v83_v4, %v81_v2  ;;  %4218 = vmatpush3.bf16.msra.mxu0 %v4215_v23  ;;  %v4825_v57 = vld [vmem:[%s5499_s7 + $0x8] sm:$0xff]  ;;  %v4830_v58 = vld [vmem:[%s5499_s7] sm:$0xff] }
  0x14   :  { %v89_v6 = vsel %vm88_vm0, %v84_v3, 0.0  ;;  %v92_v7 = vsel %vm88_vm0, %v85_v5, 0.0 }
  0x15   :  { %90 = vadd.xlane.f32.xlu0 %v89_v6 }
  0x19   :  { %93 = vadd.xlane.f32.xlu0 %v92_v7 }
  0xa2   :  { %v91_v8 = vpop.xlane.xlu0 %90 }
  0xa3   :  { %v96_v9 = vmul.f32 0.03125, %v91_v8 }
  0xa5   :  { %v98_v10 = vsub.f32 %v84_v3, %v96_v9 }
  0xa6   :  { %v94_v11 = vpop.xlane.xlu0 %93 }
  0xa7   :  { %v97_v12 = vmul.f32 0.03125, %v94_v11  ;;  %v100_v13 = vmul.f32 %v98_v10, %v98_v10 }
  0xa9   :  { %v99_v14 = vsub.f32 %v85_v5, %v97_v12  ;;  %v102_v15 = vsel %vm88_vm0, %v100_v13, 0.0 }
  0xaa   :  { %103 = vadd.xlane.f32.xlu1 %v102_v15 }
  0xab   :  { %v101_v16 = vmul.f32 %v99_v14, %v99_v14 }
  0xad   :  { %v105_v17 = vsel %vm88_vm0, %v101_v16, 0.0 }
  0xae   :  { %106 = vadd.xlane.f32.xlu1 %v105_v17 }
 0x137   :  { %v104_v24 = vpop.xlane.xlu1 %103 }
 0x138   :  { %v108_v25 = vmul.f32 0.03125, %v104_v24 }
 0x13a   :  { %v110_v26 = vadd.f32 1e-12, %v108_v25 }
 0x13b   :  { %v107_v27 = vpop.xlane.xlu1 %106 }
 0x13c   :  { %4498 = vrsqrt.f32 %v110_v26  ;;  %v109_v28 = vmul.f32 0.03125, %v107_v27 }
 0x13e   :  { %v111_v29 = vadd.f32 1e-12, %v109_v28 }
 0x140   :  { %4500 = vrsqrt.f32 %v111_v29 }
 0x146   :  { %v4499_v30 = vpop.eup %4498 }
 0x147   :  { %v114_v32 = vmul.f32 %v4499_v30, %v98_v10 }
 0x149   :  { %v122_v34 = vmul.f32 %v3669_v31, %v114_v32 }
 0x14a   :  { %v4501_v35 = vpop.eup %4500 }
 0x14b   :  { %v115_v36 = vmul.f32 %v4501_v35, %v99_v14  ;;  %v4775_v37 = vadd.f32 %v3670_v33, %v122_v34 }
 0x14d   :  { %v123_v38 = vmul.f32 %v3669_v31, %v115_v36  ;;  %3954 = vmatprep.mubr.msk.f32.mxu0 %vm88_vm0, %v4775_v37 }
 0x14f   :  { %v4779_v39 = vadd.f32 %v3670_v33, %v123_v38 }
 0x151   :  { %3955 = vmatmul.mubr.msk.f32.vlgmr.msra.gmra.mrb[0].mxu0 %vm88_vm0, %v4779_v39 }
 0x224   :  { %v3956_v41 = vpop.f32.mrb[0].mxu0 }
 0x225   :  { %v4786_v42 = vadd.f32 %v3956_v41, %v3671_v40  ;;  %v217_v43 = vpop.f32.mrb[1].mxu0 }
 0x226   :  { %v4788_v44 = vadd.f32 %v3671_v40, %v217_v43 }
 0x228   :  { %3961 = vmatprep.mubr.msk.f32.mxu1 %vm232_vm1, %v4788_v44  ;;  %v4794_v45 = vpack.i.bf16 %v4786_v42, %v4788_v44 }
 0x22a   :  { %4424 = vrot.lane.b32.xlu1 %v4794_v45, %s4592_s28  ;;  %4419 = vrot.lane.b32.xlu0 %v4794_v45, %s4593_s11 }
 0x22e   :  { %426 = vrot.lane.b32.xlu1 %v4788_v44, %s4594_s3 }
 0x232   :  { %428 = vrot.lane.b32.xlu1 %v4786_v42, %s4594_s3 }
 0x29c   :  { %v4425_v46 = vpop.permute.xlu1 %4424  ;;  %v4420_v47 = vpop.permute.xlu0 %4419 }
 0x29d   :  { %v4427_v48 = vunpack.i.h.bf16 %v4425_v46  ;;  %v4426_v49 = vunpack.i.l.bf16 %v4425_v46  ;;  %v4422_v50 = vunpack.i.h.bf16 %v4420_v47  ;;  %v4421_v51 = vunpack.i.l.bf16 %v4420_v47 }
 0x29f   :  { %v4219_v53 = vpack.c.bf16 %v4422_v50, %v4421_v51  ;;  %v4229_v54 = vpack.c.bf16 %v4427_v48, %v4426_v49 }
 0x2a0   :  { %v427_v55 = vpop.permute.xlu1 %426 }
 0x2a1   :  { %4221 = vmatprep.subr.msk.bf16.mxu1 %vm4806_vm2, %v4219_v53 }
 0x2a2   :  { %4224 = vmatpush3.bf16.xpose.msk.msra.mxu1 %vm4806_vm2, %v4219_v53 }
 0x2a3   :  { %4231 = vmatprep.subr.msk.bf16.mxu1 %vm4806_vm2, %v4229_v54 }
 0x2a4   :  { %v429_v56 = vpop.permute.xlu1 %428 }
 0x2a9   :  { %3962 = vmatmul.mubr.msk.f32.vlgmr.msra.gmra.mrb[0].mxu1 %vm232_vm1, %v4786_v42 }
 0x2aa   :  { %4234 = vmatpush3.bf16.xpose.msk.msra.mxu1 %vm4806_vm2, %v4229_v54  ;;  %3975 = vmatprep.mubr.msk.f32.mxu1 %vm232_vm1, %v427_v55 }
 0x2b1   :  { %3976 = vmatmul.mubr.msk.f32.vlgmr.msra.gmra.mrb[2].mxu1 %vm232_vm1, %v429_v56 }
 0x37c   :  { %v3963_v59 = vpop.f32.mrb[0].mxu1 }
 0x37d   :  { %v313_v60 = vadd.f32 %v3963_v59, %v4825_v57  ;;  %v307_v61 = vpop.f32.mrb[1].mxu1 }
 0x37e   :  { %v308_v62 = vadd.f32 %v307_v61, %v4830_v58 }
 0x37f   :  { %v320_v63 = vsel %vm316_vm3, %v313_v60, -inf }
 0x380   :  { %321 = vmax.xlane.f32.xlu1 %v320_v63  ;;  %v317_v0 = vsel %vm316_vm3, %v308_v62, -inf }
 0x381   :  { %318 = vmax.xlane.f32.xlu0 %v317_v0 }
 0x384   :  { %v3977_v1 = vpop.f32.mrb[2].mxu1 }
 0x385   :  { %v508_v2 = vpop.f32.mrb[3].mxu1  ;;  %v514_v4 = vadd.f32 %v3977_v1, %v4825_v57 }
 0x386   :  { %v509_v3 = vadd.f32 %v508_v2, %v4830_v58 }
 0x387   :  { %v520_v6 = vsel %vm316_vm3, %v514_v4, -inf }
 0x388   :  { %v517_v5 = vsel %vm316_vm3, %v509_v3, -inf }
 0x389   :  { %518 = vmax.xlane.f32.xlu0 %v517_v5 }
 0x38d   :  { %521 = vmax.xlane.f32.xlu0 %v520_v6 }
 0x40d   :  { %v322_v7 = vpop.xlane.xlu1 %321 }
 0x40e   :  { %v324_v8 = vsub.f32 %v313_v60, %v322_v7  ;;  %v319_v9 = vpop.xlane.xlu0 %318 }
 0x40f   :  { %v323_v10 = vsub.f32 %v308_v62, %v319_v9 }
 0x410   :  { %v327_v11 = vmul.f32 1.442695, %v324_v8 }
 0x411   :  { %v325_v12 = vmul.f32 1.442695, %v323_v10 }
 0x412   :  { %4502 = vpow2.f32 %v327_v11 }
 0x413   :  { %4504 = vpow2.f32 %v325_v12 }
 0x416   :  { %v519_v13 = vpop.xlane.xlu0 %518 }
 0x417   :  { %v523_v14 = vsub.f32 %v509_v3, %v519_v13 }
 0x419   :  { %v525_v15 = vmul.f32 1.442695, %v523_v14 }
 0x41a   :  { %v522_v16 = vpop.xlane.xlu0 %521 }
 0x41b   :  { %4506 = vpow2.f32 %v525_v15  ;;  %v524_v17 = vsub.f32 %v514_v4, %v522_v16 }
 0x41c   :  { %v4503_v18 = vpop.eup %4502 }
 0x41d   :  { %v4505_v19 = vpop.eup %4504  ;;  %v527_v20 = vmul.f32 1.442695, %v524_v17  ;;  %v332_v21 = vsel %vm316_vm3, %v4503_v18, 0.0 }
 0x41e   :  { %333 = vadd.xlane.f32.xlu1 %v332_v21  ;;  %v329_v22 = vsel %vm316_vm3, %v4505_v19, 0.0 }
 0x41f   :  { %4508 = vpow2.f32 %v527_v20  ;;  %330 = vadd.xlane.f32.xlu0 %v329_v22 }
 0x425   :  { %v4507_v23 = vpop.eup %4506 }
 0x426   :  { %v529_v24 = vsel %vm316_vm3, %v4507_v23, 0.0 }
 0x427   :  { %530 = vadd.xlane.f32.xlu0 %v529_v24 }
 0x429   :  { %v4509_v25 = vpop.eup %4508 }
 0x42a   :  { %v532_v26 = vsel %vm316_vm3, %v4509_v25, 0.0 }
 0x42b   :  { %533 = vadd.xlane.f32.xlu1 %v532_v26 }
 0x43c   :  { %4434 = vrot.lane.b32.xlu1 %v4794_v45, %s5480_s4  ;;  %s5509_s4 = smov 40  }
 0x43d   :  { %4429 = vrot.lane.b32.xlu0 %v4794_v45, %s5474_s8 }
 0x440   :  { %4439 = vrot.lane.b32.xlu1 %v4794_v45, %s5473_s26 }
 0x441   :  { %626 = vrot.lane.b32.xlu0 %v4788_v44, %s5471_s1 }
 0x444   :  { %4444 = vrot.lane.b32.xlu1 %v4794_v45, %s5467_s10  ;;  %s5476_s10 = smov 24  }
 0x445   :  { %826 = vrot.lane.b32.xlu0 %v4788_v44, %s5468_s23 }
 0x448   :  { %628 = vrot.lane.b32.xlu1 %v4786_v42, %s5471_s1  ;;  %s5501_s1 = sld [smem:[#allocation10_spill]] }
 0x44c   :  { %828 = vrot.lane.b32.xlu1 %v4786_v42, %s5468_s23 }
 0x4ab   :  { %v334_v28 = vpop.xlane.xlu1 %333 }
 0x4ac   :  { %v331_v27 = vpop.xlane.xlu0 %330 }
 0x4ad   :  { %4510 = vrcp.f32 %v331_v27 }
 0x4ae   :  { %4512 = vrcp.f32 %v334_v28 }
 0x4b4   :  { %v531_v29 = vpop.xlane.xlu0 %530 }
 0x4b5   :  { %4514 = vrcp.f32 %v531_v29 }
 0x4b7   :  { %v4511_v30 = vpop.eup %4510 }
 0x4b8   :  { %v534_v31 = vpop.xlane.xlu1 %533  ;;  %v4430_v32 = vpop.permute.xlu0 %4429  ;;  %v337_v33 = vmul.f32 %v4511_v30, %v4505_v19 }
 0x4b9   :  { %4516 = vrcp.f32 %v534_v31  ;;  %v4432_v34 = vunpack.i.h.bf16 %v4430_v32  ;;  %v4431_v35 = vunpack.i.l.bf16 %v4430_v32  ;;  %v4513_v38 = vpop.eup %4512 }
 0x4ba   :  { %3968 = vmatprep.mubr.msk.f32.mxu0 %vm316_vm3, %v337_v33  ;;  %v338_v46 = vmul.f32 %v4513_v38, %v4503_v18 }
 0x4bb   :  { %v4225_v36 = vpack.c.bf16 %v4432_v34, %v4431_v35 }
 0x4bc   :  { %v4435_v40 = vpop.permute.xlu1 %4434  ;;  %v627_v41 = vpop.permute.xlu0 %626 }
 0x4bd   :  { %v4437_v42 = vunpack.i.h.bf16 %v4435_v40  ;;  %v4436_v43 = vunpack.i.l.bf16 %v4435_v40  ;;  %4226 = vmatprep.subr.bf16.mxu0 %v4225_v36 }
 0x4be   :  { %4228 = vmatpush3.bf16.msra.mxu0 %v4225_v36 }
 0x4bf   :  { %v4515_v44 = vpop.eup %4514  ;;  %v4235_v47 = vpack.c.bf16 %v4437_v42, %v4436_v43 }
 0x4c0   :  { %v4440_v48 = vpop.permute.xlu1 %4439  ;;  %v827_v49 = vpop.permute.xlu0 %826  ;;  %v537_v50 = vmul.f32 %v4515_v44, %v4507_v23 }
 0x4c1   :  { %v4442_v51 = vunpack.i.h.bf16 %v4440_v48  ;;  %v4441_v53 = vunpack.i.l.bf16 %v4440_v48  ;;  %3969 = vmatmul.mubr.msk.f32.vlgmr.msra.gmra.mrb[2].mxu0 %vm316_vm3, %v338_v46  ;;  %4236 = vmatprep.subr.bf16.mxu0 %v4235_v47 }
 0x4c2   :  { %4003 = vmatprep.mubr.msk.f32.mxu1 %vm232_vm1, %v827_v49  ;;  %4238 = vmatpush3.bf16.msra.mxu0 %v4235_v47 }
 0x4c3   :  { %v4517_v54 = vpop.eup %4516  ;;  %v4239_v55 = vpack.c.bf16 %v4442_v51, %v4441_v53  ;;  %3982 = vmatprep.mubr.msk.f32.mxu0 %vm316_vm3, %v537_v50 }
 0x4c4   :  { %v4445_v56 = vpop.permute.xlu1 %4444  ;;  %v538_v59 = vmul.f32 %v4517_v54, %v4509_v25 }
 0x4c5   :  { %v4447_v60 = vunpack.i.h.bf16 %v4445_v56  ;;  %v4446_v61 = vunpack.i.l.bf16 %v4445_v56  ;;  %4241 = vmatprep.subr.msk.bf16.mxu0 %vm4806_vm2, %v4239_v55 }
 0x4c6   :  { %3983 = vmatmul.mubr.msk.f32.vlgmr.msra.gmra.mrb[4].mxu0 %vm316_vm3, %v538_v59 }
 0x4c7   :  { %v4249_v62 = vpack.c.bf16 %v4447_v60, %v4446_v61  ;;  %3989 = vmatprep.mubr.msk.f32.mxu0 %vm232_vm1, %v627_v41 }
 0x4c8   :  { %v629_v63 = vpop.permute.xlu1 %628 }
 0x4c9   :  { %4251 = vmatprep.subr.msk.bf16.mxu1 %vm4806_vm2, %v4249_v62 }
 0x4ca   :  { %4254 = vmatpush3.bf16.xpose.msk.msra.mxu1 %vm4806_vm2, %v4249_v62 }
 0x4cb   :  { %4244 = vmatpush3.bf16.xpose.msk.msra.mxu0 %vm4806_vm2, %v4239_v55 }
 0x4cc   :  { %v829_v0 = vpop.permute.xlu1 %828 }
 0x4d1   :  { %4004 = vmatmul.mubr.msk.f32.vlgmr.msra.gmra.mrb[4].mxu1 %vm232_vm1, %v829_v0 }
 0x4d2   :  { %3990 = vmatmul.mubr.msk.f32.vlgmr.msra.gmra.mrb[6].mxu0 %vm232_vm1, %v629_v63 }
 0x594   :  { %v4876_v1 = vpop.f32.mrb[2].mxu0 }
 0x595   :  { %v4878_v2 = vpop.f32.mrb[3].mxu0 }
 0x599   :  { %v3984_v3 = vpop.f32.mrb[4].mxu0 }
 0x59a   :  { %v617_v4 = vpop.f32.mrb[5].mxu0 }
 0x5a4   :  { %v4005_v5 = vpop.f32.mrb[4].mxu1 }
 0x5a5   :  { %v3991_v6 = vpop.f32.mrb[6].mxu0  ;;  %v908_v7 = vpop.f32.mrb[5].mxu1  ;;  %v914_v14 = vadd.f32 %v4005_v5, %v4825_v57 }
 0x5a6   :  { %v714_v8 = vadd.f32 %v3991_v6, %v4825_v57  ;;  %v708_v9 = vpop.f32.mrb[7].mxu0  ;;  %v909_v12 = vadd.f32 %v908_v7, %v4830_v58 }
 0x5a7   :  { %v709_v10 = vadd.f32 %v708_v9, %v4830_v58  ;;  %v920_v16 = vsel %vm316_vm3, %v914_v14, -inf }
 0x5a8   :  { %v720_v11 = vsel %vm316_vm3, %v714_v8, -inf  ;;  %v917_v15 = vsel %vm316_vm3, %v909_v12, -inf }
 0x5a9   :  { %721 = vmax.xlane.f32.xlu1 %v720_v11  ;;  %v717_v13 = vsel %vm316_vm3, %v709_v10, -inf }
 0x5aa   :  { %718 = vmax.xlane.f32.xlu0 %v717_v13 }
 0x5ae   :  { %918 = vmax.xlane.f32.xlu0 %v917_v15 }
 0x5b2   :  { %921 = vmax.xlane.f32.xlu0 %v920_v16 }
 0x636   :  { %v722_v19 = vpop.xlane.xlu1 %721 }
 0x637   :  { %v719_v17 = vpop.xlane.xlu0 %718  ;;  %v724_v22 = vsub.f32 %v714_v8, %v722_v19 }
 0x638   :  { %v723_v18 = vsub.f32 %v709_v10, %v719_v17 }
 0x639   :  { %v727_v27 = vmul.f32 1.442695, %v724_v22 }
 0x63a   :  { %v725_v23 = vmul.f32 1.442695, %v723_v18 }
 0x63b   :  { %v919_v20 = vpop.xlane.xlu0 %918 }
 0x63c   :  { %v923_v21 = vsub.f32 %v909_v12, %v919_v20 }
 0x63e   :  { %v925_v24 = vmul.f32 1.442695, %v923_v21 }
 0x63f   :  { %v922_v25 = vpop.xlane.xlu0 %921 }
 0x640   :  { %4518 = vpow2.f32 %v925_v24  ;;  %v924_v26 = vsub.f32 %v914_v14, %v922_v25 }
 0x641   :  { %4520 = vpow2.f32 %v725_v23 }
 0x642   :  { %v927_v28 = vmul.f32 1.442695, %v924_v26 }
 0x644   :  { %4522 = vpow2.f32 %v927_v28 }
 0x645   :  { %4524 = vpow2.f32 %v727_v27 }
 0x64a   :  { %v4519_v29 = vpop.eup %4518 }
 0x64b   :  { %v929_v30 = vsel %vm316_vm3, %v4519_v29, 0.0  ;;  %v4521_v31 = vpop.eup %4520 }
 0x64c   :  { %930 = vadd.xlane.f32.xlu0 %v929_v30  ;;  %v729_v33 = vsel %vm316_vm3, %v4521_v31, 0.0 }
 0x64e   :  { %v4523_v32 = vpop.eup %4522 }
 0x64f   :  { %v932_v34 = vsel %vm316_vm3, %v4523_v32, 0.0  ;;  %v4525_v35 = vpop.eup %4524 }
 0x650   :  { %730 = vadd.xlane.f32.xlu0 %v729_v33  ;;  %933 = vadd.xlane.f32.xlu1 %v932_v34  ;;  %v732_v36 = vsel %vm316_vm3, %v4525_v35, 0.0 }
 0x654   :  { %733 = vadd.xlane.f32.xlu1 %v732_v36 }
 0x665   :  { %4454 = vrot.lane.b32.xlu1 %v4794_v45, %s5466_s0  ;;  %s5500_s0 = sld [smem:[#allocation9_spill]] }
 0x666   :  { %4449 = vrot.lane.b32.xlu0 %v4794_v45, %s5470_s29 }
 0x669   :  { %1028 = vrot.lane.b32.xlu1 %v617_v4, %s5464_s9 }
 0x66b   :  { %v1057_v62 = vld [vmem:[%s5500_s0] sm:$0xff]  ;;  %v1058_v63 = vld [vmem:[%s5500_s0 + $0x8] sm:$0xff]  ;;  %v1060_v4 = vld [vmem:[%s5500_s0 + $0x18] sm:$0xff] }
 0x66c   :  { %v4259_v0 = vpack.c.bf16 %v1058_v63, %v1057_v62 }
 0x66d   :  { %1030 = vrot.lane.b32.xlu1 %v3984_v3, %s5464_s9  ;;  %v1059_v3 = vld [vmem:[%s5500_s0 + $0x10] sm:$0xff]  ;;  %s5478_s9 = smov 16  }
 0x66e   :  { %v4263_v5 = vpack.c.bf16 %v1060_v4, %v1059_v3  ;;  %v1298_v3 = vld [vmem:[%s5443_s16 + $0x8] sm:$0xff] }
 0x6d9   :  { %v931_v38 = vpop.xlane.xlu0 %930 }
 0x6dd   :  { %v934_v40 = vpop.xlane.xlu1 %933  ;;  %v731_v41 = vpop.xlane.xlu0 %730 }
 0x6de   :  { %4526 = vrcp.f32 %v731_v41 }
 0x6df   :  { %4528 = vrcp.f32 %v931_v38 }
 0x6e1   :  { %v734_v42 = vpop.xlane.xlu1 %733  ;;  %v4450_v43 = vpop.permute.xlu0 %4449 }
 0x6e2   :  { %4530 = vrcp.f32 %v734_v42  ;;  %v4452_v44 = vunpack.i.h.bf16 %v4450_v43  ;;  %v4451_v46 = vunpack.i.l.bf16 %v4450_v43  ;;  %v1197_v42 = vld [vmem:[%s5440_s14 + $0x10] sm:$0xff]  ;;  %v1198_v43 = vld [vmem:[%s5440_s14 + $0x18] sm:$0xff] }
 0x6e3   :  { %4532 = vrcp.f32 %v934_v40  ;;  %v1196_v40 = vld [vmem:[%s5440_s14 + $0x8] sm:$0xff] }
 0x6e4   :  { %v4245_v47 = vpack.c.bf16 %v4452_v44, %v4451_v46  ;;  %v4271_v44 = vpack.c.bf16 %v1198_v43, %v1197_v42 }
 0x6e5   :  { %v4455_v48 = vpop.permute.xlu1 %4454 }
 0x6e6   :  { %v4457_v49 = vunpack.i.h.bf16 %v4455_v48  ;;  %v4456_v45 = vunpack.i.l.bf16 %v4455_v48  ;;  %4246 = vmatprep.subr.bf16.mxu0 %v4245_v47 }
 0x6e7   :  { %4248 = vmatpush3.bf16.msra.mxu0 %v4245_v47 }
 0x6e8   :  { %v4255_v50 = vpack.c.bf16 %v4457_v49, %v4456_v45  ;;  %v4527_v51 = vpop.eup %4526 }
 0x6e9   :  { %v737_v53 = vmul.f32 %v4527_v51, %v4521_v31  ;;  %v4529_v54 = vpop.eup %4528  ;;  %v1029_v10 = vpop.permute.xlu1 %1028 }
 0x6ea   :  { %4256 = vmatprep.subr.bf16.mxu0 %v4255_v50  ;;  %v937_v60 = vmul.f32 %v4529_v54, %v4519_v29  ;;  %v1050_v14 = vsel %vm232_vm1, %v4878_v2, %v1029_v10  ;;  %v3698_v2 = vld [vmem:[%s5501_s1] ss:$0 sm:$0xff] }
 0x6eb   :  { %3996 = vmatprep.mubr.msk.f32.mxu0 %vm316_vm3, %v737_v53  ;;  %v3701_v53 = vld [vmem:[%s5441_s12] ss:$0 sm:$0xff] }
 0x6ec   :  { %v4531_v55 = vpop.eup %4530 }
 0x6ed   :  { %v738_v56 = vmul.f32 %v4531_v55, %v4525_v35  ;;  %v4533_v59 = vpop.eup %4532  ;;  %v1031_v11 = vpop.permute.xlu1 %1030  ;;  %v3702_v55 = vld [vmem:[%s5442_s13] ss:$0 sm:$0xff] }
 0x6ee   :  { %v938_v61 = vmul.f32 %v4533_v59, %v4523_v32  ;;  %v1051_v16 = vsel %vm232_vm1, %v4876_v1, %v1031_v11  ;;  %v1303_v11 = vld [vmem:[%s5443_s16 + $0x30] sm:$0xff] }
 0x6ef   :  { %3997 = vmatmul.mubr.msk.f32.vlgmr.msra.gmra.mrb[8].mxu0 %vm316_vm3, %v738_v56 }
 0x6f0   :  { %4258 = vmatpush3.bf16.msra.mxu0 %v4255_v50  ;;  %4010 = vmatprep.mubr.msk.f32.mxu0 %vm316_vm3, %v937_v60 }
 0x6f1   :  { %4260 = vmatprep.subr.bf16.mxu0 %v4259_v0 }
 0x6f3   :  { %4011 = vmatmul.mubr.msk.f32.vlgmr.msra.gmra.mrb[10].mxu0 %vm316_vm3, %v938_v61 }
 0x6f4   :  { %4262 = vmatpush3.bf16.msra.mxu0 %v4259_v0  ;;  %v1297_v0 = vld [vmem:[%s5443_s16] sm:$0xff] }
 0x6f5   :  { %4264 = vmatprep.subr.bf16.mxu0 %v4263_v5  ;;  %v4275_v4 = vpack.c.bf16 %v1298_v3, %v1297_v0 }
 0x6f8   :  { %4266 = vmatpush3.bf16.msra.mxu0 %v4263_v5  ;;  %v1299_v5 = vld [vmem:[%s5443_s16 + $0x10] sm:$0xff] }
 0x6f9   :  { %4276 = vmatprep.subr.bf16.mxu0 %v4275_v4 }
 0x7c2   :  { %v3998_v6 = vpop.f32.mrb[8].mxu0 }
 0x7c3   :  { %1038 = vrot.lane.b32.xlu1 %v3998_v6, %s5478_s9  ;;  %v817_v7 = vpop.f32.mrb[9].mxu0  ;;  %v1300_v6 = vld [vmem:[%s5443_s16 + $0x18] sm:$0xff] }
 0x7c4   :  { %1036 = vrot.lane.b32.xlu0 %v817_v7, %s5478_s9  ;;  %v4279_v7 = vpack.c.bf16 %v1300_v6, %v1299_v5  ;;  %s5510_s9 = smov 8  }
 0x7c6   :  { %v4012_v8 = vpop.f32.mrb[10].mxu0 }
 0x7c7   :  { %1046 = vrot.lane.b32.xlu1 %v4012_v8, %s5476_s10  ;;  %v1017_v9 = vpop.f32.mrb[11].mxu0  ;;  %v1301_v8 = vld [vmem:[%s5443_s16 + $0x20] sm:$0xff] }
 0x7c8   :  { %1044 = vrot.lane.b32.xlu0 %v1017_v9, %s5476_s10  ;;  %v1302_v9 = vld [vmem:[%s5443_s16 + $0x28] sm:$0xff]  ;;  %s5507_s10 = smov 104  }
 0x7c9   :  { %v4283_v10 = vpack.c.bf16 %v1302_v9, %v1301_v8  ;;  %v3716_v9 = vld [vmem:[%s5496_s27 + $0x1] ss:$0 sm:$0xff]  ;;  %s5502_s27 = smov 56  }
 0x835   :  { %v1039_v12 = vpop.permute.xlu1 %1038 }
 0x836   :  { %v1037_v13 = vpop.permute.xlu0 %1036  ;;  %v1053_v19 = vsel %vm316_vm3, %v1051_v16, %v1039_v12  ;;  %v1304_v12 = vld [vmem:[%s5443_s16 + $0x38] sm:$0xff] }
 0x837   :  { %v1052_v17 = vsel %vm316_vm3, %v1050_v14, %v1037_v13  ;;  %v4287_v13 = vpack.c.bf16 %v1304_v12, %v1303_v11  ;;  %v3703_v14 = vld [vmem:[%s5444_s15] ss:$0 sm:$0xff] }
 0x839   :  { %v1047_v15 = vpop.permute.xlu1 %1046 }
 0x83a   :  { %v1045_v18 = vpop.permute.xlu0 %1044  ;;  %v1056_v21 = vsel %vm1054_vm4, %v1053_v19, %v1047_v15 }
 0x83b   :  { %v1055_v20 = vsel %vm1054_vm4, %v1052_v17, %v1045_v18 }
 0x83c   :  { %4021 = vmatprep.mubr.msk.f32.mxu0 %vm88_vm0, %v1055_v20 }
 0x83d   :  { %4022 = vmatmul.mubr.msk.f32.vlgmr.msra.gmra.mrb[12].mxu0 %vm88_vm0, %v1056_v21 }
 0x83e   :  { %4278 = vmatpush3.bf16.msra.mxu0 %v4275_v4  ;;  %v3710_v4 = vld [vmem:[%s5447_s19] ss:$0 sm:$0xff] }
 0x83f   :  { %4280 = vmatprep.subr.bf16.mxu0 %v4279_v7 }
 0x842   :  { %4282 = vmatpush3.bf16.msra.mxu0 %v4279_v7 }
 0x843   :  { %4284 = vmatprep.subr.bf16.mxu0 %v4283_v10 }
 0x846   :  { %4286 = vmatpush3.bf16.msra.mxu0 %v4283_v10 }
 0x847   :  { %4288 = vmatprep.subr.bf16.mxu0 %v4287_v13 }
 0x84a   :  { %4290 = vmatpush3.bf16.msra.mxu0 %v4287_v13 }
 0x910   :  { %v4023_v22 = vpop.f32.mrb[12].mxu0 }
 0x911   :  { %v1146_v23 = vadd.f32 %v4023_v22, %v3698_v2  ;;  %v1140_v1 = vpop.f32.mrb[13].mxu0 }
 0x912   :  { %v1141_v24 = vadd.f32 %v3698_v2, %v1140_v1 }
 0x913   :  { %v1150_v25 = vadd.f32 %v1146_v23, %v4779_v39 }
 0x914   :  { %v1149_v26 = vadd.f32 %v1141_v24, %v4775_v37  ;;  %v1195_v37 = vld [vmem:[%s5440_s14] sm:$0xff] }
 0x915   :  { %v1156_v27 = vsel %vm88_vm0, %v1150_v25, 0.0  ;;  %v4267_v41 = vpack.c.bf16 %v1196_v40, %v1195_v37 }
 0x916   :  { %1157 = vadd.xlane.f32.xlu1 %v1156_v27  ;;  %v1153_v28 = vsel %vm88_vm0, %v1149_v26, 0.0  ;;  %v3706_v27 = vld [vmem:[%s5445_s17] ss:$0 sm:$0xff] }
 0x917   :  { %1154 = vadd.xlane.f32.xlu0 %v1153_v28  ;;  %4268 = vmatprep.subr.bf16.mxu1 %v4267_v41 }
 0x918   :  { %4270 = vmatpush3.bf16.msra.mxu1 %v4267_v41 }
 0x919   :  { %4272 = vmatprep.subr.bf16.mxu1 %v4271_v44 }
 0x91c   :  { %4274 = vmatpush3.bf16.msra.mxu1 %v4271_v44 }
 0x9a3   :  { %v1158_v29 = vpop.xlane.xlu1 %1157 }
 0x9a4   :  { %v1160_v30 = vmul.f32 0.03125, %v1158_v29  ;;  %v1155_v31 = vpop.xlane.xlu0 %1154 }
 0x9a5   :  { %v1159_v32 = vmul.f32 0.03125, %v1155_v31 }
 0x9a6   :  { %v1162_v33 = vsub.f32 %v1150_v25, %v1160_v30 }
 0x9a7   :  { %v1161_v34 = vsub.f32 %v1149_v26, %v1159_v32 }
 0x9a8   :  { %v1164_v38 = vmul.f32 %v1162_v33, %v1162_v33 }
 0x9a9   :  { %v1163_v35 = vmul.f32 %v1161_v34, %v1161_v34 }
 0x9aa   :  { %v1168_v39 = vsel %vm88_vm0, %v1164_v38, 0.0 }
 0x9ab   :  { %v1165_v36 = vsel %vm88_vm0, %v1163_v35, 0.0 }
 0x9ac   :  { %1166 = vadd.xlane.f32.xlu0 %v1165_v36 }
 0x9b0   :  { %1169 = vadd.xlane.f32.xlu0 %v1168_v39 }
 0xa39   :  { %v1167_v46 = vpop.xlane.xlu0 %1166 }
 0xa3a   :  { %v1171_v47 = vmul.f32 0.03125, %v1167_v46 }
 0xa3c   :  { %v1173_v48 = vadd.f32 1e-12, %v1171_v47  ;;  %v3711_v47 = vld [vmem:[%s5493_s2 + $0x20] sm:$0xff] }
 0xa3d   :  { %v1170_v49 = vpop.xlane.xlu0 %1169 }
 0xa3e   :  { %4534 = vrsqrt.f32 %v1173_v48  ;;  %v1172_v45 = vmul.f32 0.03125, %v1170_v49  ;;  %v3712_v48 = vld [vmem:[%s5493_s2 + $0x28] sm:$0xff] }
 0xa3f   :  { %v4291_v49 = vpack.c.bf16 %v3712_v48, %v3711_v47 }
 0xa40   :  { %v1174_v50 = vadd.f32 1e-12, %v1172_v45  ;;  %v3713_v45 = vld [vmem:[%s5493_s2 + $0x30] sm:$0xff] }
 0xa41   :  { %4292 = vmatprep.subr.bf16.mxu1 %v4291_v49 }
 0xa42   :  { %4536 = vrsqrt.f32 %v1174_v50  ;;  %v3714_v50 = vld [vmem:[%s5493_s2 + $0x38] sm:$0xff]  ;;  %s5506_s2 = smov 48  }
 0xa48   :  { %v4535_v51 = vpop.eup %4534 }
 0xa49   :  { %v1177_v54 = vmul.f32 %v4535_v51, %v1161_v34  ;;  %v4295_v51 = vpack.c.bf16 %v3714_v50, %v3713_v45 }
 0xa4b   :  { %v1185_v56 = vmul.f32 %v3701_v53, %v1177_v54 }
 0xa4c   :  { %v4537_v59 = vpop.eup %4536 }
 0xa4d   :  { %v1178_v60 = vmul.f32 %v4537_v59, %v1162_v33  ;;  %v1193_v61 = vadd.f32 %v3702_v55, %v1185_v56 }
 0xa4f   :  { %v1186_v62 = vmul.f32 %v3701_v53, %v1178_v60  ;;  %4032 = vmatprep.mubr.msk.f32.mxu1 %vm88_vm0, %v1193_v61 }
 0xa51   :  { %v1194_v63 = vadd.f32 %v3702_v55, %v1186_v62  ;;  %v3709_v62 = vld [vmem:[%s5446_s18] ss:$0 sm:$0xff] }
 0xa53   :  { %4033 = vmatmul.mubr.msk.f32.vlgmr.msra.gmra.mrb[6].mxu1 %vm88_vm0, %v1194_v63 }
 0xa54   :  { %4294 = vmatpush3.bf16.msra.mxu1 %v4291_v49 }
 0xa55   :  { %4296 = vmatprep.subr.bf16.mxu1 %v4295_v51 }
 0xa58   :  { %4298 = vmatpush3.bf16.msra.mxu1 %v4295_v51 }
 0xb26   :  { %v4034_v15 = vpop.f32.mrb[6].mxu1 }
 0xb27   :  { %v1284_v16 = vadd.f32 %v4034_v15, %v3703_v14  ;;  %v1278_v17 = vpop.f32.mrb[7].mxu1 }
 0xb28   :  { %v1279_v18 = vadd.f32 %v3703_v14, %v1278_v17 }
 0xb29   :  { %v1290_v19 = vmul.f32 0.70710677, %v1284_v16  ;;  %v1288_v24 = vmul.f32 0.5, %v1284_v16 }
 0xb2a   :  { %v1289_v20 = vmul.f32 0.70710677, %v1279_v18  ;;  %v1287_v23 = vmul.f32 0.5, %v1279_v18 }
 0xb2b   :  { %4538 = verf.f32 %v1290_v19 }
 0xb2c   :  { %4540 = verf.f32 %v1289_v20 }
 0xb35   :  { %v4539_v21 = vpop.eup %4538 }
 0xb36   :  { %v4541_v2 = vpop.eup %4540  ;;  %v1294_v22 = vadd.f32 1.0, %v4539_v21 }
 0xb37   :  { %v1293_v1 = vadd.f32 1.0, %v4541_v2 }
 0xb38   :  { %v1296_v26 = vmul.f32 %v1294_v22, %v1288_v24 }
 0xb39   :  { %v1295_v25 = vmul.f32 %v1293_v1, %v1287_v23 }
 0xb3b   :  { %4051 = vmatprep.mubr.msk.f32.mxu0 %vm1312_vm5, %v1295_v25 }
 0xb3c   :  { %4052 = vmatmul.mubr.msk.f32.vlgmr.msra.gmra.mrb[14].mxu0 %vm1312_vm5, %v1296_v26 }
 0xc0f   :  { %v4053_v28 = vpop.f32.mrb[14].mxu0 }
 0xc10   :  { %v1391_v29 = vadd.f32 %v4053_v28, %v3706_v27  ;;  %v1385_v30 = vpop.f32.mrb[15].mxu0 }
 0xc11   :  { %v1386_v31 = vadd.f32 %v3706_v27, %v1385_v30 }
 0xc12   :  { %v1395_v32 = vadd.f32 %v1391_v29, %v1194_v63 }
 0xc13   :  { %v1394_v33 = vadd.f32 %v1386_v31, %v1193_v61 }
 0xc14   :  { %v1401_v34 = vsel %vm88_vm0, %v1395_v32, 0.0 }
 0xc15   :  { %1402 = vadd.xlane.f32.xlu1 %v1401_v34  ;;  %v1398_v35 = vsel %vm88_vm0, %v1394_v33, 0.0 }
 0xc16   :  { %1399 = vadd.xlane.f32.xlu0 %v1398_v35 }
 0xca2   :  { %v1403_v36 = vpop.xlane.xlu1 %1402 }
 0xca3   :  { %v1405_v38 = vmul.f32 0.03125, %v1403_v36  ;;  %v1400_v39 = vpop.xlane.xlu0 %1399 }
 0xca4   :  { %v1404_v37 = vmul.f32 0.03125, %v1400_v39 }
 0xca5   :  { %v1407_v40 = vsub.f32 %v1395_v32, %v1405_v38 }
 0xca6   :  { %v1406_v41 = vsub.f32 %v1394_v33, %v1404_v37 }
 0xca7   :  { %v1409_v42 = vmul.f32 %v1407_v40, %v1407_v40 }
 0xca8   :  { %v1408_v43 = vmul.f32 %v1406_v41, %v1406_v41 }
 0xca9   :  { %v1413_v44 = vsel %vm88_vm0, %v1409_v42, 0.0 }
 0xcaa   :  { %1414 = vadd.xlane.f32.xlu1 %v1413_v44  ;;  %v1410_v46 = vsel %vm88_vm0, %v1408_v43, 0.0 }
 0xcab   :  { %1411 = vadd.xlane.f32.xlu0 %v1410_v46 }
 0xd37   :  { %v1415_v53 = vpop.xlane.xlu1 %1414 }
 0xd38   :  { %v1417_v54 = vmul.f32 0.03125, %v1415_v53  ;;  %v1412_v55 = vpop.xlane.xlu0 %1411 }
 0xd39   :  { %v1416_v56 = vmul.f32 0.03125, %v1412_v55 }
 0xd3a   :  { %v1419_v59 = vadd.f32 1e-12, %v1417_v54 }
 0xd3b   :  { %v1418_v60 = vadd.f32 1e-12, %v1416_v56 }
 0xd3c   :  { %4542 = vrsqrt.f32 %v1419_v59 }
 0xd3d   :  { %4544 = vrsqrt.f32 %v1418_v60 }
 0xd46   :  { %v4543_v61 = vpop.eup %4542 }
 0xd47   :  { %v4545_v63 = vpop.eup %4544  ;;  %v1423_v0 = vmul.f32 %v4543_v61, %v1407_v40 }
 0xd48   :  { %v1422_v3 = vmul.f32 %v4545_v63, %v1406_v41 }
 0xd49   :  { %v1431_v5 = vmul.f32 %v3709_v62, %v1423_v0 }
 0xd4a   :  { %v1430_v6 = vmul.f32 %v3709_v62, %v1422_v3 }
 0xd4b   :  { %v5013_v8 = vadd.f32 %v3710_v4, %v1431_v5 }
 0xd4c   :  { %v5011_v7 = vadd.f32 %v3710_v4, %v1430_v6 }
 0xd4e   :  { %4062 = vmatprep.mubr.msk.f32.mxu1 %vm88_vm0, %v5011_v7 }
 0xd4f   :  { %4063 = vmatmul.mubr.msk.f32.vlgmr.msra.gmra.mrb[8].mxu1 %vm88_vm0, %v5013_v8 }
 0xe22   :  { %v4064_v10 = vpop.f32.mrb[8].mxu1 }
 0xe23   :  { %v5022_v11 = vadd.f32 %v4064_v10, %v3716_v9  ;;  %v1525_v12 = vpop.f32.mrb[9].mxu1 }
 0xe24   :  { %v5024_v13 = vadd.f32 %v3716_v9, %v1525_v12 }
 0xe26   :  { %4069 = vmatprep.mubr.msk.f32.mxu1 %vm232_vm1, %v5024_v13  ;;  %v5030_v14 = vpack.i.bf16 %v5022_v11, %v5024_v13 }
 0xe28   :  { %4464 = vrot.lane.b32.xlu1 %v5030_v14, %s4592_s28  ;;  %4459 = vrot.lane.b32.xlu0 %v5030_v14, %s4593_s11  ;;  %s5503_s28 = smov 64  }
 0xe2c   :  { %1732 = vrot.lane.b32.xlu1 %v5024_v13, %s4594_s3 }
 0xe30   :  { %1734 = vrot.lane.b32.xlu1 %v5022_v11, %s4594_s3  ;;  %s5504_s3 = smov 80  }
 0xe9a   :  { %v4465_v15 = vpop.permute.xlu1 %4464  ;;  %v4460_v16 = vpop.permute.xlu0 %4459 }
 0xe9b   :  { %v4467_v17 = vunpack.i.h.bf16 %v4465_v15  ;;  %v4466_v18 = vunpack.i.l.bf16 %v4465_v15  ;;  %v4462_v19 = vunpack.i.h.bf16 %v4460_v16  ;;  %v4461_v20 = vunpack.i.l.bf16 %v4460_v16 }
 0xe9d   :  { %v4299_v21 = vpack.c.bf16 %v4462_v19, %v4461_v20  ;;  %v4309_v2 = vpack.c.bf16 %v4467_v17, %v4466_v18 }
 0xe9e   :  { %v1733_v22 = vpop.permute.xlu1 %1732 }
 0xe9f   :  { %4301 = vmatprep.subr.msk.bf16.mxu1 %vm4806_vm2, %v4299_v21 }
 0xea0   :  { %4304 = vmatpush3.bf16.xpose.msk.msra.mxu1 %vm4806_vm2, %v4299_v21 }
 0xea1   :  { %4311 = vmatprep.subr.msk.bf16.mxu1 %vm4806_vm2, %v4309_v2 }
 0xea2   :  { %v1735_v23 = vpop.permute.xlu1 %1734 }
 0xea7   :  { %4070 = vmatmul.mubr.msk.f32.vlgmr.msra.gmra.mrb[10].mxu1 %vm232_vm1, %v5022_v11 }
 0xea8   :  { %4314 = vmatpush3.bf16.xpose.msk.msra.mxu1 %vm4806_vm2, %v4309_v2  ;;  %4083 = vmatprep.mubr.msk.f32.mxu1 %vm232_vm1, %v1733_v22 }
 0xeaf   :  { %4084 = vmatmul.mubr.msk.f32.vlgmr.msra.gmra.mrb[12].mxu1 %vm232_vm1, %v1735_v23 }
 0xf7a   :  { %v4071_v1 = vpop.f32.mrb[10].mxu1 }
 0xf7b   :  { %v1620_v24 = vadd.f32 %v4071_v1, %v4825_v57  ;;  %v1614_v25 = vpop.f32.mrb[11].mxu1 }
 0xf7c   :  { %v1615_v26 = vadd.f32 %v1614_v25, %v4830_v58 }
 0xf7d   :  { %v1626_v27 = vsel %vm316_vm3, %v1620_v24, -inf }
 0xf7e   :  { %1627 = vmax.xlane.f32.xlu1 %v1626_v27  ;;  %v1623_v28 = vsel %vm316_vm3, %v1615_v26, -inf }
 0xf7f   :  { %1624 = vmax.xlane.f32.xlu0 %v1623_v28  ;;  %v4590_v28 = vld [vmem:[%s5499_s7 + $0x8] sm:$0xff] }
 0xf82   :  { %v4085_v29 = vpop.f32.mrb[12].mxu1 }
 0xf83   :  { %v1814_v30 = vpop.f32.mrb[13].mxu1  ;;  %v1820_v32 = vadd.f32 %v4085_v29, %v4825_v57 }
 0xf84   :  { %v1815_v31 = vadd.f32 %v1814_v30, %v4830_v58 }
 0xf85   :  { %v1826_v34 = vsel %vm316_vm3, %v1820_v32, -inf }
 0xf86   :  { %v1823_v33 = vsel %vm316_vm3, %v1815_v31, -inf }
 0xf87   :  { %1824 = vmax.xlane.f32.xlu0 %v1823_v33 }
 0xf8b   :  { %1827 = vmax.xlane.f32.xlu0 %v1826_v34 }
0x100b   :  { %v1628_v35 = vpop.xlane.xlu1 %1627 }
0x100c   :  { %v1630_v36 = vsub.f32 %v1620_v24, %v1628_v35  ;;  %v1625_v38 = vpop.xlane.xlu0 %1624 }
0x100d   :  { %v1629_v39 = vsub.f32 %v1615_v26, %v1625_v38 }
0x100e   :  { %v1633_v37 = vmul.f32 1.442695, %v1630_v36 }
0x100f   :  { %v1631_v40 = vmul.f32 1.442695, %v1629_v39 }
0x1010   :  { %4546 = vpow2.f32 %v1633_v37 }
0x1011   :  { %4548 = vpow2.f32 %v1631_v40 }
0x1014   :  { %v1825_v41 = vpop.xlane.xlu0 %1824 }
0x1015   :  { %v1829_v42 = vsub.f32 %v1815_v31, %v1825_v41  ;;  %v4591_v31 = vld [vmem:[%s5499_s7] sm:$0xff]  ;;  %s5508_s7 = smov 72  }
0x1017   :  { %v1831_v43 = vmul.f32 1.442695, %v1829_v42 }
0x1018   :  { %v1828_v58 = vpop.xlane.xlu0 %1827 }
0x1019   :  { %4550 = vpow2.f32 %v1831_v43  ;;  %v1830_v57 = vsub.f32 %v1820_v32, %v1828_v58 }
0x101a   :  { %v4547_v44 = vpop.eup %4546 }
0x101b   :  { %v4549_v46 = vpop.eup %4548  ;;  %v1833_v47 = vmul.f32 1.442695, %v1830_v57  ;;  %v1638_v48 = vsel %vm316_vm3, %v4547_v44, 0.0 }
0x101c   :  { %1639 = vadd.xlane.f32.xlu1 %v1638_v48  ;;  %v1635_v49 = vsel %vm316_vm3, %v4549_v46, 0.0 }
0x101d   :  { %4552 = vpow2.f32 %v1833_v47  ;;  %1636 = vadd.xlane.f32.xlu0 %v1635_v49 }
0x1023   :  { %v4551_v45 = vpop.eup %4550 }
0x1024   :  { %v1835_v50 = vsel %vm316_vm3, %v4551_v45, 0.0 }
0x1025   :  { %1836 = vadd.xlane.f32.xlu0 %v1835_v50 }
0x1027   :  { %v4553_v51 = vpop.eup %4552 }
0x1028   :  { %v1838_v53 = vsel %vm316_vm3, %v4553_v51, 0.0 }
0x1029   :  { %1839 = vadd.xlane.f32.xlu1 %v1838_v53 }
0x103a   :  { %4474 = vrot.lane.b32.xlu1 %v5030_v14, %s5502_s27  ;;  %s5511_s27 = smov 16  }
0x103b   :  { %4469 = vrot.lane.b32.xlu0 %v5030_v14, %s5503_s28 }
0x103e   :  { %4479 = vrot.lane.b32.xlu1 %v5030_v14, %s5504_s3 }
0x103f   :  { %1934 = vrot.lane.b32.xlu0 %v5022_v11, %s5505_s30 }
0x1042   :  { %1932 = vrot.lane.b32.xlu1 %v5024_v13, %s5505_s30 }
0x10a9   :  { %v1640_v55 = vpop.xlane.xlu1 %1639 }
0x10aa   :  { %v1637_v54 = vpop.xlane.xlu0 %1636 }
0x10ab   :  { %4554 = vrcp.f32 %v1637_v54 }
0x10ac   :  { %4556 = vrcp.f32 %v1640_v55 }
0x10b2   :  { %v1837_v56 = vpop.xlane.xlu0 %1836 }
0x10b3   :  { %4558 = vrcp.f32 %v1837_v56 }
0x10b5   :  { %v4555_v59 = vpop.eup %4554 }
0x10b6   :  { %v1840_v60 = vpop.xlane.xlu1 %1839  ;;  %v4470_v61 = vpop.permute.xlu0 %4469  ;;  %v1643_v62 = vmul.f32 %v4555_v59, %v4549_v46 }
0x10b7   :  { %4560 = vrcp.f32 %v1840_v60  ;;  %v4472_v63 = vunpack.i.h.bf16 %v4470_v61  ;;  %v4471_v0 = vunpack.i.l.bf16 %v4470_v61  ;;  %v4557_v4 = vpop.eup %4556 }
0x10b8   :  { %4076 = vmatprep.mubr.msk.f32.mxu0 %vm316_vm3, %v1643_v62  ;;  %v1644_v12 = vmul.f32 %v4557_v4, %v4547_v44 }
0x10b9   :  { %v4305_v3 = vpack.c.bf16 %v4472_v63, %v4471_v0 }
0x10ba   :  { %v4475_v5 = vpop.permute.xlu1 %4474  ;;  %v1935_v23 = vpop.permute.xlu0 %1934 }
0x10bb   :  { %v4477_v6 = vunpack.i.h.bf16 %v4475_v5  ;;  %v4476_v9 = vunpack.i.l.bf16 %v4475_v5  ;;  %4306 = vmatprep.subr.bf16.mxu0 %v4305_v3 }
0x10bc   :  { %4308 = vmatpush3.bf16.msra.mxu0 %v4305_v3 }
0x10bd   :  { %v4559_v10 = vpop.eup %4558  ;;  %v4315_v15 = vpack.c.bf16 %v4477_v6, %v4476_v9 }
0x10be   :  { %v4480_v16 = vpop.permute.xlu1 %4479  ;;  %v1843_v17 = vmul.f32 %v4559_v10, %v4551_v45 }
0x10bf   :  { %v4482_v18 = vunpack.i.h.bf16 %v4480_v16  ;;  %v4481_v19 = vunpack.i.l.bf16 %v4480_v16  ;;  %4077 = vmatmul.mubr.msk.f32.vlgmr.msra.gmra.mrb[16].mxu0 %vm316_vm3, %v1644_v12  ;;  %4316 = vmatprep.subr.bf16.mxu0 %v4315_v15 }
0x10c0   :  { %4318 = vmatpush3.bf16.msra.mxu0 %v4315_v15  ;;  %4090 = vmatprep.mubr.msk.f32.mxu0 %vm316_vm3, %v1843_v17 }
0x10c1   :  { %v4561_v20 = vpop.eup %4560  ;;  %v4319_v21 = vpack.c.bf16 %v4482_v18, %v4481_v19 }
0x10c2   :  { %v1844_v2 = vmul.f32 %v4561_v20, %v4553_v51  ;;  %v1933_v22 = vpop.permute.xlu1 %1932 }
0x10c3   :  { %4321 = vmatprep.subr.msk.bf16.mxu0 %vm4806_vm2, %v4319_v21 }
0x10c4   :  { %4091 = vmatmul.mubr.msk.f32.vlgmr.msra.gmra.mrb[18].mxu0 %vm316_vm3, %v1844_v2 }
0x10c5   :  { %4097 = vmatprep.mubr.msk.f32.mxu0 %vm232_vm1, %v1933_v22 }
0x10c9   :  { %4324 = vmatpush3.bf16.xpose.msk.msra.mxu0 %vm4806_vm2, %v4319_v21 }
0x10d0   :  { %4098 = vmatmul.mubr.msk.f32.vlgmr.msra.gmra.mrb[20].mxu0 %vm232_vm1, %v1935_v23 }
0x1192   :  { %v5084_v1 = vpop.f32.mrb[16].mxu0 }
0x1193   :  { %v5086_v24 = vpop.f32.mrb[17].mxu0 }
0x1197   :  { %v5088_v25 = vpop.f32.mrb[18].mxu0 }
0x1198   :  { %v5090_v26 = vpop.f32.mrb[19].mxu0 }
0x11a3   :  { %v4099_v27 = vpop.f32.mrb[20].mxu0 }
0x11a4   :  { %v2020_v29 = vadd.f32 %v4590_v28, %v4099_v27  ;;  %v2014_v30 = vpop.f32.mrb[21].mxu0 }
0x11a5   :  { %v2015_v32 = vadd.f32 %v4591_v31, %v2014_v30  ;;  %v3743_v30 = vld [vmem:[%s5500_s0 + $0x20] sm:$0xff] }
0x11a6   :  { %v2026_v33 = vsel %vm316_vm3, %v2020_v29, -inf }
0x11a7   :  { %2027 = vmax.xlane.f32.xlu0 %v2026_v33  ;;  %v2023_v34 = vsel %vm316_vm3, %v2015_v32, -inf  ;;  %v3746_v33 = vld [vmem:[%s5500_s0 + $0x38] sm:$0xff] }
0x11a8   :  { %2024 = vmax.xlane.f32.xlu1 %v2023_v34 }
0x11b9   :  { %4484 = vrot.lane.b32.xlu1 %v5030_v14, %s5506_s2 }
0x11bd   :  { %2132 = vrot.lane.b32.xlu1 %v5024_v13, %s5507_s10 }
0x11c1   :  { %2134 = vrot.lane.b32.xlu1 %v5022_v11, %s5507_s10 }
0x1234   :  { %v2028_v35 = vpop.xlane.xlu0 %2027 }
0x1235   :  { %v2030_v36 = vsub.f32 %v2020_v29, %v2028_v35  ;;  %v2025_v38 = vpop.xlane.xlu1 %2024 }
0x1236   :  { %v2029_v39 = vsub.f32 %v2015_v32, %v2025_v38 }
0x1237   :  { %v2033_v37 = vmul.f32 1.442695, %v2030_v36 }
0x1238   :  { %v2031_v40 = vmul.f32 1.442695, %v2029_v39 }
0x1239   :  { %4562 = vpow2.f32 %v2033_v37  ;;  %v4485_v41 = vpop.permute.xlu1 %4484 }
0x123a   :  { %v4487_v42 = vunpack.i.h.bf16 %v4485_v41  ;;  %v4486_v43 = vunpack.i.l.bf16 %v4485_v41  ;;  %4564 = vpow2.f32 %v2031_v40 }
0x123c   :  { %v4325_v58 = vpack.c.bf16 %v4487_v42, %v4486_v43 }
0x123d   :  { %v2133_v56 = vpop.permute.xlu1 %2132 }
0x123e   :  { %4326 = vmatprep.subr.bf16.mxu1 %v4325_v58 }
0x123f   :  { %4328 = vmatpush3.bf16.msra.mxu1 %v4325_v58 }
0x1241   :  { %v2135_v59 = vpop.permute.xlu1 %2134 }
0x1243   :  { %v4563_v57 = vpop.eup %4562 }
0x1244   :  { %v2038_v13 = vsel %vm316_vm3, %v4563_v57, 0.0  ;;  %v4565_v44 = vpop.eup %4564 }
0x1245   :  { %2039 = vadd.xlane.f32.xlu0 %v2038_v13  ;;  %v2035_v11 = vsel %vm316_vm3, %v4565_v44, 0.0 }
0x1249   :  { %2036 = vadd.xlane.f32.xlu0 %v2035_v11 }
0x125f   :  { %4489 = vrot.lane.b32.xlu0 %v5030_v14, %s5508_s7  ;;  %s5512_s7 = smov 24  }
0x12d2   :  { %v2040_v46 = vpop.xlane.xlu0 %2039 }
0x12d3   :  { %4566 = vrcp.f32 %v2040_v46 }
0x12d6   :  { %v2037_v47 = vpop.xlane.xlu0 %2036 }
0x12d7   :  { %4568 = vrcp.f32 %v2037_v47 }
0x12da   :  { %v4490_v48 = vpop.permute.xlu0 %4489 }
0x12db   :  { %v4492_v49 = vunpack.i.h.bf16 %v4490_v48  ;;  %v4491_v45 = vunpack.i.l.bf16 %v4490_v48 }
0x12dd   :  { %v4329_v50 = vpack.c.bf16 %v4492_v49, %v4491_v45  ;;  %v4567_v51 = vpop.eup %4566 }
0x12de   :  { %v2044_v55 = vmul.f32 %v4567_v51, %v4563_v57 }
0x12df   :  { %4331 = vmatprep.subr.msk.bf16.mxu1 %vm4806_vm2, %v4329_v50 }
0x12e1   :  { %v4569_v53 = vpop.eup %4568 }
0x12e2   :  { %v2043_v54 = vmul.f32 %v4569_v53, %v4565_v44 }
0x12e4   :  { %4104 = vmatprep.mubr.msk.f32.mxu1 %vm316_vm3, %v2043_v54 }
0x12e5   :  { %4105 = vmatmul.mubr.msk.f32.vlgmr.msra.gmra.mrb[14].mxu1 %vm316_vm3, %v2044_v55 }
0x12e6   :  { %4334 = vmatpush3.bf16.xpose.msk.msra.mxu1 %vm4806_vm2, %v4329_v50  ;;  %4111 = vmatprep.mubr.msk.f32.mxu1 %vm232_vm1, %v2133_v56 }
0x12ed   :  { %4112 = vmatmul.mubr.msk.f32.vlgmr.msra.gmra.mrb[16].mxu1 %vm232_vm1, %v2135_v59 }
0x13b8   :  { %v4106_v60 = vpop.f32.mrb[14].mxu1 }
0x13b9   :  { %v2123_v61 = vpop.f32.mrb[15].mxu1 }
0x13c0   :  { %v4113_v62 = vpop.f32.mrb[16].mxu1 }
0x13c1   :  { %v2220_v63 = vadd.f32 %v4590_v28, %v4113_v62  ;;  %v2214_v0 = vpop.f32.mrb[17].mxu1 }
0x13c2   :  { %v2215_v3 = vadd.f32 %v4591_v31, %v2214_v0  ;;  %v3745_v31 = vld [vmem:[%s5500_s0 + $0x30] sm:$0xff]  ;;  %v3756_v0 = vld [vmem:[%s5440_s14 + $0x28] sm:$0xff] }
0x13c3   :  { %v2226_v4 = vsel %vm316_vm3, %v2220_v63, -inf  ;;  %v4343_v34 = vpack.c.bf16 %v3746_v33, %v3745_v31  ;;  %v3768_v33 = vld [vmem:[%s5443_s16 + $0x68] sm:$0xff] }
0x13c4   :  { %2227 = vmax.xlane.f32.xlu0 %v2226_v4  ;;  %v2223_v5 = vsel %vm316_vm3, %v2215_v3, -inf  ;;  %v3757_v4 = vld [vmem:[%s5440_s14 + $0x30] sm:$0xff] }
0x13c5   :  { %2224 = vmax.xlane.f32.xlu1 %v2223_v5  ;;  %v3758_v5 = vld [vmem:[%s5440_s14 + $0x38] sm:$0xff] }
0x13d6   :  { %4494 = vrot.lane.b32.xlu1 %v5030_v14, %s5509_s4 }
0x13da   :  { %2336 = vrot.lane.b32.xlu1 %v5088_v25, %s5510_s9 }
0x13de   :  { %2342 = vrot.lane.b32.xlu1 %v2123_v61, %s5511_s27 }
0x13e2   :  { %2344 = vrot.lane.b32.xlu1 %v4106_v60, %s5511_s27 }
0x1451   :  { %v2228_v52 = vpop.xlane.xlu0 %2227 }
0x1452   :  { %v2230_v6 = vsub.f32 %v2220_v63, %v2228_v52  ;;  %v2225_v9 = vpop.xlane.xlu1 %2224  ;;  %v4351_v52 = vpack.c.bf16 %v3758_v5, %v3757_v4  ;;  %v2754_v5 = vld [vmem:[%s5448_s5] sm:$0xff] }
0x1453   :  { %v2229_v10 = vsub.f32 %v2215_v3, %v2225_v9 }
0x1454   :  { %v2233_v12 = vmul.f32 1.442695, %v2230_v6 }
0x1455   :  { %v2231_v15 = vmul.f32 1.442695, %v2229_v10 }
0x1456   :  { %v4495_v16 = vpop.permute.xlu1 %4494 }
0x1457   :  { %4570 = vpow2.f32 %v2231_v15  ;;  %v4497_v17 = vunpack.i.h.bf16 %v4495_v16  ;;  %v4496_v18 = vunpack.i.l.bf16 %v4495_v16 }
0x1458   :  { %4572 = vpow2.f32 %v2233_v12 }
0x1459   :  { %v4335_v19 = vpack.c.bf16 %v4497_v17, %v4496_v18  ;;  %v3753_v18 = vld [vmem:[%s5441_s12 + $0x1] ss:$0 sm:$0xff] }
0x145a   :  { %v2337_v38 = vpop.permute.xlu1 %2336 }
0x145b   :  { %4336 = vmatprep.subr.bf16.mxu0 %v4335_v19  ;;  %v2357_v43 = vsel %vm232_vm1, %v5084_v1, %v2337_v38 }
0x145c   :  { %4338 = vmatpush3.bf16.msra.mxu0 %v4335_v19 }
0x145e   :  { %v2343_v39 = vpop.permute.xlu1 %2342 }
0x1461   :  { %v4571_v14 = vpop.eup %4570 }
0x1462   :  { %v2235_v20 = vsel %vm316_vm3, %v4571_v14, 0.0  ;;  %v4573_v21 = vpop.eup %4572  ;;  %v2345_v40 = vpop.permute.xlu1 %2344 }
0x1463   :  { %2236 = vadd.xlane.f32.xlu0 %v2235_v20  ;;  %v2238_v2 = vsel %vm316_vm3, %v4573_v21, 0.0  ;;  %v2359_v13 = vsel %vm316_vm3, %v2357_v43, %v2345_v40 }
0x1467   :  { %2239 = vadd.xlane.f32.xlu0 %v2238_v2 }
0x147d   :  { %2334 = vrot.lane.b32.xlu0 %v5090_v26, %s5510_s9  ;;  %v3744_v26 = vld [vmem:[%s5500_s0 + $0x28] sm:$0xff] }
0x147e   :  { %v4339_v32 = vpack.c.bf16 %v3744_v26, %v3743_v30  ;;  %v3765_v30 = vld [vmem:[%s5443_s16 + $0x50] sm:$0xff]  ;;  %v3766_v26 = vld [vmem:[%s5443_s16 + $0x58] sm:$0xff] }
0x147f   :  { %v4359_v31 = vpack.c.bf16 %v3766_v26, %v3765_v30  ;;  %v2839_v30 = vld [vmem:[%s5449_s20 + $0x10] sm:$0xff]  ;;  %v2840_v26 = vld [vmem:[%s5449_s20 + $0x18] sm:$0xff] }
0x1480   :  { %4340 = vmatprep.subr.bf16.mxu0 %v4339_v32 }
0x14f0   :  { %v2237_v22 = vpop.xlane.xlu0 %2236 }
0x14f1   :  { %4574 = vrcp.f32 %v2237_v22 }
0x14f4   :  { %v2240_v23 = vpop.xlane.xlu0 %2239 }
0x14f5   :  { %4576 = vrcp.f32 %v2240_v23 }
0x14f8   :  { %v2335_v37 = vpop.permute.xlu0 %2334 }
0x14f9   :  { %v2356_v41 = vsel %vm232_vm1, %v5086_v24, %v2335_v37  ;;  %v3748_v24 = vld [vmem:[%s5501_s1 + $0x1] ss:$0 sm:$0xff]  ;;  %s4608_s1 = smov 1  }
0x14fa   :  { %v2358_v58 = vsel %vm316_vm3, %v2356_v41, %v2343_v39  ;;  %v3760_v39 = vld [vmem:[%s5444_s15 + $0x1] ss:$0 sm:$0xff] }
0x14fb   :  { %v4575_v25 = vpop.eup %4574 }
0x14fc   :  { %v2243_v27 = vmul.f32 %v4575_v25, %v4571_v14  ;;  %v3754_v14 = vld [vmem:[%s5442_s13 + $0x1] ss:$0 sm:$0xff] }
0x14fe   :  { %4118 = vmatprep.mubr.msk.f32.mxu0 %vm316_vm3, %v2243_v27  ;;  %v3763_v27 = vld [vmem:[%s5443_s16 + $0x40] sm:$0xff] }
0x14ff   :  { %v4577_v28 = vpop.eup %4576 }
0x1500   :  { %v2244_v29 = vmul.f32 %v4577_v28, %v4573_v21  ;;  %v3764_v28 = vld [vmem:[%s5443_s16 + $0x48] sm:$0xff] }
0x1502   :  { %4119 = vmatmul.mubr.msk.f32.vlgmr.msra.gmra.mrb[22].mxu0 %vm316_vm3, %v2244_v29  ;;  %v4355_v29 = vpack.c.bf16 %v3764_v28, %v3763_v27 }
0x1503   :  { %4342 = vmatpush3.bf16.msra.mxu0 %v4339_v32  ;;  %v3767_v32 = vld [vmem:[%s5443_s16 + $0x60] sm:$0xff] }
0x1504   :  { %4344 = vmatprep.subr.bf16.mxu0 %v4343_v34 }
0x1507   :  { %4346 = vmatpush3.bf16.msra.mxu0 %v4343_v34  ;;  %v4363_v34 = vpack.c.bf16 %v3768_v33, %v3767_v32  ;;  %v4379_v32 = vpack.c.bf16 %v2840_v26, %v2839_v30 }
0x1508   :  { %4356 = vmatprep.subr.bf16.mxu0 %v4355_v29 }
0x15d5   :  { %v4120_v35 = vpop.f32.mrb[22].mxu0 }
0x15d6   :  { %2352 = vrot.lane.b32.xlu1 %v4120_v35, %s5512_s7  ;;  %v2323_v36 = vpop.f32.mrb[23].mxu0  ;;  %v3769_v35 = vld [vmem:[%s5443_s16 + $0x70] sm:$0xff] }
0x15d7   :  { %2350 = vrot.lane.b32.xlu0 %v2323_v36, %s5512_s7  ;;  %v3770_v36 = vld [vmem:[%s5443_s16 + $0x78] sm:$0xff]  ;;  %s5513_s7 = sld [smem:[#allocation11_spill]] }
0x15d8   :  { %v4367_v38 = vpack.c.bf16 %v3770_v36, %v3769_v35 }
0x15dd   :  { %v2931_v33 = vld [vmem:[%s5513_s7] sm:$0xff] }
0x1648   :  { %v2353_v42 = vpop.permute.xlu1 %2352 }
0x1649   :  { %v2351_v57 = vpop.permute.xlu0 %2350  ;;  %v2361_v11 = vsel %vm1054_vm4, %v2359_v13, %v2353_v42 }
0x164a   :  { %v2360_v44 = vsel %vm1054_vm4, %v2358_v58, %v2351_v57 }
0x164b   :  { %4129 = vmatprep.mubr.msk.f32.mxu0 %vm88_vm0, %v2360_v44 }
0x164c   :  { %4130 = vmatmul.mubr.msk.f32.vlgmr.msra.gmra.mrb[24].mxu0 %vm88_vm0, %v2361_v11 }
0x164d   :  { %4358 = vmatpush3.bf16.msra.mxu0 %v4355_v29 }
0x164e   :  { %4360 = vmatprep.subr.bf16.mxu0 %v4359_v31 }
0x1651   :  { %4362 = vmatpush3.bf16.msra.mxu0 %v4359_v31  ;;  %v2755_v31 = vld [vmem:[%s5448_s5 + $0x8] sm:$0x3] }
0x1652   :  { %4364 = vmatprep.subr.bf16.mxu0 %v4363_v34 }
0x1655   :  { %4366 = vmatpush3.bf16.msra.mxu0 %v4363_v34  ;;  %v2932_v34 = vld [vmem:[%s5513_s7 + $0x8] sm:$0xff] }
0x1656   :  { %4368 = vmatprep.subr.bf16.mxu0 %v4367_v38  ;;  %v4383_v35 = vpack.c.bf16 %v2932_v34, %v2931_v33 }
0x1659   :  { %4370 = vmatpush3.bf16.msra.mxu0 %v4367_v38 }
0x171f   :  { %v4131_v46 = vpop.f32.mrb[24].mxu0 }
0x1720   :  { %v2453_v47 = vadd.f32 %v4131_v46, %v3748_v24  ;;  %v2447_v1 = vpop.f32.mrb[25].mxu0 }
0x1721   :  { %v2448_v48 = vadd.f32 %v3748_v24, %v2447_v1 }
0x1722   :  { %v2457_v49 = vadd.f32 %v2453_v47, %v5013_v8 }
0x1723   :  { %v2456_v45 = vadd.f32 %v2448_v48, %v5011_v7  ;;  %v3755_v7 = vld [vmem:[%s5440_s14 + $0x20] sm:$0xff] }
0x1724   :  { %v2465_v50 = vsel %vm88_vm0, %v2457_v49, 0.0  ;;  %v4347_v3 = vpack.c.bf16 %v3756_v0, %v3755_v7  ;;  %v3772_v48 = vld [vmem:[%s5445_s17 + $0x1] ss:$0 sm:$0xff] }
0x1725   :  { %2466 = vadd.xlane.f32.xlu1 %v2465_v50  ;;  %v2462_v51 = vsel %vm88_vm0, %v2456_v45, 0.0 }
0x1726   :  { %2463 = vadd.xlane.f32.xlu0 %v2462_v51  ;;  %4348 = vmatprep.subr.bf16.mxu1 %v4347_v3 }
0x1727   :  { %4350 = vmatpush3.bf16.msra.mxu1 %v4347_v3 }
0x1728   :  { %4352 = vmatprep.subr.bf16.mxu1 %v4351_v52 }
0x172b   :  { %4354 = vmatpush3.bf16.msra.mxu1 %v4351_v52 }
0x17b2   :  { %v2467_v53 = vpop.xlane.xlu1 %2466 }
0x17b3   :  { %v2469_v54 = vmul.f32 0.03125, %v2467_v53  ;;  %v2464_v55 = vpop.xlane.xlu0 %2463 }
0x17b4   :  { %v2468_v56 = vmul.f32 0.03125, %v2464_v55 }
0x17b5   :  { %v2471_v59 = vsub.f32 %v2457_v49, %v2469_v54 }
0x17b6   :  { %v2470_v60 = vsub.f32 %v2456_v45, %v2468_v56 }
0x17b7   :  { %v2473_v63 = vmul.f32 %v2471_v59, %v2471_v59 }
0x17b8   :  { %v2472_v61 = vmul.f32 %v2470_v60, %v2470_v60 }
0x17b9   :  { %v2477_v8 = vsel %vm88_vm0, %v2473_v63, 0.0 }
0x17ba   :  { %v2474_v62 = vsel %vm88_vm0, %v2472_v61, 0.0 }
0x17bb   :  { %2475 = vadd.xlane.f32.xlu0 %v2474_v62 }
0x17bf   :  { %2478 = vadd.xlane.f32.xlu0 %v2477_v8 }
0x1848   :  { %v2476_v6 = vpop.xlane.xlu0 %2475 }
0x1849   :  { %v2480_v9 = vmul.f32 0.03125, %v2476_v6 }
0x184b   :  { %v2482_v10 = vadd.f32 1e-12, %v2480_v9 }
0x184c   :  { %v2479_v12 = vpop.xlane.xlu0 %2478 }
0x184d   :  { %4578 = vrsqrt.f32 %v2482_v10  ;;  %v2481_v15 = vmul.f32 0.03125, %v2479_v12 }
0x184f   :  { %v2483_v16 = vadd.f32 1e-12, %v2481_v15 }
0x1851   :  { %4580 = vrsqrt.f32 %v2483_v16 }
0x1857   :  { %v4579_v17 = vpop.eup %4578 }
0x1858   :  { %v2486_v19 = vmul.f32 %v4579_v17, %v2470_v60  ;;  %v3777_v17 = vld [vmem:[%s5446_s18 + $0x1] ss:$0 sm:$0xff] }
0x185a   :  { %v2494_v20 = vmul.f32 %v3753_v18, %v2486_v19 }
0x185b   :  { %v4581_v21 = vpop.eup %4580 }
0x185c   :  { %v2487_v2 = vmul.f32 %v4581_v21, %v2471_v59  ;;  %v2502_v22 = vadd.f32 %v3754_v14, %v2494_v20 }
0x185e   :  { %v2495_v23 = vmul.f32 %v3753_v18, %v2487_v2  ;;  %4140 = vmatprep.mubr.msk.f32.mxu1 %vm88_vm0, %v2502_v22 }
0x1860   :  { %v2503_v25 = vadd.f32 %v3754_v14, %v2495_v23  ;;  %v3778_v14 = vld [vmem:[%s5447_s19 + $0x1] ss:$0 sm:$0xff] }
0x1861   :  { %v2837_v23 = vld [vmem:[%s5449_s20] sm:$0xff] }
0x1862   :  { %4141 = vmatmul.mubr.msk.f32.vlgmr.msra.gmra.mrb[18].mxu1 %vm88_vm0, %v2503_v25 }
0x1863   :  { %4166 = vmatprep.mubr.msk.f32.mxu1 %vm316_vm3, %v2754_v5  ;;  %v4609_v5 = vmov 0  }
0x1935   :  { %v4142_v37 = vpop.f32.mrb[18].mxu1 }
0x1936   :  { %v2595_v40 = vadd.f32 %v4142_v37, %v3760_v39  ;;  %v2589_v41 = vpop.f32.mrb[19].mxu1  ;;  %v2934_v37 = vld [vmem:[%s5513_s7 + $0x18] sm:$0xff] }
0x1937   :  { %v2590_v42 = vadd.f32 %v3760_v39, %v2589_v41  ;;  %v2933_v39 = vld [vmem:[%s5513_s7 + $0x10] sm:$0xff]  ;;  %v4606_v41 = vmov 0.0  }
0x1938   :  { %v2601_v43 = vmul.f32 0.70710677, %v2595_v40  ;;  %v2599_v46 = vmul.f32 0.5, %v2595_v40  ;;  %v4387_v40 = vpack.c.bf16 %v2934_v37, %v2933_v39  ;;  %4191 = vmatprep.subr.mxu0 %v4606_v41 }
0x1939   :  { %v2600_v58 = vmul.f32 0.70710677, %v2590_v42  ;;  %v2598_v11 = vmul.f32 0.5, %v2590_v42  ;;  %v3781_v42 = vld [vmem:[%s5451_s21] ss:$0 sm:$0xff] }
0x193a   :  { %4582 = verf.f32 %v2601_v43 }
0x193b   :  { %4584 = verf.f32 %v2600_v58 }
0x1944   :  { %v4583_v57 = vpop.eup %4582 }
0x1945   :  { %v4585_v13 = vpop.eup %4584  ;;  %v2605_v44 = vadd.f32 1.0, %v4583_v57 }
0x1946   :  { %v2604_v24 = vadd.f32 1.0, %v4585_v13 }
0x1947   :  { %v2607_v1 = vmul.f32 %v2605_v44, %v2599_v46 }
0x1948   :  { %v2606_v47 = vmul.f32 %v2604_v24, %v2598_v11  ;;  %v3018_v24 = vld [vmem:[%s5452_s22] sm:$0x1] }
0x194a   :  { %4159 = vmatprep.mubr.msk.f32.mxu0 %vm1312_vm5, %v2606_v47 }
0x194b   :  { %4160 = vmatmul.mubr.msk.f32.vlgmr.msra.gmra.mrb[26].mxu0 %vm1312_vm5, %v2607_v1 }
0x194c   :  { %4193 = vmatprep.mubr.msk.f32.mxu0 %vm4607_vm8, %v4606_v41 }
0x1a1e   :  { %v4161_v49 = vpop.f32.mrb[26].mxu0 }
0x1a1f   :  { %v2703_v45 = vadd.f32 %v4161_v49, %v3772_v48  ;;  %v2697_v50 = vpop.f32.mrb[27].mxu0 }
0x1a20   :  { %v2698_v51 = vadd.f32 %v3772_v48, %v2697_v50  ;;  %v3788_v50 = vld [vmem:[%s5453_s6] ss:$0 sm:$0xff] }
0x1a21   :  { %v2707_v53 = vadd.f32 %v2703_v45, %v2503_v25  ;;  %v2838_v25 = vld [vmem:[%s5449_s20 + $0x8] sm:$0xff] }
0x1a22   :  { %v2706_v54 = vadd.f32 %v2698_v51, %v2502_v22  ;;  %v4375_v29 = vpack.c.bf16 %v2838_v25, %v2837_v23  ;;  %v3795_v51 = vld [vmem:[%s5453_s6 + $0x1] ss:$0 sm:$0xff]  ;;  %s4610_s6 = smov 32  }
0x1a23   :  { %v2715_v55 = vsel %vm88_vm0, %v2707_v53, 0.0 }
0x1a24   :  { %2716 = vadd.xlane.f32.xlu1 %v2715_v55  ;;  %v2712_v56 = vsel %vm88_vm0, %v2706_v54, 0.0 }
0x1a25   :  { %2713 = vadd.xlane.f32.xlu0 %v2712_v56 }
0x1ab1   :  { %v2717_v59 = vpop.xlane.xlu1 %2716 }
0x1ab2   :  { %v2719_v60 = vmul.f32 0.03125, %v2717_v59  ;;  %v2714_v61 = vpop.xlane.xlu0 %2713 }
0x1ab3   :  { %v2718_v62 = vmul.f32 0.03125, %v2714_v61 }
0x1ab4   :  { %v2721_v63 = vsub.f32 %v2707_v53, %v2719_v60 }
0x1ab5   :  { %v2720_v8 = vsub.f32 %v2706_v54, %v2718_v62 }
0x1ab6   :  { %v2723_v7 = vmul.f32 %v2721_v63, %v2721_v63 }
0x1ab7   :  { %v2722_v0 = vmul.f32 %v2720_v8, %v2720_v8 }
0x1ab8   :  { %v2727_v3 = vsel %vm88_vm0, %v2723_v7, 0.0 }
0x1ab9   :  { %2728 = vadd.xlane.f32.xlu1 %v2727_v3  ;;  %v2724_v4 = vsel %vm88_vm0, %v2722_v0, 0.0 }
0x1aba   :  { %2725 = vadd.xlane.f32.xlu0 %v2724_v4 }
0x1b46   :  { %v2729_v52 = vpop.xlane.xlu1 %2728 }
0x1b47   :  { %v2731_v6 = vmul.f32 0.03125, %v2729_v52  ;;  %v2726_v9 = vpop.xlane.xlu0 %2725 }
0x1b48   :  { %v2730_v10 = vmul.f32 0.03125, %v2726_v9 }
0x1b49   :  { %v2733_v12 = vadd.f32 1e-12, %v2731_v6 }
0x1b4a   :  { %v2732_v15 = vadd.f32 1e-12, %v2730_v10 }
0x1b4b   :  { %4586 = vrsqrt.f32 %v2733_v12 }
0x1b4c   :  { %4588 = vrsqrt.f32 %v2732_v15 }
0x1b55   :  { %v4587_v16 = vpop.eup %4586 }
0x1b56   :  { %v4589_v18 = vpop.eup %4588  ;;  %v2737_v19 = vmul.f32 %v4587_v16, %v2721_v63  ;;  %v3016_v63 = vlaneseq }
0x1b57   :  { %v2736_v20 = vmul.f32 %v4589_v18, %v2720_v8 }
0x1b58   :  { %v2745_v21 = vmul.f32 %v3777_v17, %v2737_v19  ;;  %v3115_v0 = vshrl.u32 %v3016_v63, 7 }
0x1b59   :  { %v2744_v2 = vmul.f32 %v3777_v17, %v2736_v20 }
0x1b5a   :  { %v2753_v22 = vadd.f32 %v3778_v14, %v2745_v21  ;;  %v3116_v4 = vsub.s32 0, %v3115_v0  ;;  %v3017_v21 = vand.u32 127, %v3016_v63  ;;  %v3439_v63 = vld [vmem:[%s5454_s24 + $0x20] sm:$0xff] }
0x1b5b   :  { %v2752_v27 = vadd.f32 %v3778_v14, %v2744_v2 }
0x1b5d   :  { %v4371_v28 = vpack.c.bf16 %v2753_v22, %v2752_v27 }
0x1b5f   :  { %4372 = vmatprep.subr.bf16.mxu1 %v4371_v28 }
0x1b60   :  { %4374 = vmatpush3.bf16.msra.mxu1 %v4371_v28 }
0x1b61   :  { %4376 = vmatprep.subr.bf16.mxu1 %v4375_v29 }
0x1b63   :  { %4167 = vmatmul.mubr.msk.f32.vlgmr.msra.gmra.mrb[20].mxu1 %vm316_vm3, %v2755_v31 }
0x1b64   :  { %4378 = vmatpush3.bf16.msra.mxu1 %v4375_v29 }
0x1b65   :  { %4380 = vmatprep.subr.bf16.mxu1 %v4379_v32 }
0x1b68   :  { %4382 = vmatpush3.bf16.msra.mxu1 %v4379_v32 }
0x1b69   :  { %4384 = vmatprep.subr.bf16.mxu1 %v4383_v35 }
0x1c36   :  { %v4168_v36 = vpop.f32.mrb[20].mxu1 }
0x1c37   :  { %v2828_v38 = vpop.f32.mrb[21].mxu1 }
0x1c38   :  { %4177 = vmatprep.mubr.msk.f32.mxu1 %vm88_vm0, %v2828_v38 }
0x1c39   :  { %4178 = vmatmul.mubr.msk.f32.vlgmr.msra.gmra.mrb[22].mxu1 %vm88_vm0, %v4168_v36 }
0x1c3a   :  { %4386 = vmatpush3.bf16.msra.mxu1 %v4383_v35 }
0x1c3b   :  { %4388 = vmatprep.subr.bf16.mxu1 %v4387_v40 }
0x1c3e   :  { %4390 = vmatpush3.bf16.msra.mxu1 %v4387_v40 }
0x1c3f   :  { %4201 = vmatprep.subr.mxu1 %v4606_v41 }
0x1d0c   :  { %v4179_v43 = vpop.f32.mrb[22].mxu1 }
0x1d0d   :  { %v2926_v58 = vadd.f32 %v4179_v43, %v3781_v42  ;;  %v2920_v57 = vpop.f32.mrb[23].mxu1 }
0x1d0e   :  { %v2921_v13 = vadd.f32 %v3781_v42, %v2920_v57 }
0x1d0f   :  { %v5266_v44 = vmax.f32 %v2926_v58, 0.0 }
0x1d10   :  { %v5268_v11 = vmax.f32 %v2921_v13, 0.0 }
0x1d11   :  { %v3225_v46 = vrot.slane %v5266_v44, 4 }
0x1d12   :  { %4188 = vmatprep.mubr.msk.f32.mxu1 %vm88_vm0, %v5268_v11  ;;  %v3019_v47 = vrot.slane %v5268_v11, 7  ;;  %v3224_v1 = vrot.slane %v5268_v11, 4 }
0x1d13   :  { %4189 = vmatmul.mubr.msk.f32.vlgmr.msra.gmra.mrb[24].mxu1 %vm88_vm0, %v5266_v44 }
0x1d14   :  { %v5280_v48 = vsel %vm3021_vm6, %v3018_v24, %v3019_v47  ;;  %v3226_v49 = vsel %vm3223_vm7, %v3224_v1, %v3225_v46  ;;  %4203 = vmatprep.mubr.msk.f32.mxu1 %vm4607_vm8, %v4606_v41 }
0x1d15   :  { %3024 = vrot.lane.b32.xlu0 %v5280_v48, %s4593_s11  ;;  %v5284_v45 = vsel %vm3021_vm6, %v3018_v24, %v3226_v49  ;;  %vm3150_vm6 = vcmask 1045504  }
0x1d16   :  { %3235 = vrot.lane.b32.xlu1 %v5284_v45, %s4593_s11 }
0x1d1a   :  { %3107 = vrot.lane.b32.xlu1 %v3788_v50, %s4608_s1 }
0x1d1e   :  { %3318 = vrot.lane.b32.xlu1 %v3795_v51, %s4608_s1  ;;  %v3436_v51 = vld [vmem:[%s5454_s24 + $0x8] sm:$0xff] }
0x1d87   :  { %v3025_v53 = vpop.permute.xlu0 %3024 }
0x1d88   :  { %v3236_v54 = vpop.permute.xlu1 %3235  ;;  %4192 = vmatpush3.xpose.msk.msra.mxu0 %vm88_vm0, %v3025_v53  ;;  %v3438_v53 = vld [vmem:[%s5454_s24 + $0x18] sm:$0xff] }
0x1d89   :  { %4202 = vmatpush3.xpose.msk.msra.mxu1 %vm88_vm0, %v3236_v54  ;;  %4196 = vmatprep.subr.mxu0 %v4606_v41  ;;  %v4391_v54 = vpack.c.bf16 %v3438_v53, %v3436_v51 }
0x1d8b   :  { %4392 = vmatprep.subr.bf16.mxu1 %v4391_v54 }
0x1d8c   :  { %v3108_v62 = vpop.permute.xlu1 %3107 }
0x1d8d   :  { %v3111_v8 = vsel %vm3110_vm10, 1.0, %v3108_v62 }
0x1d8e   :  { %vm3112_vm11 = vcmp.gt.f32.partialorder %v3111_v8, 0.5  ;;  %v3441_v8 = vld [vmem:[%s5454_s24 + $0x30] sm:$0xff] }
0x1d8f   :  { %v3113_v52 = vsel %vm3112_vm11, 1, %v4609_v5  ;;  %vm3146_vm11 = vcmask 48128  }
0x1d90   :  { %v3319_v7 = vpop.permute.xlu1 %3318  ;;  %v3117_v6 = vrot.slane %v3113_v52, %v3116_v4 }
0x1d91   :  { %v3321_v3 = vsel %vm3110_vm10, 1.0, %v3319_v7  ;;  %v4397_v7 = vpack.c.bf16 %v3441_v8, %v3439_v63 }
0x1d92   :  { %vm3322_vm12 = vcmp.gt.f32.partialorder %v3321_v3, 0.5  ;;  %vm3118_vm13 = vcmp.eq.s32.totalorder %v3117_v6, 1 }
0x1d93   :  { %v3323_v9 = vsel %vm3322_vm12, 1, %v4609_v5 }
0x1d94   :  { %v3327_v10 = vrot.slane %v3323_v9, %v3116_v4 }
0x1d96   :  { %vm3328_vm15 = vcmp.eq.s32.totalorder %v3327_v10, 1 }
0x1de6   :  { %v4190_v55 = vpop.f32.mrb[24].mxu1 }
0x1de7   :  { %v3232_v56 = vrot.slane %v4190_v55, 5  ;;  %v3007_v59 = vpop.f32.mrb[25].mxu1  ;;  %v3435_v55 = vld [vmem:[%s5454_s24] sm:$0xff] }
0x1de8   :  { %v3231_v60 = vrot.slane %v3007_v59, 5  ;;  %4194 = vmatmul.mubr.msk.f32.vlgmr.msra.gmra.mrb[28].mxu0 %vm88_vm0, %v3007_v59 }
0x1de9   :  { %4198 = vmatprep.mubr.msk.f32.mxu0 %vm4607_vm8, %v4606_v41 }
0x1dea   :  { %v3233_v61 = vsel %vm3230_vm9, %v3231_v60, %v3232_v56  ;;  %v3437_v56 = vld [vmem:[%s5454_s24 + $0x10] sm:$0xff]  ;;  %v3440_v60 = vld [vmem:[%s5454_s24 + $0x28] sm:$0xff] }
0x1deb   :  { %4204 = vmatmul.mubr.msk.f32.vlgmr.msra.gmra.mrb[26].mxu1 %vm88_vm0, %v3233_v61  ;;  %v4393_v59 = vpack.c.bf16 %v3437_v56, %v3435_v55  ;;  %v3442_v61 = vld [vmem:[%s5454_s24 + $0x38] sm:$0xff] }
0x1dec   :  { %3512 = vmatprep.mubr.f32.mxu1 %v4606_v41  ;;  %v4395_v62 = vpack.c.bf16 %v3442_v61, %v3440_v60 }
0x1ded   :  { %4394 = vmatpush1.bf16.msra.mxu1 %v4393_v59 }
0x1dee   :  { %4396 = vmatprep.subr.bf16.mxu1 %v4395_v62 }
0x1df1   :  { %4398 = vmatpush1.bf16.msra.mxu1 %v4397_v7 }
0x1ebb   :  { %v5309_v12 = vpop.f32.mrb[28].mxu0 }
0x1ebc   :  { %v4195_v15 = vpop.f32.mrb[29].mxu0  ;;  %v3119_v16 = vsel %vm3118_vm13, %v5309_v12, -1e+30  ;;  %vm3529_vm13 = vcmask 258048  }
0x1ebd   :  { %v3121_v17 = vsel %vm3120_vm14, %v3119_v16, -inf }
0x1ebe   :  { %v5313_v18 = vpop.f32.mrb[26].mxu1  ;;  %3122 = vmax.xlane.f32.xlu0 %v3121_v17 }
0x1ebf   :  { %v3329_v19 = vsel %vm3328_vm15, %v5313_v18, -1e+30  ;;  %v4205_v14 = vpop.f32.mrb[27].mxu1  ;;  %vm3568_vm15 = vcmask 15360  }
0x1ec0   :  { %v3330_v20 = vsel %vm3120_vm14, %v3329_v19, -inf }
0x1ec1   :  { %3331 = vmax.xlane.f32.xlu1 %v3330_v20 }
0x1f4b   :  { %v3123_v2 = vpop.xlane.xlu0 %3122 }
0x1f4c   :  { %vm3124_vm1 = vcmp.ge.f32.partialorder %v3119_v16, %v3123_v2 }
0x1f4d   :  { %v3125_v22 = vsel %vm3124_vm1, %v3017_v21, 6  ;;  %vm3570_vm1 = vcmask 23552  }
0x1f4e   :  { %v3126_v23 = vsel %vm3120_vm14, %v3125_v22, 2147483647  ;;  %v3332_v25 = vpop.xlane.xlu1 %3331 }
0x1f4f   :  { %vm3333_vm2 = vcmp.ge.f32.partialorder %v3329_v19, %v3332_v25  ;;  %v3128_v27 = vshra.s32 %v3126_v23, 16  ;;  %v3127_v32 = vand.u32 65535, %v3126_v23 }
0x1f50   :  { %v3334_v28 = vsel %vm3333_vm2, %v3017_v21, 6  ;;  %vm3572_vm2 = vcmask 31744  }
0x1f51   :  { %v3335_v29 = vsel %vm3120_vm14, %v3334_v28, 2147483647  ;;  %v3130_v30 = vcvt.s32.f32 %v3128_v27  ;;  %v3129_v35 = vcvt.s32.f32 %v3127_v32  ;;  %vm3588_vm14 = vcmask 261125  }
0x1f52   :  { %v3337_v26 = vshra.s32 %v3335_v29, 16  ;;  %v3336_v33 = vand.u32 65535, %v3335_v29 }
0x1f53   :  { %3131 = vmin.xlane.f32.xlu0 %v3130_v30 }
0x1f54   :  { %v3339_v31 = vcvt.s32.f32 %v3337_v26  ;;  %v3338_v39 = vcvt.s32.f32 %v3336_v33 }
0x1f57   :  { %3340 = vmin.xlane.f32.xlu0 %v3339_v31 }
0x1fe0   :  { %v3132_v34 = vpop.xlane.xlu0 %3131 }
0x1fe1   :  { %vm3133_vm3 = vcmp.eq.f32.partialorder %v3130_v30, %v3132_v34  ;;  %v3138_v40 = vcvt.f32.s32 %v3132_v34 }
0x1fe2   :  { %v3134_v36 = vsel %vm3133_vm3, %v3129_v35, inf  ;;  %vm3575_vm3 = vcmask 39936  }
0x1fe3   :  { %3135 = vmin.xlane.f32.xlu0 %v3134_v36  ;;  %v3139_v43 = vshll.u32 %v3138_v40, 16 }
0x1fe4   :  { %v3341_v38 = vpop.xlane.xlu0 %3340 }
0x1fe5   :  { %vm3342_vm4 = vcmp.eq.f32.partialorder %v3339_v31, %v3341_v38  ;;  %v3347_v58 = vcvt.f32.s32 %v3341_v38 }
0x1fe6   :  { %v3343_v37 = vsel %vm3342_vm4, %v3338_v39, inf }
0x1fe7   :  { %3344 = vmin.xlane.f32.xlu1 %v3343_v37  ;;  %v3348_v47 = vshll.u32 %v3347_v58, 16 }
0x1ff8   :  { %3353 = vrot.lane.b32.xlu1 %v5284_v45, %s5503_s28 }
0x1ff9   :  { %3144 = vrot.lane.b32.xlu0 %v5280_v48, %s5503_s28 }
0x1ffc   :  { %3525 = vrot.lane.b32.xlu1 %v5268_v11, %s4610_s6 }
0x1ffd   :  { %3533 = vrot.lane.b32.xlu0 %v5268_v11, %s5503_s28 }
0x2000   :  { %3544 = vrot.lane.b32.xlu1 %v5268_v11, %s4593_s11 }
0x2001   :  { %3596 = vrot.lane.b32.xlu0 %v5266_v44, %s5503_s28 }
0x2005   :  { %3610 = vrot.lane.b32.xlu0 %v5266_v44, %s4593_s11 }
0x2009   :  { %3584 = vrot.lane.b32.xlu0 %v5266_v44, %s4610_s6 }
0x2070   :  { %v3136_v42 = vpop.xlane.xlu0 %3135 }
0x2071   :  { %v3137_v57 = vcvt.f32.s32 %v3136_v42 }
0x2073   :  { %v3140_v13 = vadd.s32 %v3139_v43, %v3137_v57 }
0x2074   :  { %v3345_v24 = vpop.xlane.xlu1 %3344  ;;  %v3145_v46 = vpop.permute.xlu0 %3144 }
0x2075   :  { %vm3141_vm7 = vcmp.eq.s32.totalorder %v3017_v21, %v3140_v13  ;;  %v3346_v1 = vcvt.f32.s32 %v3345_v24  ;;  %4197 = vmatpush3.msk.msra.mxu0 %vm3150_vm6, %v3145_v46 }
0x2076   :  { %v3789_v48 = vsel %vm3141_vm7, 1.0, %v4606_v41  ;;  %4206 = vmatprep.subr.mxu0 %v4606_v41 }
0x2077   :  { %v3349_v49 = vadd.s32 %v3348_v47, %v3346_v1  ;;  %4199 = vmatmul.mubr.msk.f32.vlgmr.msra.gmra.mrb[30].mxu0 %vm3146_vm11, %v3789_v48 }
0x2078   :  { %v3354_v45 = vpop.permute.xlu1 %3353  ;;  %4208 = vmatprep.mubr.msk.f32.mxu0 %vm4607_vm8, %v4606_v41  ;;  %vm3433_vm8 = vcmask 1044480   ;;  %v3534_v10 = vpop.permute.xlu0 %3533 }
0x2079   :  { %vm3350_vm12 = vcmp.eq.s32.totalorder %v3017_v21, %v3349_v49  ;;  %4207 = vmatpush3.msk.msra.mxu0 %vm3150_vm6, %v3354_v45 }
0x207a   :  { %v3796_v50 = vsel %vm3350_vm12, 1.0, %v4606_v41 }
0x207b   :  { %4209 = vmatmul.mubr.msk.f32.vlgmr.msra.gmra.mrb[32].mxu0 %vm3146_vm11, %v3796_v50 }
0x207c   :  { %v3526_v9 = vpop.permute.xlu1 %3525  ;;  %v3597_v27 = vpop.permute.xlu0 %3596 }
0x2080   :  { %v3545_v20 = vpop.permute.xlu1 %3544  ;;  %v3611_v30 = vpop.permute.xlu0 %3610 }
0x2084   :  { %v3585_v32 = vpop.permute.xlu0 %3584 }
0x214a   :  { %v3219_v0 = vpop.f32.mrb[30].mxu0 }
0x214b   :  { %v4200_v3 = vpop.f32.mrb[31].mxu0 }
0x214e   :  { %v3426_v4 = vpop.f32.mrb[32].mxu0 }
0x214f   :  { %v3431_v5 = vrot.slane %v3426_v4, 3  ;;  %v4210_v52 = vpop.f32.mrb[33].mxu0 }
0x2151   :  { %v3434_v6 = vsel %vm3433_vm8, %v3219_v0, %v3431_v5 }
0x2152   :  { %3799 = vmatmul.mubr.msk.f32.vlgmr.msra.gmra.mrb[28].mxu1 %vm88_vm0, %v3434_v6 }
0x2153   :  { %3518 = vmatprep.mubr.f32.mxu1 %v4606_v41 }
0x2156   :  { %3800 = vmatmul.mubr.msk.f32.gmra.mrb[30].mxu1 %vm88_vm0, %v3431_v5  ;;  %vm3592_vm0 = vcmask 254976  }
0x2225   :  { %v3514_v15 = vpop.f32.mrb[28].mxu1 }
0x2226   :  { %v3536_v16 = vmul.f32 %v3534_v10, %v3514_v15  ;;  %v3516_v17 = vpop.f32.mrb[29].mxu1  ;;  %v3528_v19 = vmul.f32 %v3526_v9, %v3514_v15  ;;  %v3547_v2 = vmul.f32 %v3545_v20, %v3514_v15  ;;  %v3555_v25 = vmul.f32 %v3514_v15, %v5268_v11 }
0x2227   :  { %v3563_v41 = vmul.f32 %v3526_v9, %v3516_v17 }
0x2228   :  { %3538 = vrot.lane.b32.xlu0 %v3536_v16, %s4593_s11  ;;  %v3530_v14 = vsel %vm3529_vm13, %v3528_v19, 0.0  ;;  %v3589_v23 = vsel %vm3588_vm14, %v3528_v19, 0.0  ;;  %v3574_v16 = vsel %vm3146_vm11, %v5309_v12, 0.0 }
0x2229   :  { %3531 = vadd.xlane.f32.xlu1 %v3530_v14  ;;  %v3520_v21 = vpop.f32.mrb[30].mxu1  ;;  %v3564_v28 = vsel %vm3529_vm13, %v3563_v41, 0.0  ;;  %v3636_v42 = vsel %vm3588_vm14, %v3563_v41, 0.0 }
0x222a   :  { %v5374_v22 = vpop.f32.mrb[31].mxu1  ;;  %v3599_v29 = vmul.f32 %v3597_v27, %v3520_v21  ;;  %v3613_v26 = vmul.f32 %v3611_v30, %v3520_v21  ;;  %v3624_v31 = vmul.f32 %v3520_v21, %v5266_v44  ;;  %v3587_v33 = vmul.f32 %v3585_v32, %v3520_v21 }
0x222b   :  { %v3635_v10 = vmul.f32 %v3585_v32, %v5374_v22 }
0x222c   :  { %3549 = vrot.lane.b32.xlu0 %v3547_v2, %s5503_s28  ;;  %v3593_v11 = vsel %vm3592_vm0, %v3587_v33, 0.0 }
0x222d   :  { %3590 = vadd.xlane.f32.xlu1 %v3589_v23  ;;  %v3639_v15 = vsel %vm3592_vm0, %v3635_v10, 0.0 }
0x2230   :  { %3557 = vrot.lane.b32.xlu0 %v3555_v25, %s4610_s6 }
0x2231   :  { %3565 = vadd.xlane.f32.xlu1 %v3564_v28  ;;  %v3650_v28 = vsel %vm3146_vm11, %v5313_v18, 0.0 }
0x2234   :  { %3601 = vrot.lane.b32.xlu0 %v3599_v29, %s4593_s11 }
0x2238   :  { %3615 = vrot.lane.b32.xlu0 %v3613_v26, %s5503_s28 }
0x223c   :  { %3626 = vrot.lane.b32.xlu0 %v3624_v31, %s4610_s6 }
0x225b   :  { %3594 = vadd.xlane.f32.xlu0 %v3593_v11 }
0x229a   :  { %v3539_v34 = vpop.permute.xlu0 %3538 }
0x229b   :  { %v3541_v35 = vsel %vm3529_vm13, %v3539_v34, 0.0  ;;  %v3604_v37 = vsel %vm3588_vm14, %v3539_v34, 0.0 }
0x229c   :  { %3542 = vadd.xlane.f32.xlu0 %v3541_v35 }
0x229e   :  { %v3550_v36 = vpop.permute.xlu0 %3549 }
0x229f   :  { %v3552_v38 = vsel %vm3529_vm13, %v3550_v36, 0.0  ;;  %v3618_v40 = vsel %vm3588_vm14, %v3550_v36, 0.0 }
0x22a0   :  { %3553 = vadd.xlane.f32.xlu1 %v3552_v38 }
0x22a2   :  { %v3558_v39 = vpop.permute.xlu0 %3557 }
0x22a3   :  { %v3560_v44 = vsel %vm3529_vm13, %v3558_v39, 0.0  ;;  %v3629_v58 = vsel %vm3588_vm14, %v3558_v39, 0.0 }
0x22a4   :  { %3605 = vadd.xlane.f32.xlu1 %v3604_v37  ;;  %3561 = vadd.xlane.f32.xlu0 %v3560_v44 }
0x22a6   :  { %v3602_v43 = vpop.permute.xlu0 %3601 }
0x22a7   :  { %v3607_v13 = vsel %vm3592_vm0, %v3602_v43, 0.0 }
0x22a8   :  { %3619 = vadd.xlane.f32.xlu1 %v3618_v40  ;;  %3637 = vadd.xlane.f32.xlu0 %v3636_v42 }
0x22aa   :  { %v3616_v57 = vpop.permute.xlu0 %3615 }
0x22ab   :  { %v3621_v24 = vsel %vm3592_vm0, %v3616_v57, 0.0 }
0x22ac   :  { %3630 = vadd.xlane.f32.xlu1 %v3629_v58 }
0x22ae   :  { %v3627_v46 = vpop.permute.xlu0 %3626 }
0x22af   :  { %v3632_v47 = vsel %vm3592_vm0, %v3627_v46, 0.0 }
0x22b0   :  { %3608 = vadd.xlane.f32.xlu1 %v3607_v13 }
0x22b4   :  { %3622 = vadd.xlane.f32.xlu1 %v3621_v24 }
0x22b6   :  { %v3532_v1 = vpop.xlane.xlu1 %3531 }
0x22b8   :  { %3633 = vadd.xlane.f32.xlu1 %v3632_v47 }
0x22ba   :  { %v3591_v48 = vpop.xlane.xlu1 %3590 }
0x22be   :  { %v3566_v49 = vpop.xlane.xlu1 %3565 }
0x22e8   :  { %v3595_v45 = vpop.xlane.xlu0 %3594 }
0x2329   :  { %v3543_v50 = vpop.xlane.xlu0 %3542 }
0x232a   :  { %v3567_v53 = vsel %vm3110_vm10, %v3532_v1, %v3543_v50 }
0x232d   :  { %v3554_v51 = vpop.xlane.xlu1 %3553 }
0x232e   :  { %v3569_v54 = vsel %vm3568_vm15, %v3567_v53, %v3554_v51 }
0x2331   :  { %v3606_v55 = vpop.xlane.xlu1 %3605  ;;  %v3562_v56 = vpop.xlane.xlu0 %3561 }
0x2332   :  { %v3571_v59 = vsel %vm3570_vm1, %v3569_v54, %v3562_v56  ;;  %v3642_v62 = vsel %vm3110_vm10, %v3591_v48, %v3606_v55 }
0x2333   :  { %v3573_v60 = vsel %vm3572_vm2, %v3571_v59, %v3566_v49 }
0x2334   :  { %v3576_v61 = vsel %vm3575_vm3, %v3573_v60, 0.0 }
0x2335   :  { %v3620_v63 = vpop.xlane.xlu1 %3619  ;;  %3578 = vrot.lane.b32.xlu1 %v3576_v61, %s5503_s28  ;;  %v3638_v20 = vpop.xlane.xlu0 %3637 }
0x2336   :  { %v3644_v8 = vsel %vm3568_vm15, %v3642_v62, %v3620_v63 }
0x2339   :  { %v3631_v7 = vpop.xlane.xlu1 %3630 }
0x233a   :  { %v3646_v0 = vsel %vm3570_vm1, %v3644_v8, %v3631_v7 }
0x233b   :  { %v3648_v21 = vsel %vm3572_vm2, %v3646_v0, %v3638_v20 }
0x233c   :  { %v3651_v2 = vsel %vm3575_vm3, %v3648_v21, 0.0 }
0x233d   :  { %v3609_v3 = vpop.xlane.xlu1 %3608  ;;  %v3655_v12 = vrot.slane %v3651_v2, 5 }
0x233e   :  { %v3643_v4 = vsel %vm3110_vm10, %v3595_v45, %v3609_v3 }
0x2341   :  { %v3623_v5 = vpop.xlane.xlu1 %3622 }
0x2342   :  { %v3645_v52 = vsel %vm3568_vm15, %v3643_v4, %v3623_v5 }
0x2345   :  { %v3634_v6 = vpop.xlane.xlu1 %3633 }
0x2346   :  { %v3647_v9 = vsel %vm3570_vm1, %v3645_v52, %v3634_v6 }
0x2359   :  { %3640 = vadd.xlane.f32.xlu1 %v3639_v15 }
0x23a7   :  { %v3579_v17 = vpop.permute.xlu1 %3578 }
0x23a8   :  { %v3581_v19 = vsel %vm1312_vm5, %v3574_v16, %v3579_v17 }
0x23a9   :  { %v3582_v14 = vsel %vm3433_vm8, %v3581_v19, 0.0 }
0x23aa   :  { %3583 = vst [vmem:[%s5455_s25] sm:$0xff] %v3582_v14 }
0x23e6   :  { %v3641_v22 = vpop.xlane.xlu1 %3640 }
0x23e7   :  { %v3649_v41 = vsel %vm3572_vm2, %v3647_v9, %v3641_v22 }
0x23e8   :  { %v3652_v23 = vsel %vm3575_vm3, %v3649_v41, 0.0 }
0x23e9   :  { %v3656_v25 = vrot.slane %v3652_v23, 5 }
0x23eb   :  { %v3657_v27 = vsel %vm3230_vm9, %v3655_v12, %v3656_v25 }
0x23ec   :  { %3658 = vrot.lane.b32.xlu0 %v3657_v27, %s5503_s28 }
0x245e   :  { %v3659_v29 = vpop.permute.xlu0 %3658 }
0x245f   :  { %v3661_v30 = vsel %vm1312_vm5, %v3650_v28, %v3659_v29 }
0x2460   :  { %v3662_v26 = vsel %vm3433_vm8, %v3661_v30, 0.0 }
0x2461   :  { %3801 = vst [vmem:[%s5455_s25 + $0x8] sm:$0xff] %v3662_v26 }

</bundles_post_ra>
